<compile_context>
chip_gen: v7x
topology: tpu7x:2x2x1
jax: 0.10.0
libtpu: 0.0.40
codegen_flags: <defaults>
</compile_context>

<pallas_src>
import functools

import jax
import jax.numpy as jnp
from jax.experimental import pallas as pl
from jax.experimental.pallas import tpu as pltpu

LANE = 128


def _round_up(x, m):
    return ((x + m - 1) // m) * m


# ----------------------------------------------------------------------------
# Pallas kernel: 3x3 conv (pad=1, stride=1) + folded BatchNorm + ReLU
# ----------------------------------------------------------------------------
def _conv3x3_bn_relu_kernel(x_ref, w_ref, scale_ref, bias_ref, o_ref, acc_ref):
    # x_ref     : (1, 3*Hp, W, tk) bf16  kw-pre-shifted, spatially padded input slabs
    # w_ref     : (9, tk, tn)      bf16  3x3 kernel tile flattened over (kh, kw)
    # scale_ref : (1, tn)          f32   gamma / sqrt(var + eps)
    # bias_ref  : (1, tn)          f32   beta - mean * scale
    # o_ref     : (1, H, W, tn)
    # acc_ref   : (H*W, tn)        f32   VMEM accumulator, resident across Cin axis
    H = o_ref.shape[1]
    W = o_ref.shape[2]
    tn = o_ref.shape[3]
    tk = x_ref.shape[-1]
    Hp = H + 2
    k = pl.program_id(2)

    @pl.when(k == 0)
    def _():
        acc_ref[...] = jnp.zeros_like(acc_ref)

    # 9 taps as MXU matmuls.  All slices below are static offsets on OUTER dims of
    # the ref (kw slab + kh row window); the (H, W, tk)->(H*W, tk) reshape merges an
    # outer dim with an 8-aligned sublane dim, so no relayout copies are generated.
    for kw in range(3):
        base = kw * Hp
        for kh in range(3):
            patch = x_ref[0, base + kh:base + kh + H, :, :].reshape(H * W, tk)
            acc_ref[...] += jnp.dot(patch, w_ref[kh * 3 + kw],
                                    preferred_element_type=jnp.float32)

    @pl.when(k == pl.num_programs(2) - 1)
    def _():
        y = acc_ref[...] * scale_ref[...] + bias_ref[...]   # folded BatchNorm (1 FMA)
        y = jnp.maximum(y, 0.0)                             # ReLU
        o_ref[0] = y.reshape(H, W, tn).astype(o_ref.dtype)


def conv3x3_bn_relu(x_nhwc, w, scale, bias, *, out_dtype, tn=256, tk=256):
    """x_nhwc: (B,H,W,Cin) bf16; w: (9,Cin,Cout) bf16; scale/bias: (1,Cout) f32.
    Cin and Cout must be multiples of 128.  Returns (B,H,W,Cout) in out_dtype."""
    B, H, W, Cin = x_nhwc.shape
    Cout = w.shape[-1]
    Hp = H + 2

    tn = tn if Cout % tn == 0 else LANE
    tk = tk if Cin % tk == 0 else LANE

    # Spatial pad + partial im2col: 3 width-shifted copies so the kernel never
    # slices the sublane (W) axis at a non-aligned offset.
    xp = jnp.pad(x_nhwc, ((0, 0), (1, 1), (1, 1), (0, 0)))
    xs = jnp.stack([xp[:, :, kw:kw + W, :] for kw in range(3)], axis=1)
    xs = xs.reshape(B, 3 * Hp, W, Cin)

    grid = (B, Cout // tn, Cin // tk)

    out_bytes = jnp.dtype(out_dtype).itemsize
    x_blk = 3 * Hp * W * tk * 2
    w_blk = 9 * tk * tn * 2
    o_blk = H * W * tn * out_bytes
    acc_bytes = H * W * tn * 4
    vmem_est = 2 * (x_blk + w_blk + o_blk) + acc_bytes + (4 << 20)
    vmem_limit = int(min(max(vmem_est, 32 << 20), 48 << 20))

    cost = pl.CostEstimate(
        flops=2 * B * H * W * 9 * Cin * Cout,
        transcendentals=0,
        bytes_accessed=int(xs.size) * 2 + int(w.size) * 2
                       + (int(scale.size) + int(bias.size)) * 4
                       + B * H * W * Cout * out_bytes)

    return pl.pallas_call(
        _conv3x3_bn_relu_kernel,
        out_shape=jax.ShapeDtypeStruct((B, H, W, Cout), out_dtype),
        grid=grid,
        in_specs=[
            pl.BlockSpec((1, 3 * Hp, W, tk), lambda b, n, k: (b, 0, 0, k)),
            pl.BlockSpec((9, tk, tn), lambda b, n, k: (0, k, n)),
            pl.BlockSpec((1, tn), lambda b, n, k: (0, n)),
            pl.BlockSpec((1, tn), lambda b, n, k: (0, n)),
        ],
        out_specs=pl.BlockSpec((1, H, W, tn), lambda b, n, k: (b, 0, 0, n)),
        scratch_shapes=[pltpu.VMEM((H * W, tn), jnp.float32)],
        compiler_params=pltpu.CompilerParams(
            dimension_semantics=("parallel", "parallel", "arbitrary"),
            vmem_limit_bytes=vmem_limit),
        cost_estimate=cost,
    )(xs, w, scale, bias)


# ----------------------------------------------------------------------------
# Glue: bilinear 2x upsample with align_corners=True (matches F.upsample)
# ----------------------------------------------------------------------------
def upsample2x_bilinear_align_corners(x):  # x: (B, H, W, C)
    B, H, W, C = x.shape
    Ho, Wo = 2 * H, 2 * W

    def coords(n_in, n_out):
        if n_out == 1 or n_in == 1:
            z = jnp.zeros((n_out,), jnp.int32)
            return z, z, jnp.zeros((n_out,), jnp.float32)
        src = jnp.arange(n_out, dtype=jnp.float32) * ((n_in - 1) / (n_out - 1))
        i0 = jnp.clip(jnp.floor(src).astype(jnp.int32), 0, n_in - 1)
        i1 = jnp.clip(i0 + 1, 0, n_in - 1)
        return i0, i1, src - i0.astype(jnp.float32)

    y0, y1, wy = coords(H, Ho)
    x0, x1, wx = coords(W, Wo)
    rows = (x[:, y0, :, :] * (1.0 - wy)[None, :, None, None]
            + x[:, y1, :, :] * wy[None, :, None, None])
    out = (rows[:, :, x0, :] * (1.0 - wx)[None, None, :, None]
           + rows[:, :, x1, :] * wx[None, None, :, None])
    return out


# ----------------------------------------------------------------------------
# Parameters (deterministic synthetic init; BN folded; channels padded to 128)
# ----------------------------------------------------------------------------
def init_params(key, in_channels, channels, out_channels, eps=1e-5):
    ks = jax.random.split(key, 10)
    cin_p = _round_up(in_channels, LANE)
    c1_p = _round_up(channels, LANE)
    c2_p = _round_up(out_channels, LANE)

    def bn_fold(gamma, beta, rmean, rvar):
        s = gamma / jnp.sqrt(rvar + eps)
        return s, beta - rmean * s

    def pad_w(w, cin_pad, cout_pad):
        # (3,3,cin,cout) -> zero-pad channels -> (9, cin_pad, cout_pad) bf16
        w = jnp.pad(w, ((0, 0), (0, 0),
                        (0, cin_pad - w.shape[2]), (0, cout_pad - w.shape[3])))
        return w.reshape(9, cin_pad, cout_pad).astype(jnp.bfloat16)

    def pad_vec(v, cpad, fill):
        return jnp.pad(v, (0, cpad - v.shape[0]),
                       constant_values=fill).reshape(1, cpad).astype(jnp.float32)

    w1 = (jax.random.normal(ks[0], (3, 3, in_channels, channels), jnp.float32)
          * (1.0 / jnp.sqrt(9.0 * in_channels)))
    g1 = 1.0 + 0.1 * jax.random.normal(ks[1], (channels,), jnp.float32)
    b1 = 0.1 * jax.random.normal(ks[2], (channels,), jnp.float32)
    m1 = 0.05 * jax.random.normal(ks[3], (channels,), jnp.float32)
    v1 = 1.0 + 0.1 * jnp.abs(jax.random.normal(ks[4], (channels,), jnp.float32))
    s1, bb1 = bn_fold(g1, b1, m1, v1)

    w2 = (jax.random.normal(ks[5], (3, 3, channels, out_channels), jnp.float32)
          * (1.0 / jnp.sqrt(9.0 * channels)))
    g2 = 1.0 + 0.1 * jax.random.normal(ks[6], (out_channels,), jnp.float32)
    b2 = 0.1 * jax.random.normal(ks[7], (out_channels,), jnp.float32)
    m2 = 0.05 * jax.random.normal(ks[8], (out_channels,), jnp.float32)
    v2 = 1.0 + 0.1 * jnp.abs(jax.random.normal(ks[9], (out_channels,), jnp.float32))
    s2, bb2 = bn_fold(g2, b2, m2, v2)

    # Padded output channels of conv1 get zero weights + zero bias -> exact zeros,
    # and conv2's zero-padded input-channel weights ignore them.  No slicing needed
    # between the two convs; only the final public output is sliced back.
    return dict(
        w1=pad_w(w1, cin_p, c1_p),
        scale1=pad_vec(s1, c1_p, 1.0), bias1=pad_vec(bb1, c1_p, 0.0),
        w2=pad_w(w2, c1_p, c2_p),
        scale2=pad_vec(s2, c2_p, 1.0), bias2=pad_vec(bb2, c2_p, 0.0),
    )


# ----------------------------------------------------------------------------
# Decoder_Resnet50 forward (defaults: convT_channels=0, SE=False)
# ----------------------------------------------------------------------------
@functools.partial(jax.jit, static_argnames=("out_channels",))
def decoder_resnet50_forward(x_nchw, skip_nchw, params, out_channels):
    x = jnp.transpose(x_nchw, (0, 2, 3, 1))        # NCHW -> NHWC (public boundary)
    skip = jnp.transpose(skip_nchw, (0, 2, 3, 1))
    x = upsample2x_bilinear_align_corners(x)       # F.upsample(..., align_corners=True)
    x = jnp.concatenate([x, skip], axis=-1)        # torch.cat([x, skip], dim=1)
    cin_pad = params["w1"].shape[1]
    if x.shape[-1] < cin_pad:                      # lane-pad channels to 128 multiple
        x = jnp.pad(x, ((0, 0), (0, 0), (0, 0), (0, cin_pad - x.shape[-1])))
    x = x.astype(jnp.bfloat16)
    x = conv3x3_bn_relu(x, params["w1"], params["scale1"], params["bias1"],
                        out_dtype=jnp.bfloat16)
    x = conv3x3_bn_relu(x, params["w2"], params["scale2"], params["bias2"],
                        out_dtype=jnp.float32)
    x = x[..., :out_channels]                      # drop channel padding
    return jnp.transpose(x, (0, 3, 1, 2))          # back to NCHW for PyTorch parity


if __name__ == "__main__":
    key = jax.random.PRNGKey(0)
    kx, ksk, kp = jax.random.split(key, 3)

    B, Cx, H, W = 2, 4, 8, 8          # low-res feature map (upsampled to 16x16)
    Cskip = 4                          # skip connection at 16x16
    in_channels = Cx + Cskip           # channels after concat
    channels = 8
    out_channels = 8

    x = jax.random.normal(kx, (B, Cx, H, W), jnp.float32)
    skip = jax.random.normal(ksk, (B, Cskip, 2 * H, 2 * W), jnp.float32)
    params = init_params(kp, in_channels, channels, out_channels)

    out = decoder_resnet50_forward(x, skip, params, out_channels)
    out = jax.block_until_ready(out)
    assert out.shape == (B, out_channels, 2 * H, 2 * W), out.shape
    assert bool(jnp.all(jnp.isfinite(out)))
    print("KERNEL_OK")
</pallas_src>

<mosaic_0001>
module attributes {stable_mosaic.version = 11 : i64} {
  func.func @_conv3x3_bn_relu_kernel(%arg0: i32, %arg1: i32, %arg2: i32, %arg3: memref<1x54x16x128xbf16, #tpu.memory_space<vmem>>, %arg4: memref<9x128x128xbf16, #tpu.memory_space<vmem>>, %arg5: memref<1x128xf32, #tpu.memory_space<vmem>>, %arg6: memref<1x128xf32, #tpu.memory_space<vmem>>, %arg7: memref<1x16x16x128xbf16, #tpu.memory_space<vmem>>, %arg8: memref<256x128xf32, #tpu.memory_space<vmem>>) attributes {dimension_semantics = [#tpu.dimension_semantics<parallel>, #tpu.dimension_semantics<parallel>, #tpu.dimension_semantics<arbitrary>], iteration_bounds = array<i64: 2, 1, 1>, scalar_prefetch = 0 : i64, scratch_operands = 1 : i64, tpu.core_type = #tpu.core_type<tc>, window_params = [{transform_indices = @transform_0, window_bounds = array<i64: 1, 54, 16, 128>}, {transform_indices = @transform_1, window_bounds = array<i64: 9, 128, 128>}, {transform_indices = @transform_2, window_bounds = array<i64: 1, 128>}, {transform_indices = @transform_3, window_bounds = array<i64: 1, 128>}, {transform_indices = @transform_4, window_bounds = array<i64: 1, 16, 16, 128>}]} {
    %c0_i32 = arith.constant 0 : i32
    %0 = arith.cmpi eq, %arg2, %c0_i32 : i32
    %1 = arith.extui %0 : i1 to i32
    %c0_i32_0 = arith.constant 0 : i32
    %2 = arith.cmpi ne, %1, %c0_i32_0 : i32
    scf.if %2 {
      %cst_95 = arith.constant 0.000000e+00 : f32
      %87 = vector.broadcast %cst_95 : f32 to vector<256x128xf32>
      %c0_96 = arith.constant 0 : index
      %c0_97 = arith.constant 0 : index
      %88 = vector.load %arg8[%c0_96, %c0_97] : memref<256x128xf32, #tpu.memory_space<vmem>>, vector<256x128xf32>
      tpu.vector_store %arg8[%c0_96, %c0_97], %87 {strides = array<i32>} : memref<256x128xf32, #tpu.memory_space<vmem>>, vector<256x128xf32>,
    } else {
    }
    %c0 = arith.constant 0 : index
    %c0_1 = arith.constant 0 : index
    %c0_2 = arith.constant 0 : index
    %c0_3 = arith.constant 0 : index
    %3 = vector.load %arg3[%c0, %c0_1, %c0_2, %c0_3] : memref<1x54x16x128xbf16, #tpu.memory_space<vmem>>, vector<1x16x16x128xbf16>
    %4 = vector.shape_cast %3 : vector<1x16x16x128xbf16> to vector<16x16x128xbf16>
    %5 = vector.shape_cast %4 : vector<16x16x128xbf16> to vector<256x128xbf16>
    %c0_4 = arith.constant 0 : index
    %c0_5 = arith.constant 0 : index
    %6 = vector.load %arg8[%c0_4, %c0_5] : memref<256x128xf32, #tpu.memory_space<vmem>>, vector<256x128xf32>
    %c0_6 = arith.constant 0 : index
    %c0_7 = arith.constant 0 : index
    %c0_8 = arith.constant 0 : index
    %7 = vector.load %arg4[%c0_6, %c0_7, %c0_8] : memref<9x128x128xbf16, #tpu.memory_space<vmem>>, vector<1x128x128xbf16>
    %8 = vector.shape_cast %7 : vector<1x128x128xbf16> to vector<128x128xbf16>
    %cst = arith.constant dense<0.000000e+00> : vector<256x128xf32>
    %9 = tpu.matmul %5, %8, %cst {dimension_numbers = #tpu.dot_dimension_numbers<[1], [0], [0], [1], [0, 0, 1, 1], [], []>} : vector<256x128xbf16>, vector<128x128xbf16>, vector<256x128xf32> -> vector<256x128xf32>
    %10 = arith.addf %6, %9 : vector<256x128xf32>
    %c0_9 = arith.constant 0 : index
    %c0_10 = arith.constant 0 : index
    %11 = vector.load %arg8[%c0_9, %c0_10] : memref<256x128xf32, #tpu.memory_space<vmem>>, vector<256x128xf32>
    tpu.vector_store %arg8[%c0_9, %c0_10], %10 {strides = array<i32>} : memref<256x128xf32, #tpu.memory_space<vmem>>, vector<256x128xf32>,
    %c0_11 = arith.constant 0 : index
    %c1 = arith.constant 1 : index
    %c0_12 = arith.constant 0 : index
    %c0_13 = arith.constant 0 : index
    %12 = vector.load %arg3[%c0_11, %c1, %c0_12, %c0_13] : memref<1x54x16x128xbf16, #tpu.memory_space<vmem>>, vector<1x16x16x128xbf16>
    %13 = vector.shape_cast %12 : vector<1x16x16x128xbf16> to vector<16x16x128xbf16>
    %14 = vector.shape_cast %13 : vector<16x16x128xbf16> to vector<256x128xbf16>
    %c0_14 = arith.constant 0 : index
    %c0_15 = arith.constant 0 : index
    %15 = vector.load %arg8[%c0_14, %c0_15] : memref<256x128xf32, #tpu.memory_space<vmem>>, vector<256x128xf32>
    %c3 = arith.constant 3 : index
    %c0_16 = arith.constant 0 : index
    %c0_17 = arith.constant 0 : index
    %16 = vector.load %arg4[%c3, %c0_16, %c0_17] : memref<9x128x128xbf16, #tpu.memory_space<vmem>>, vector<1x128x128xbf16>
    %17 = vector.shape_cast %16 : vector<1x128x128xbf16> to vector<128x128xbf16>
    %cst_18 = arith.constant dense<0.000000e+00> : vector<256x128xf32>
    %18 = tpu.matmul %14, %17, %cst_18 {dimension_numbers = #tpu.dot_dimension_numbers<[1], [0], [0], [1], [0, 0, 1, 1], [], []>} : vector<256x128xbf16>, vector<128x128xbf16>, vector<256x128xf32> -> vector<256x128xf32>
    %19 = arith.addf %15, %18 : vector<256x128xf32>
    %c0_19 = arith.constant 0 : index
    %c0_20 = arith.constant 0 : index
    %20 = vector.load %arg8[%c0_19, %c0_20] : memref<256x128xf32, #tpu.memory_space<vmem>>, vector<256x128xf32>
    tpu.vector_store %arg8[%c0_19, %c0_20], %19 {strides = array<i32>} : memref<256x128xf32, #tpu.memory_space<vmem>>, vector<256x128xf32>,
    %c0_21 = arith.constant 0 : index
    %c2 = arith.constant 2 : index
    %c0_22 = arith.constant 0 : index
    %c0_23 = arith.constant 0 : index
    %21 = vector.load %arg3[%c0_21, %c2, %c0_22, %c0_23] : memref<1x54x16x128xbf16, #tpu.memory_space<vmem>>, vector<1x16x16x128xbf16>
    %22 = vector.shape_cast %21 : vector<1x16x16x128xbf16> to vector<16x16x128xbf16>
    %23 = vector.shape_cast %22 : vector<16x16x128xbf16> to vector<256x128xbf16>
    %c0_24 = arith.constant 0 : index
    %c0_25 = arith.constant 0 : index
    %24 = vector.load %arg8[%c0_24, %c0_25] : memref<256x128xf32, #tpu.memory_space<vmem>>, vector<256x128xf32>
    %c6 = arith.constant 6 : index
    %c0_26 = arith.constant 0 : index
    %c0_27 = arith.constant 0 : index
    %25 = vector.load %arg4[%c6, %c0_26, %c0_27] : memref<9x128x128xbf16, #tpu.memory_space<vmem>>, vector<1x128x128xbf16>
    %26 = vector.shape_cast %25 : vector<1x128x128xbf16> to vector<128x128xbf16>
    %cst_28 = arith.constant dense<0.000000e+00> : vector<256x128xf32>
    %27 = tpu.matmul %23, %26, %cst_28 {dimension_numbers = #tpu.dot_dimension_numbers<[1], [0], [0], [1], [0, 0, 1, 1], [], []>} : vector<256x128xbf16>, vector<128x128xbf16>, vector<256x128xf32> -> vector<256x128xf32>
    %28 = arith.addf %24, %27 : vector<256x128xf32>
    %c0_29 = arith.constant 0 : index
    %c0_30 = arith.constant 0 : index
    %29 = vector.load %arg8[%c0_29, %c0_30] : memref<256x128xf32, #tpu.memory_space<vmem>>, vector<256x128xf32>
    tpu.vector_store %arg8[%c0_29, %c0_30], %28 {strides = array<i32>} : memref<256x128xf32, #tpu.memory_space<vmem>>, vector<256x128xf32>,
    %c0_31 = arith.constant 0 : index
    %c18 = arith.constant 18 : index
    %c0_32 = arith.constant 0 : index
    %c0_33 = arith.constant 0 : index
    %30 = vector.load %arg3[%c0_31, %c18, %c0_32, %c0_33] : memref<1x54x16x128xbf16, #tpu.memory_space<vmem>>, vector<1x16x16x128xbf16>
    %31 = vector.shape_cast %30 : vector<1x16x16x128xbf16> to vector<16x16x128xbf16>
    %32 = vector.shape_cast %31 : vector<16x16x128xbf16> to vector<256x128xbf16>
    %c0_34 = arith.constant 0 : index
    %c0_35 = arith.constant 0 : index
    %33 = vector.load %arg8[%c0_34, %c0_35] : memref<256x128xf32, #tpu.memory_space<vmem>>, vector<256x128xf32>
    %c1_36 = arith.constant 1 : index
    %c0_37 = arith.constant 0 : index
    %c0_38 = arith.constant 0 : index
    %34 = vector.load %arg4[%c1_36, %c0_37, %c0_38] : memref<9x128x128xbf16, #tpu.memory_space<vmem>>, vector<1x128x128xbf16>
    %35 = vector.shape_cast %34 : vector<1x128x128xbf16> to vector<128x128xbf16>
    %cst_39 = arith.constant dense<0.000000e+00> : vector<256x128xf32>
    %36 = tpu.matmul %32, %35, %cst_39 {dimension_numbers = #tpu.dot_dimension_numbers<[1], [0], [0], [1], [0, 0, 1, 1], [], []>} : vector<256x128xbf16>, vector<128x128xbf16>, vector<256x128xf32> -> vector<256x128xf32>
    %37 = arith.addf %33, %36 : vector<256x128xf32>
    %c0_40 = arith.constant 0 : index
    %c0_41 = arith.constant 0 : index
    %38 = vector.load %arg8[%c0_40, %c0_41] : memref<256x128xf32, #tpu.memory_space<vmem>>, vector<256x128xf32>
    tpu.vector_store %arg8[%c0_40, %c0_41], %37 {strides = array<i32>} : memref<256x128xf32, #tpu.memory_space<vmem>>, vector<256x128xf32>,
    %c0_42 = arith.constant 0 : index
    %c19 = arith.constant 19 : index
    %c0_43 = arith.constant 0 : index
    %c0_44 = arith.constant 0 : index
    %39 = vector.load %arg3[%c0_42, %c19, %c0_43, %c0_44] : memref<1x54x16x128xbf16, #tpu.memory_space<vmem>>, vector<1x16x16x128xbf16>
    %40 = vector.shape_cast %39 : vector<1x16x16x128xbf16> to vector<16x16x128xbf16>
    %41 = vector.shape_cast %40 : vector<16x16x128xbf16> to vector<256x128xbf16>
    %c0_45 = arith.constant 0 : index
    %c0_46 = arith.constant 0 : index
    %42 = vector.load %arg8[%c0_45, %c0_46] : memref<256x128xf32, #tpu.memory_space<vmem>>, vector<256x128xf32>
    %c4 = arith.constant 4 : index
    %c0_47 = arith.constant 0 : index
    %c0_48 = arith.constant 0 : index
    %43 = vector.load %arg4[%c4, %c0_47, %c0_48] : memref<9x128x128xbf16, #tpu.memory_space<vmem>>, vector<1x128x128xbf16>
    %44 = vector.shape_cast %43 : vector<1x128x128xbf16> to vector<128x128xbf16>
    %cst_49 = arith.constant dense<0.000000e+00> : vector<256x128xf32>
    %45 = tpu.matmul %41, %44, %cst_49 {dimension_numbers = #tpu.dot_dimension_numbers<[1], [0], [0], [1], [0, 0, 1, 1], [], []>} : vector<256x128xbf16>, vector<128x128xbf16>, vector<256x128xf32> -> vector<256x128xf32>
    %46 = arith.addf %42, %45 : vector<256x128xf32>
    %c0_50 = arith.constant 0 : index
    %c0_51 = arith.constant 0 : index
    %47 = vector.load %arg8[%c0_50, %c0_51] : memref<256x128xf32, #tpu.memory_space<vmem>>, vector<256x128xf32>
    tpu.vector_store %arg8[%c0_50, %c0_51], %46 {strides = array<i32>} : memref<256x128xf32, #tpu.memory_space<vmem>>, vector<256x128xf32>,
    %c0_52 = arith.constant 0 : index
    %c20 = arith.constant 20 : index
    %c0_53 = arith.constant 0 : index
    %c0_54 = arith.constant 0 : index
    %48 = vector.load %arg3[%c0_52, %c20, %c0_53, %c0_54] : memref<1x54x16x128xbf16, #tpu.memory_space<vmem>>, vector<1x16x16x128xbf16>
    %49 = vector.shape_cast %48 : vector<1x16x16x128xbf16> to vector<16x16x128xbf16>
    %50 = vector.shape_cast %49 : vector<16x16x128xbf16> to vector<256x128xbf16>
    %c0_55 = arith.constant 0 : index
    %c0_56 = arith.constant 0 : index
    %51 = vector.load %arg8[%c0_55, %c0_56] : memref<256x128xf32, #tpu.memory_space<vmem>>, vector<256x128xf32>
    %c7 = arith.constant 7 : index
    %c0_57 = arith.constant 0 : index
    %c0_58 = arith.constant 0 : index
    %52 = vector.load %arg4[%c7, %c0_57, %c0_58] : memref<9x128x128xbf16, #tpu.memory_space<vmem>>, vector<1x128x128xbf16>
    %53 = vector.shape_cast %52 : vector<1x128x128xbf16> to vector<128x128xbf16>
    %cst_59 = arith.constant dense<0.000000e+00> : vector<256x128xf32>
    %54 = tpu.matmul %50, %53, %cst_59 {dimension_numbers = #tpu.dot_dimension_numbers<[1], [0], [0], [1], [0, 0, 1, 1], [], []>} : vector<256x128xbf16>, vector<128x128xbf16>, vector<256x128xf32> -> vector<256x128xf32>
    %55 = arith.addf %51, %54 : vector<256x128xf32>
    %c0_60 = arith.constant 0 : index
    %c0_61 = arith.constant 0 : index
    %56 = vector.load %arg8[%c0_60, %c0_61] : memref<256x128xf32, #tpu.memory_space<vmem>>, vector<256x128xf32>
    tpu.vector_store %arg8[%c0_60, %c0_61], %55 {strides = array<i32>} : memref<256x128xf32, #tpu.memory_space<vmem>>, vector<256x128xf32>,
    %c0_62 = arith.constant 0 : index
    %c36 = arith.constant 36 : index
    %c0_63 = arith.constant 0 : index
    %c0_64 = arith.constant 0 : index
    %57 = vector.load %arg3[%c0_62, %c36, %c0_63, %c0_64] : memref<1x54x16x128xbf16, #tpu.memory_space<vmem>>, vector<1x16x16x128xbf16>
    %58 = vector.shape_cast %57 : vector<1x16x16x128xbf16> to vector<16x16x128xbf16>
    %59 = vector.shape_cast %58 : vector<16x16x128xbf16> to vector<256x128xbf16>
    %c0_65 = arith.constant 0 : index
    %c0_66 = arith.constant 0 : index
    %60 = vector.load %arg8[%c0_65, %c0_66] : memref<256x128xf32, #tpu.memory_space<vmem>>, vector<256x128xf32>
    %c2_67 = arith.constant 2 : index
    %c0_68 = arith.constant 0 : index
    %c0_69 = arith.constant 0 : index
    %61 = vector.load %arg4[%c2_67, %c0_68, %c0_69] : memref<9x128x128xbf16, #tpu.memory_space<vmem>>, vector<1x128x128xbf16>
    %62 = vector.shape_cast %61 : vector<1x128x128xbf16> to vector<128x128xbf16>
    %cst_70 = arith.constant dense<0.000000e+00> : vector<256x128xf32>
    %63 = tpu.matmul %59, %62, %cst_70 {dimension_numbers = #tpu.dot_dimension_numbers<[1], [0], [0], [1], [0, 0, 1, 1], [], []>} : vector<256x128xbf16>, vector<128x128xbf16>, vector<256x128xf32> -> vector<256x128xf32>
    %64 = arith.addf %60, %63 : vector<256x128xf32>
    %c0_71 = arith.constant 0 : index
    %c0_72 = arith.constant 0 : index
    %65 = vector.load %arg8[%c0_71, %c0_72] : memref<256x128xf32, #tpu.memory_space<vmem>>, vector<256x128xf32>
    tpu.vector_store %arg8[%c0_71, %c0_72], %64 {strides = array<i32>} : memref<256x128xf32, #tpu.memory_space<vmem>>, vector<256x128xf32>,
    %c0_73 = arith.constant 0 : index
    %c37 = arith.constant 37 : index
    %c0_74 = arith.constant 0 : index
    %c0_75 = arith.constant 0 : index
    %66 = vector.load %arg3[%c0_73, %c37, %c0_74, %c0_75] : memref<1x54x16x128xbf16, #tpu.memory_space<vmem>>, vector<1x16x16x128xbf16>
    %67 = vector.shape_cast %66 : vector<1x16x16x128xbf16> to vector<16x16x128xbf16>
    %68 = vector.shape_cast %67 : vector<16x16x128xbf16> to vector<256x128xbf16>
    %c0_76 = arith.constant 0 : index
    %c0_77 = arith.constant 0 : index
    %69 = vector.load %arg8[%c0_76, %c0_77] : memref<256x128xf32, #tpu.memory_space<vmem>>, vector<256x128xf32>
    %c5 = arith.constant 5 : index
    %c0_78 = arith.constant 0 : index
    %c0_79 = arith.constant 0 : index
    %70 = vector.load %arg4[%c5, %c0_78, %c0_79] : memref<9x128x128xbf16, #tpu.memory_space<vmem>>, vector<1x128x128xbf16>
    %71 = vector.shape_cast %70 : vector<1x128x128xbf16> to vector<128x128xbf16>
    %cst_80 = arith.constant dense<0.000000e+00> : vector<256x128xf32>
    %72 = tpu.matmul %68, %71, %cst_80 {dimension_numbers = #tpu.dot_dimension_numbers<[1], [0], [0], [1], [0, 0, 1, 1], [], []>} : vector<256x128xbf16>, vector<128x128xbf16>, vector<256x128xf32> -> vector<256x128xf32>
    %73 = arith.addf %69, %72 : vector<256x128xf32>
    %c0_81 = arith.constant 0 : index
    %c0_82 = arith.constant 0 : index
    %74 = vector.load %arg8[%c0_81, %c0_82] : memref<256x128xf32, #tpu.memory_space<vmem>>, vector<256x128xf32>
    tpu.vector_store %arg8[%c0_81, %c0_82], %73 {strides = array<i32>} : memref<256x128xf32, #tpu.memory_space<vmem>>, vector<256x128xf32>,
    %c0_83 = arith.constant 0 : index
    %c38 = arith.constant 38 : index
    %c0_84 = arith.constant 0 : index
    %c0_85 = arith.constant 0 : index
    %75 = vector.load %arg3[%c0_83, %c38, %c0_84, %c0_85] : memref<1x54x16x128xbf16, #tpu.memory_space<vmem>>, vector<1x16x16x128xbf16>
    %76 = vector.shape_cast %75 : vector<1x16x16x128xbf16> to vector<16x16x128xbf16>
    %77 = vector.shape_cast %76 : vector<16x16x128xbf16> to vector<256x128xbf16>
    %c0_86 = arith.constant 0 : index
    %c0_87 = arith.constant 0 : index
    %78 = vector.load %arg8[%c0_86, %c0_87] : memref<256x128xf32, #tpu.memory_space<vmem>>, vector<256x128xf32>
    %c8 = arith.constant 8 : index
    %c0_88 = arith.constant 0 : index
    %c0_89 = arith.constant 0 : index
    %79 = vector.load %arg4[%c8, %c0_88, %c0_89] : memref<9x128x128xbf16, #tpu.memory_space<vmem>>, vector<1x128x128xbf16>
    %80 = vector.shape_cast %79 : vector<1x128x128xbf16> to vector<128x128xbf16>
    %cst_90 = arith.constant dense<0.000000e+00> : vector<256x128xf32>
    %81 = tpu.matmul %77, %80, %cst_90 {dimension_numbers = #tpu.dot_dimension_numbers<[1], [0], [0], [1], [0, 0, 1, 1], [], []>} : vector<256x128xbf16>, vector<128x128xbf16>, vector<256x128xf32> -> vector<256x128xf32>
    %82 = arith.addf %78, %81 : vector<256x128xf32>
    %c0_91 = arith.constant 0 : index
    %c0_92 = arith.constant 0 : index
    %83 = vector.load %arg8[%c0_91, %c0_92] : memref<256x128xf32, #tpu.memory_space<vmem>>, vector<256x128xf32>
    tpu.vector_store %arg8[%c0_91, %c0_92], %82 {strides = array<i32>} : memref<256x128xf32, #tpu.memory_space<vmem>>, vector<256x128xf32>,
    %c0_i32_93 = arith.constant 0 : i32
    %84 = arith.cmpi eq, %arg2, %c0_i32_93 : i32
    %85 = arith.extui %84 : i1 to i32
    %c0_i32_94 = arith.constant 0 : i32
    %86 = arith.cmpi ne, %85, %c0_i32_94 : i32
    scf.if %86 {
      %c0_95 = arith.constant 0 : index
      %c0_96 = arith.constant 0 : index
      %87 = vector.load %arg8[%c0_95, %c0_96] : memref<256x128xf32, #tpu.memory_space<vmem>>, vector<256x128xf32>
      %c0_97 = arith.constant 0 : index
      %c0_98 = arith.constant 0 : index
      %88 = vector.load %arg5[%c0_97, %c0_98] : memref<1x128xf32, #tpu.memory_space<vmem>>, vector<1x128xf32>
      %89 = vector.broadcast %88 : vector<1x128xf32> to vector<256x128xf32>
      %90 = arith.mulf %87, %89 : vector<256x128xf32>
      %c0_99 = arith.constant 0 : index
      %c0_100 = arith.constant 0 : index
      %91 = vector.load %arg6[%c0_99, %c0_100] : memref<1x128xf32, #tpu.memory_space<vmem>>, vector<1x128xf32>
      %92 = vector.broadcast %91 : vector<1x128xf32> to vector<256x128xf32>
      %93 = arith.addf %90, %92 : vector<256x128xf32>
      %cst_101 = arith.constant 0.000000e+00 : f32
      %94 = vector.broadcast %cst_101 : f32 to vector<256x128xf32>
      %95 = arith.maximumf %93, %94 : vector<256x128xf32>
      %96 = vector.shape_cast %95 : vector<256x128xf32> to vector<16x16x128xf32>
      %97 = arith.truncf %96 : vector<16x16x128xf32> to vector<16x16x128xbf16>
      %c0_102 = arith.constant 0 : index
      %c0_103 = arith.constant 0 : index
      %c0_104 = arith.constant 0 : index
      %c0_105 = arith.constant 0 : index
      %98 = vector.load %arg7[%c0_102, %c0_103, %c0_104, %c0_105] : memref<1x16x16x128xbf16, #tpu.memory_space<vmem>>, vector<1x16x16x128xbf16>
      %99 = vector.shape_cast %98 : vector<1x16x16x128xbf16> to vector<16x16x128xbf16>
      %100 = vector.shape_cast %97 : vector<16x16x128xbf16> to vector<1x16x16x128xbf16>
      tpu.vector_store %arg7[%c0_102, %c0_103, %c0_104, %c0_105], %100 {strides = array<i32>} : memref<1x16x16x128xbf16, #tpu.memory_space<vmem>>, vector<1x16x16x128xbf16>,
    } else {
    }
    return
  }
  func.func @transform_0(%arg0: i32, %arg1: i32, %arg2: i32) -> (i32, i32, i32, i32) {
    %c0_i32 = arith.constant 0 : i32
    %c0_i32_0 = arith.constant 0 : i32
    %c0_i32_1 = arith.constant 0 : i32
    return %arg0, %c0_i32, %c0_i32_0, %arg2 : i32, i32, i32, i32
  }
  func.func @transform_1(%arg0: i32, %arg1: i32, %arg2: i32) -> (i32, i32, i32) {
    %c0_i32 = arith.constant 0 : i32
    %c0_i32_0 = arith.constant 0 : i32
    return %c0_i32, %arg2, %arg1 : i32, i32, i32
  }
  func.func @transform_2(%arg0: i32, %arg1: i32, %arg2: i32) -> (i32, i32) {
    %c0_i32 = arith.constant 0 : i32
    %c0_i32_0 = arith.constant 0 : i32
    return %c0_i32, %arg1 : i32, i32
  }
  func.func @transform_3(%arg0: i32, %arg1: i32, %arg2: i32) -> (i32, i32) {
    %c0_i32 = arith.constant 0 : i32
    %c0_i32_0 = arith.constant 0 : i32
    return %c0_i32, %arg1 : i32, i32
  }
  func.func @transform_4(%arg0: i32, %arg1: i32, %arg2: i32) -> (i32, i32, i32, i32) {
    %c0_i32 = arith.constant 0 : i32
    %c0_i32_0 = arith.constant 0 : i32
    %c0_i32_1 = arith.constant 0 : i32
    return %arg0, %c0_i32, %c0_i32_0, %arg1 : i32, i32, i32, i32
  }
}

module attributes {stable_mosaic.version = 11 : i64} {
  func.func @_conv3x3_bn_relu_kernel(%arg0: i32, %arg1: i32, %arg2: i32, %arg3: memref<1x54x16x128xbf16, #tpu.memory_space<vmem>>, %arg4: memref<9x128x128xbf16, #tpu.memory_space<vmem>>, %arg5: memref<1x128xf32, #tpu.memory_space<vmem>>, %arg6: memref<1x128xf32, #tpu.memory_space<vmem>>, %arg7: memref<1x16x16x128xf32, #tpu.memory_space<vmem>>, %arg8: memref<256x128xf32, #tpu.memory_space<vmem>>) attributes {dimension_semantics = [#tpu.dimension_semantics<parallel>, #tpu.dimension_semantics<parallel>, #tpu.dimension_semantics<arbitrary>], iteration_bounds = array<i64: 2, 1, 1>, scalar_prefetch = 0 : i64, scratch_operands = 1 : i64, tpu.core_type = #tpu.core_type<tc>, window_params = [{transform_indices = @transform_0, window_bounds = array<i64: 1, 54, 16, 128>}, {transform_indices = @transform_1, window_bounds = array<i64: 9, 128, 128>}, {transform_indices = @transform_2, window_bounds = array<i64: 1, 128>}, {transform_indices = @transform_3, window_bounds = array<i64: 1, 128>}, {transform_indices = @transform_4, window_bounds = array<i64: 1, 16, 16, 128>}]} {
    %c0_i32 = arith.constant 0 : i32
    %0 = arith.cmpi eq, %arg2, %c0_i32 : i32
    %1 = arith.extui %0 : i1 to i32
    %c0_i32_0 = arith.constant 0 : i32
    %2 = arith.cmpi ne, %1, %c0_i32_0 : i32
    scf.if %2 {
      %cst_95 = arith.constant 0.000000e+00 : f32
      %87 = vector.broadcast %cst_95 : f32 to vector<256x128xf32>
      %c0_96 = arith.constant 0 : index
      %c0_97 = arith.constant 0 : index
      %88 = vector.load %arg8[%c0_96, %c0_97] : memref<256x128xf32, #tpu.memory_space<vmem>>, vector<256x128xf32>
      tpu.vector_store %arg8[%c0_96, %c0_97], %87 {strides = array<i32>} : memref<256x128xf32, #tpu.memory_space<vmem>>, vector<256x128xf32>,
    } else {
    }
    %c0 = arith.constant 0 : index
    %c0_1 = arith.constant 0 : index
    %c0_2 = arith.constant 0 : index
    %c0_3 = arith.constant 0 : index
    %3 = vector.load %arg3[%c0, %c0_1, %c0_2, %c0_3] : memref<1x54x16x128xbf16, #tpu.memory_space<vmem>>, vector<1x16x16x128xbf16>
    %4 = vector.shape_cast %3 : vector<1x16x16x128xbf16> to vector<16x16x128xbf16>
    %5 = vector.shape_cast %4 : vector<16x16x128xbf16> to vector<256x128xbf16>
    %c0_4 = arith.constant 0 : index
    %c0_5 = arith.constant 0 : index
    %6 = vector.load %arg8[%c0_4, %c0_5] : memref<256x128xf32, #tpu.memory_space<vmem>>, vector<256x128xf32>
    %c0_6 = arith.constant 0 : index
    %c0_7 = arith.constant 0 : index
    %c0_8 = arith.constant 0 : index
    %7 = vector.load %arg4[%c0_6, %c0_7, %c0_8] : memref<9x128x128xbf16, #tpu.memory_space<vmem>>, vector<1x128x128xbf16>
    %8 = vector.shape_cast %7 : vector<1x128x128xbf16> to vector<128x128xbf16>
    %cst = arith.constant dense<0.000000e+00> : vector<256x128xf32>
    %9 = tpu.matmul %5, %8, %cst {dimension_numbers = #tpu.dot_dimension_numbers<[1], [0], [0], [1], [0, 0, 1, 1], [], []>} : vector<256x128xbf16>, vector<128x128xbf16>, vector<256x128xf32> -> vector<256x128xf32>
    %10 = arith.addf %6, %9 : vector<256x128xf32>
    %c0_9 = arith.constant 0 : index
    %c0_10 = arith.constant 0 : index
    %11 = vector.load %arg8[%c0_9, %c0_10] : memref<256x128xf32, #tpu.memory_space<vmem>>, vector<256x128xf32>
    tpu.vector_store %arg8[%c0_9, %c0_10], %10 {strides = array<i32>} : memref<256x128xf32, #tpu.memory_space<vmem>>, vector<256x128xf32>,
    %c0_11 = arith.constant 0 : index
    %c1 = arith.constant 1 : index
    %c0_12 = arith.constant 0 : index
    %c0_13 = arith.constant 0 : index
    %12 = vector.load %arg3[%c0_11, %c1, %c0_12, %c0_13] : memref<1x54x16x128xbf16, #tpu.memory_space<vmem>>, vector<1x16x16x128xbf16>
    %13 = vector.shape_cast %12 : vector<1x16x16x128xbf16> to vector<16x16x128xbf16>
    %14 = vector.shape_cast %13 : vector<16x16x128xbf16> to vector<256x128xbf16>
    %c0_14 = arith.constant 0 : index
    %c0_15 = arith.constant 0 : index
    %15 = vector.load %arg8[%c0_14, %c0_15] : memref<256x128xf32, #tpu.memory_space<vmem>>, vector<256x128xf32>
    %c3 = arith.constant 3 : index
    %c0_16 = arith.constant 0 : index
    %c0_17 = arith.constant 0 : index
    %16 = vector.load %arg4[%c3, %c0_16, %c0_17] : memref<9x128x128xbf16, #tpu.memory_space<vmem>>, vector<1x128x128xbf16>
    %17 = vector.shape_cast %16 : vector<1x128x128xbf16> to vector<128x128xbf16>
    %cst_18 = arith.constant dense<0.000000e+00> : vector<256x128xf32>
    %18 = tpu.matmul %14, %17, %cst_18 {dimension_numbers = #tpu.dot_dimension_numbers<[1], [0], [0], [1], [0, 0, 1, 1], [], []>} : vector<256x128xbf16>, vector<128x128xbf16>, vector<256x128xf32> -> vector<256x128xf32>
    %19 = arith.addf %15, %18 : vector<256x128xf32>
    %c0_19 = arith.constant 0 : index
    %c0_20 = arith.constant 0 : index
    %20 = vector.load %arg8[%c0_19, %c0_20] : memref<256x128xf32, #tpu.memory_space<vmem>>, vector<256x128xf32>
    tpu.vector_store %arg8[%c0_19, %c0_20], %19 {strides = array<i32>} : memref<256x128xf32, #tpu.memory_space<vmem>>, vector<256x128xf32>,
    %c0_21 = arith.constant 0 : index
    %c2 = arith.constant 2 : index
    %c0_22 = arith.constant 0 : index
    %c0_23 = arith.constant 0 : index
    %21 = vector.load %arg3[%c0_21, %c2, %c0_22, %c0_23] : memref<1x54x16x128xbf16, #tpu.memory_space<vmem>>, vector<1x16x16x128xbf16>
    %22 = vector.shape_cast %21 : vector<1x16x16x128xbf16> to vector<16x16x128xbf16>
    %23 = vector.shape_cast %22 : vector<16x16x128xbf16> to vector<256x128xbf16>
    %c0_24 = arith.constant 0 : index
    %c0_25 = arith.constant 0 : index
    %24 = vector.load %arg8[%c0_24, %c0_25] : memref<256x128xf32, #tpu.memory_space<vmem>>, vector<256x128xf32>
    %c6 = arith.constant 6 : index
    %c0_26 = arith.constant 0 : index
    %c0_27 = arith.constant 0 : index
    %25 = vector.load %arg4[%c6, %c0_26, %c0_27] : memref<9x128x128xbf16, #tpu.memory_space<vmem>>, vector<1x128x128xbf16>
    %26 = vector.shape_cast %25 : vector<1x128x128xbf16> to vector<128x128xbf16>
    %cst_28 = arith.constant dense<0.000000e+00> : vector<256x128xf32>
    %27 = tpu.matmul %23, %26, %cst_28 {dimension_numbers = #tpu.dot_dimension_numbers<[1], [0], [0], [1], [0, 0, 1, 1], [], []>} : vector<256x128xbf16>, vector<128x128xbf16>, vector<256x128xf32> -> vector<256x128xf32>
    %28 = arith.addf %24, %27 : vector<256x128xf32>
    %c0_29 = arith.constant 0 : index
    %c0_30 = arith.constant 0 : index
    %29 = vector.load %arg8[%c0_29, %c0_30] : memref<256x128xf32, #tpu.memory_space<vmem>>, vector<256x128xf32>
    tpu.vector_store %arg8[%c0_29, %c0_30], %28 {strides = array<i32>} : memref<256x128xf32, #tpu.memory_space<vmem>>, vector<256x128xf32>,
    %c0_31 = arith.constant 0 : index
    %c18 = arith.constant 18 : index
    %c0_32 = arith.constant 0 : index
    %c0_33 = arith.constant 0 : index
    %30 = vector.load %arg3[%c0_31, %c18, %c0_32, %c0_33] : memref<1x54x16x128xbf16, #tpu.memory_space<vmem>>, vector<1x16x16x128xbf16>
    %31 = vector.shape_cast %30 : vector<1x16x16x128xbf16> to vector<16x16x128xbf16>
    %32 = vector.shape_cast %31 : vector<16x16x128xbf16> to vector<256x128xbf16>
    %c0_34 = arith.constant 0 : index
    %c0_35 = arith.constant 0 : index
    %33 = vector.load %arg8[%c0_34, %c0_35] : memref<256x128xf32, #tpu.memory_space<vmem>>, vector<256x128xf32>
    %c1_36 = arith.constant 1 : index
    %c0_37 = arith.constant 0 : index
    %c0_38 = arith.constant 0 : index
    %34 = vector.load %arg4[%c1_36, %c0_37, %c0_38] : memref<9x128x128xbf16, #tpu.memory_space<vmem>>, vector<1x128x128xbf16>
    %35 = vector.shape_cast %34 : vector<1x128x128xbf16> to vector<128x128xbf16>
    %cst_39 = arith.constant dense<0.000000e+00> : vector<256x128xf32>
    %36 = tpu.matmul %32, %35, %cst_39 {dimension_numbers = #tpu.dot_dimension_numbers<[1], [0], [0], [1], [0, 0, 1, 1], [], []>} : vector<256x128xbf16>, vector<128x128xbf16>, vector<256x128xf32> -> vector<256x128xf32>
    %37 = arith.addf %33, %36 : vector<256x128xf32>
    %c0_40 = arith.constant 0 : index
    %c0_41 = arith.constant 0 : index
    %38 = vector.load %arg8[%c0_40, %c0_41] : memref<256x128xf32, #tpu.memory_space<vmem>>, vector<256x128xf32>
    tpu.vector_store %arg8[%c0_40, %c0_41], %37 {strides = array<i32>} : memref<256x128xf32, #tpu.memory_space<vmem>>, vector<256x128xf32>,
    %c0_42 = arith.constant 0 : index
    %c19 = arith.constant 19 : index
    %c0_43 = arith.constant 0 : index
    %c0_44 = arith.constant 0 : index
    %39 = vector.load %arg3[%c0_42, %c19, %c0_43, %c0_44] : memref<1x54x16x128xbf16, #tpu.memory_space<vmem>>, vector<1x16x16x128xbf16>
    %40 = vector.shape_cast %39 : vector<1x16x16x128xbf16> to vector<16x16x128xbf16>
    %41 = vector.shape_cast %40 : vector<16x16x128xbf16> to vector<256x128xbf16>
    %c0_45 = arith.constant 0 : index
    %c0_46 = arith.constant 0 : index
    %42 = vector.load %arg8[%c0_45, %c0_46] : memref<256x128xf32, #tpu.memory_space<vmem>>, vector<256x128xf32>
    %c4 = arith.constant 4 : index
    %c0_47 = arith.constant 0 : index
    %c0_48 = arith.constant 0 : index
    %43 = vector.load %arg4[%c4, %c0_47, %c0_48] : memref<9x128x128xbf16, #tpu.memory_space<vmem>>, vector<1x128x128xbf16>
    %44 = vector.shape_cast %43 : vector<1x128x128xbf16> to vector<128x128xbf16>
    %cst_49 = arith.constant dense<0.000000e+00> : vector<256x128xf32>
    %45 = tpu.matmul %41, %44, %cst_49 {dimension_numbers = #tpu.dot_dimension_numbers<[1], [0], [0], [1], [0, 0, 1, 1], [], []>} : vector<256x128xbf16>, vector<128x128xbf16>, vector<256x128xf32> -> vector<256x128xf32>
    %46 = arith.addf %42, %45 : vector<256x128xf32>
    %c0_50 = arith.constant 0 : index
    %c0_51 = arith.constant 0 : index
    %47 = vector.load %arg8[%c0_50, %c0_51] : memref<256x128xf32, #tpu.memory_space<vmem>>, vector<256x128xf32>
    tpu.vector_store %arg8[%c0_50, %c0_51], %46 {strides = array<i32>} : memref<256x128xf32, #tpu.memory_space<vmem>>, vector<256x128xf32>,
    %c0_52 = arith.constant 0 : index
    %c20 = arith.constant 20 : index
    %c0_53 = arith.constant 0 : index
    %c0_54 = arith.constant 0 : index
    %48 = vector.load %arg3[%c0_52, %c20, %c0_53, %c0_54] : memref<1x54x16x128xbf16, #tpu.memory_space<vmem>>, vector<1x16x16x128xbf16>
    %49 = vector.shape_cast %48 : vector<1x16x16x128xbf16> to vector<16x16x128xbf16>
    %50 = vector.shape_cast %49 : vector<16x16x128xbf16> to vector<256x128xbf16>
    %c0_55 = arith.constant 0 : index
    %c0_56 = arith.constant 0 : index
    %51 = vector.load %arg8[%c0_55, %c0_56] : memref<256x128xf32, #tpu.memory_space<vmem>>, vector<256x128xf32>
    %c7 = arith.constant 7 : index
    %c0_57 = arith.constant 0 : index
    %c0_58 = arith.constant 0 : index
    %52 = vector.load %arg4[%c7, %c0_57, %c0_58] : memref<9x128x128xbf16, #tpu.memory_space<vmem>>, vector<1x128x128xbf16>
    %53 = vector.shape_cast %52 : vector<1x128x128xbf16> to vector<128x128xbf16>
    %cst_59 = arith.constant dense<0.000000e+00> : vector<256x128xf32>
    %54 = tpu.matmul %50, %53, %cst_59 {dimension_numbers = #tpu.dot_dimension_numbers<[1], [0], [0], [1], [0, 0, 1, 1], [], []>} : vector<256x128xbf16>, vector<128x128xbf16>, vector<256x128xf32> -> vector<256x128xf32>
    %55 = arith.addf %51, %54 : vector<256x128xf32>
    %c0_60 = arith.constant 0 : index
    %c0_61 = arith.constant 0 : index
    %56 = vector.load %arg8[%c0_60, %c0_61] : memref<256x128xf32, #tpu.memory_space<vmem>>, vector<256x128xf32>
    tpu.vector_store %arg8[%c0_60, %c0_61], %55 {strides = array<i32>} : memref<256x128xf32, #tpu.memory_space<vmem>>, vector<256x128xf32>,
    %c0_62 = arith.constant 0 : index
    %c36 = arith.constant 36 : index
    %c0_63 = arith.constant 0 : index
    %c0_64 = arith.constant 0 : index
    %57 = vector.load %arg3[%c0_62, %c36, %c0_63, %c0_64] : memref<1x54x16x128xbf16, #tpu.memory_space<vmem>>, vector<1x16x16x128xbf16>
    %58 = vector.shape_cast %57 : vector<1x16x16x128xbf16> to vector<16x16x128xbf16>
    %59 = vector.shape_cast %58 : vector<16x16x128xbf16> to vector<256x128xbf16>
    %c0_65 = arith.constant 0 : index
    %c0_66 = arith.constant 0 : index
    %60 = vector.load %arg8[%c0_65, %c0_66] : memref<256x128xf32, #tpu.memory_space<vmem>>, vector<256x128xf32>
    %c2_67 = arith.constant 2 : index
    %c0_68 = arith.constant 0 : index
    %c0_69 = arith.constant 0 : index
    %61 = vector.load %arg4[%c2_67, %c0_68, %c0_69] : memref<9x128x128xbf16, #tpu.memory_space<vmem>>, vector<1x128x128xbf16>
    %62 = vector.shape_cast %61 : vector<1x128x128xbf16> to vector<128x128xbf16>
    %cst_70 = arith.constant dense<0.000000e+00> : vector<256x128xf32>
    %63 = tpu.matmul %59, %62, %cst_70 {dimension_numbers = #tpu.dot_dimension_numbers<[1], [0], [0], [1], [0, 0, 1, 1], [], []>} : vector<256x128xbf16>, vector<128x128xbf16>, vector<256x128xf32> -> vector<256x128xf32>
    %64 = arith.addf %60, %63 : vector<256x128xf32>
    %c0_71 = arith.constant 0 : index
    %c0_72 = arith.constant 0 : index
    %65 = vector.load %arg8[%c0_71, %c0_72] : memref<256x128xf32, #tpu.memory_space<vmem>>, vector<256x128xf32>
    tpu.vector_store %arg8[%c0_71, %c0_72], %64 {strides = array<i32>} : memref<256x128xf32, #tpu.memory_space<vmem>>, vector<256x128xf32>,
    %c0_73 = arith.constant 0 : index
    %c37 = arith.constant 37 : index
    %c0_74 = arith.constant 0 : index
    %c0_75 = arith.constant 0 : index
    %66 = vector.load %arg3[%c0_73, %c37, %c0_74, %c0_75] : memref<1x54x16x128xbf16, #tpu.memory_space<vmem>>, vector<1x16x16x128xbf16>
    %67 = vector.shape_cast %66 : vector<1x16x16x128xbf16> to vector<16x16x128xbf16>
    %68 = vector.shape_cast %67 : vector<16x16x128xbf16> to vector<256x128xbf16>
    %c0_76 = arith.constant 0 : index
    %c0_77 = arith.constant 0 : index
    %69 = vector.load %arg8[%c0_76, %c0_77] : memref<256x128xf32, #tpu.memory_space<vmem>>, vector<256x128xf32>
    %c5 = arith.constant 5 : index
    %c0_78 = arith.constant 0 : index
    %c0_79 = arith.constant 0 : index
    %70 = vector.load %arg4[%c5, %c0_78, %c0_79] : memref<9x128x128xbf16, #tpu.memory_space<vmem>>, vector<1x128x128xbf16>
    %71 = vector.shape_cast %70 : vector<1x128x128xbf16> to vector<128x128xbf16>
    %cst_80 = arith.constant dense<0.000000e+00> : vector<256x128xf32>
    %72 = tpu.matmul %68, %71, %cst_80 {dimension_numbers = #tpu.dot_dimension_numbers<[1], [0], [0], [1], [0, 0, 1, 1], [], []>} : vector<256x128xbf16>, vector<128x128xbf16>, vector<256x128xf32> -> vector<256x128xf32>
    %73 = arith.addf %69, %72 : vector<256x128xf32>
    %c0_81 = arith.constant 0 : index
    %c0_82 = arith.constant 0 : index
    %74 = vector.load %arg8[%c0_81, %c0_82] : memref<256x128xf32, #tpu.memory_space<vmem>>, vector<256x128xf32>
    tpu.vector_store %arg8[%c0_81, %c0_82], %73 {strides = array<i32>} : memref<256x128xf32, #tpu.memory_space<vmem>>, vector<256x128xf32>,
    %c0_83 = arith.constant 0 : index
    %c38 = arith.constant 38 : index
    %c0_84 = arith.constant 0 : index
    %c0_85 = arith.constant 0 : index
    %75 = vector.load %arg3[%c0_83, %c38, %c0_84, %c0_85] : memref<1x54x16x128xbf16, #tpu.memory_space<vmem>>, vector<1x16x16x128xbf16>
    %76 = vector.shape_cast %75 : vector<1x16x16x128xbf16> to vector<16x16x128xbf16>
    %77 = vector.shape_cast %76 : vector<16x16x128xbf16> to vector<256x128xbf16>
    %c0_86 = arith.constant 0 : index
    %c0_87 = arith.constant 0 : index
    %78 = vector.load %arg8[%c0_86, %c0_87] : memref<256x128xf32, #tpu.memory_space<vmem>>, vector<256x128xf32>
    %c8 = arith.constant 8 : index
    %c0_88 = arith.constant 0 : index
    %c0_89 = arith.constant 0 : index
    %79 = vector.load %arg4[%c8, %c0_88, %c0_89] : memref<9x128x128xbf16, #tpu.memory_space<vmem>>, vector<1x128x128xbf16>
    %80 = vector.shape_cast %79 : vector<1x128x128xbf16> to vector<128x128xbf16>
    %cst_90 = arith.constant dense<0.000000e+00> : vector<256x128xf32>
    %81 = tpu.matmul %77, %80, %cst_90 {dimension_numbers = #tpu.dot_dimension_numbers<[1], [0], [0], [1], [0, 0, 1, 1], [], []>} : vector<256x128xbf16>, vector<128x128xbf16>, vector<256x128xf32> -> vector<256x128xf32>
    %82 = arith.addf %78, %81 : vector<256x128xf32>
    %c0_91 = arith.constant 0 : index
    %c0_92 = arith.constant 0 : index
    %83 = vector.load %arg8[%c0_91, %c0_92] : memref<256x128xf32, #tpu.memory_space<vmem>>, vector<256x128xf32>
    tpu.vector_store %arg8[%c0_91, %c0_92], %82 {strides = array<i32>} : memref<256x128xf32, #tpu.memory_space<vmem>>, vector<256x128xf32>,
    %c0_i32_93 = arith.constant 0 : i32
    %84 = arith.cmpi eq, %arg2, %c0_i32_93 : i32
    %85 = arith.extui %84 : i1 to i32
    %c0_i32_94 = arith.constant 0 : i32
    %86 = arith.cmpi ne, %85, %c0_i32_94 : i32
    scf.if %86 {
      %c0_95 = arith.constant 0 : index
      %c0_96 = arith.constant 0 : index
      %87 = vector.load %arg8[%c0_95, %c0_96] : memref<256x128xf32, #tpu.memory_space<vmem>>, vector<256x128xf32>
      %c0_97 = arith.constant 0 : index
      %c0_98 = arith.constant 0 : index
      %88 = vector.load %arg5[%c0_97, %c0_98] : memref<1x128xf32, #tpu.memory_space<vmem>>, vector<1x128xf32>
      %89 = vector.broadcast %88 : vector<1x128xf32> to vector<256x128xf32>
      %90 = arith.mulf %87, %89 : vector<256x128xf32>
      %c0_99 = arith.constant 0 : index
      %c0_100 = arith.constant 0 : index
      %91 = vector.load %arg6[%c0_99, %c0_100] : memref<1x128xf32, #tpu.memory_space<vmem>>, vector<1x128xf32>
      %92 = vector.broadcast %91 : vector<1x128xf32> to vector<256x128xf32>
      %93 = arith.addf %90, %92 : vector<256x128xf32>
      %cst_101 = arith.constant 0.000000e+00 : f32
      %94 = vector.broadcast %cst_101 : f32 to vector<256x128xf32>
      %95 = arith.maximumf %93, %94 : vector<256x128xf32>
      %96 = vector.shape_cast %95 : vector<256x128xf32> to vector<16x16x128xf32>
      %c0_102 = arith.constant 0 : index
      %c0_103 = arith.constant 0 : index
      %c0_104 = arith.constant 0 : index
      %c0_105 = arith.constant 0 : index
      %97 = vector.load %arg7[%c0_102, %c0_103, %c0_104, %c0_105] : memref<1x16x16x128xf32, #tpu.memory_space<vmem>>, vector<1x16x16x128xf32>
      %98 = vector.shape_cast %97 : vector<1x16x16x128xf32> to vector<16x16x128xf32>
      %99 = vector.shape_cast %96 : vector<16x16x128xf32> to vector<1x16x16x128xf32>
      tpu.vector_store %arg7[%c0_102, %c0_103, %c0_104, %c0_105], %99 {strides = array<i32>} : memref<1x16x16x128xf32, #tpu.memory_space<vmem>>, vector<1x16x16x128xf32>,
    } else {
    }
    return
  }
  func.func @transform_0(%arg0: i32, %arg1: i32, %arg2: i32) -> (i32, i32, i32, i32) {
    %c0_i32 = arith.constant 0 : i32
    %c0_i32_0 = arith.constant 0 : i32
    %c0_i32_1 = arith.constant 0 : i32
    return %arg0, %c0_i32, %c0_i32_0, %arg2 : i32, i32, i32, i32
  }
  func.func @transform_1(%arg0: i32, %arg1: i32, %arg2: i32) -> (i32, i32, i32) {
    %c0_i32 = arith.constant 0 : i32
    %c0_i32_0 = arith.constant 0 : i32
    return %c0_i32, %arg2, %arg1 : i32, i32, i32
  }
  func.func @transform_2(%arg0: i32, %arg1: i32, %arg2: i32) -> (i32, i32) {
    %c0_i32 = arith.constant 0 : i32
    %c0_i32_0 = arith.constant 0 : i32
    return %c0_i32, %arg1 : i32, i32
  }
  func.func @transform_3(%arg0: i32, %arg1: i32, %arg2: i32) -> (i32, i32) {
    %c0_i32 = arith.constant 0 : i32
    %c0_i32_0 = arith.constant 0 : i32
    return %c0_i32, %arg1 : i32, i32
  }
  func.func @transform_4(%arg0: i32, %arg1: i32, %arg2: i32) -> (i32, i32, i32, i32) {
    %c0_i32 = arith.constant 0 : i32
    %c0_i32_0 = arith.constant 0 : i32
    %c0_i32_1 = arith.constant 0 : i32
    return %arg0, %c0_i32, %c0_i32_0, %arg1 : i32, i32, i32, i32
  }
}

</mosaic_0001>

<bundles_post_ra>
// kernel: decoder_resnet50_forward.2
= control target key start
LH: loop header
LB: loop body
LE: loop exit
PB: predicated region body
PF: predicated region fallthrough
CT: control target
= control target key end

     0   :  { %s6818_s15 = smov 0   ;;  %s6820_s16 = smov 0   ;;  %s7356_s0 = inlined_call_operand.vmem [shape: bf16[2,54,16,128], index: 0, kind: input, shape index: {}]   ;;  %s7357_s1 = inlined_call_operand.vmem [shape: bf16[9,128,128], index: 1, kind: input, shape index: {}]   ;;  %s7358_s2 = inlined_call_operand.vmem [shape: f32[1,128], index: 2, kind: input, shape index: {}]   ;;  %s7359_s3 = inlined_call_operand.vmem [shape: f32[1,128], index: 3, kind: input, shape index: {}]   ;;  %s7360_s4 = inlined_call_operand.vmem [shape: bf16[2,16,16,128], index: 4, kind: output, shape index: {}]  }
   0x1   :  { %s6822_s17 = smov 0  }
   0x2 LB: > { %s33_s18 = sadd.s32 1, %s6787_s16  ;;  %p4832_p0 = scmp.ge.s32.totalorder %s6791_s17, 1  ;;  %s6791_s17 = sphi %s6822_s17, %s14_s17   ;;  %s6787_s16 = sphi %s6820_s16, %s7362_s16   ;;  %s6783_s15 = sphi %s6818_s15, %s7361_s15  }
   0x3   : > { %p35_p1 = scmp.ge.s32.totalorder %s33_s18, 2  ;;  %p220_p2 = scmp.lt.s32.totalorder %s6791_s17, 3 }
   0x5   : > { %s7364_s18 = smov (%p35_p1, %s33_s18), 0  ;;  %p221_p3 = pnand %p4832_p0, %p220_p2 }
   0x6   : > { %v6545_v0 = vld [vmem:[%s7357_s1] sm:$0xff] (!%p221_p3)   ;;  %p266_p4 = scmp.lt.s32.totalorder (!%p221_p3), %s6783_s15, 1  ;;  %v6547_v2 = vld [vmem:[%s7357_s1 + $0x8] sm:$0xff] (!%p221_p3)   ;;  %v6549_v4 = vld [vmem:[%s7357_s1 + $0x10] sm:$0xff] (!%p221_p3)  }
   0x7   : > { %224 = sbr.rel (%p221_p3) target bundleno = 546 (0x222), region = 36  ;;  %v6546_v1 = vld [vmem:[%s7357_s1 + $0x100] sm:$0xff] (!%p221_p3)   ;;  %5816 = vmatprep.subr.bf16.mxu1 (!%p221_p3), %v6545_v0  ;;  %v6548_v3 = vld [vmem:[%s7357_s1 + $0x108] sm:$0xff] (!%p221_p3)   ;;  %v6550_v5 = vld [vmem:[%s7357_s1 + $0x110] sm:$0xff] (!%p221_p3)  }
   0x8   : > { %6008 = vmatprep.subr.bf16.mxu0 (!%p221_p3), %v6546_v1  ;;  %5817 = vmatpush3.bf16.msra.mxu1 (!%p221_p3), %v6545_v0  ;;  %v6551_v6 = vld [vmem:[%s7357_s1 + $0x18] sm:$0xff] (!%p221_p3)   ;;  %v6553_v8 = vld [vmem:[%s7357_s1 + $0x20] sm:$0xff] (!%p221_p3)   ;;  %v6555_v10 = vld [vmem:[%s7357_s1 + $0x28] sm:$0xff] (!%p221_p3)  }
   0x9   : > { %6009 = vmatpush3.bf16.msra.mxu0 (!%p221_p3), %v6546_v1  ;;  %5818 = vmatprep.subr.bf16.mxu1 (!%p221_p3), %v6547_v2  ;;  %v6552_v7 = vld [vmem:[%s7357_s1 + $0x118] sm:$0xff] (!%p221_p3)   ;;  %v6554_v9 = vld [vmem:[%s7357_s1 + $0x120] sm:$0xff] (!%p221_p3)   ;;  %v6556_v11 = vld [vmem:[%s7357_s1 + $0x128] sm:$0xff] (!%p221_p3)  }
   0xa   : > { %6010 = vmatprep.subr.bf16.mxu0 (!%p221_p3), %v6548_v3  ;;  %v6557_v14 = vld [vmem:[%s7357_s1 + $0x30] sm:$0xff] (!%p221_p3)   ;;  %v6559_v16 = vld [vmem:[%s7357_s1 + $0x38] sm:$0xff] (!%p221_p3)   ;;  %v6564_v19 = vld [vmem:[%s7357_s1 + $0xc0] sm:$0xff] (!%p221_p3)  }
   0xb   : > { %v6558_v15 = vld [vmem:[%s7357_s1 + $0x130] sm:$0xff] (!%p221_p3)   ;;  %v6560_v17 = vld [vmem:[%s7357_s1 + $0x138] sm:$0xff] (!%p221_p3)   ;;  %v6566_v20 = vld [vmem:[%s7357_s1 + $0x1c0] sm:$0xff] (!%p221_p3)  }
   0xc   : > { %5819 = vmatpush3.bf16.msra.mxu1 (!%p221_p3), %v6547_v2  ;;  %v6567_v22 = vld [vmem:[%s7357_s1 + $0x1c8] sm:$0xff] (!%p221_p3)   ;;  %v6578_v27 = vld [vmem:[%s7357_s1 + $0xd0] sm:$0xff] (!%p221_p3)   ;;  %v6574_v32 = vld [vmem:[%s7357_s1 + $0x1d8] sm:$0xff] (!%p221_p3)  }
   0xd   : > { %6011 = vmatpush3.bf16.msra.mxu0 (!%p221_p3), %v6548_v3  ;;  %5820 = vmatprep.subr.bf16.mxu1 (!%p221_p3), %v6549_v4  ;;  %v6571_v25 = vld [vmem:[%s7357_s1 + $0xc8] sm:$0xff] (!%p221_p3)   ;;  %v6573_v28 = vld [vmem:[%s7357_s1 + $0x1d0] sm:$0xff] (!%p221_p3)   ;;  %v6585_v33 = vld [vmem:[%s7357_s1 + $0xd8] sm:$0xff] (!%p221_p3)  }
   0xe   : > { %s7366_s15 = smov (!%p266_p4, %s6783_s15), 1  ;;  %6012 = vmatprep.subr.bf16.mxu0 %v6550_v5  ;;  %v6580_v36 = vld [vmem:[%s7357_s1 + $0x1e0] sm:$0xff]   ;;  %v6581_v40 = vld [vmem:[%s7357_s1 + $0x1e8] sm:$0xff]   ;;  %v6587_v42 = vld [vmem:[%s7357_s1 + $0x1f0] sm:$0xff]  }
   0xf   : > { %s6520_s9 = smul.u32 432, %s7366_s15  ;;  %v6592_v38 = vld [vmem:[%s7357_s1 + $0xe0] sm:$0xff]   ;;  %v6598_v43 = vld [vmem:[%s7357_s1 + $0xe8] sm:$0xff]   ;;  %v6588_v47 = vld [vmem:[%s7357_s1 + $0x1f8] sm:$0xff]   ;;  %s5472_s12 = sshll.u32 %s7366_s15, 7 }
  0x10   : > { %5821 = vmatpush3.bf16.msra.mxu1 %v6549_v4  ;;  %v6604_v48 = vld [vmem:[%s7357_s1 + $0xf0] sm:$0xff]   ;;  %v6594_v51 = vld [vmem:[%s7357_s1 + $0x80] sm:$0xff]   ;;  %v6600_v54 = vld [vmem:[%s7357_s1 + $0x88] sm:$0xff]   ;;  %s7268_s19 = scalar_lea.vmem %s7360_s4, %s5472_s12 }
  0x11   : > { %6013 = vmatpush3.bf16.msra.mxu0 %v6550_v5  ;;  %5822 = vmatprep.subr.bf16.mxu1 %v6551_v6  ;;  %s6872_s20 = scalar_lea.vmem %s7356_s0, %s6520_s9  ;;  %v6610_v55 = vld [vmem:[%s7357_s1 + $0xf8] sm:$0xff]   ;;  %v6606_v58 = vld [vmem:[%s7357_s1 + $0x90] sm:$0xff]   ;;  %v6616_v60 = vld [vmem:[%s7357_s1 + $0x180] sm:$0xff]  }
  0x12   : > { %6014 = vmatprep.subr.bf16.mxu0 %v6552_v7  ;;  %v6561_v12 = vld [vmem:[%s6872_s20] sm:$0xff]   ;;  %v6562_v13 = vld [vmem:[%s6872_s20 + $0x98] sm:$0xff]   ;;  %v6563_v18 = vld [vmem:[%s6872_s20 + $0x8] sm:$0xff]  }
  0x13   : > { %5832 = vmatprep.mubr.bf16.mxu1 %v6561_v12  ;;  %6024 = vmatprep.mubr.bf16.mxu0 %v6562_v13  ;;  %v6565_v21 = vld [vmem:[%s6872_s20 + $0xa0] sm:$0xff]   ;;  %v6568_v23 = vld [vmem:[%s6872_s20 + $0x10] sm:$0xff]   ;;  %v6569_v24 = vld [vmem:[%s6872_s20 + $0xa8] sm:$0xff]  }
  0x14   : > { %5823 = vmatpush3.bf16.msra.mxu1 %v6551_v6  ;;  %v6570_v26 = vld [vmem:[%s6872_s20 + $0x18] sm:$0xff]   ;;  %v6572_v29 = vld [vmem:[%s6872_s20 + $0xb0] sm:$0xff]   ;;  %v6575_v30 = vld [vmem:[%s6872_s20 + $0x20] sm:$0xff]  }
  0x15   : > { %6015 = vmatpush3.bf16.msra.mxu0 %v6552_v7  ;;  %5824 = vmatprep.subr.bf16.mxu1 %v6553_v8  ;;  %v6576_v31 = vld [vmem:[%s6872_s20 + $0xb8] sm:$0xff]   ;;  %v6577_v34 = vld [vmem:[%s6872_s20 + $0x28] sm:$0xff]   ;;  %v6579_v35 = vld [vmem:[%s6872_s20 + $0xc0] sm:$0xff]  }
  0x16   : > { %6016 = vmatprep.subr.bf16.mxu0 %v6554_v9  ;;  %v6582_v37 = vld [vmem:[%s6872_s20 + $0x30] sm:$0xff]   ;;  %v6583_v39 = vld [vmem:[%s6872_s20 + $0xc8] sm:$0xff]   ;;  %v6584_v41 = vld [vmem:[%s6872_s20 + $0x38] sm:$0xff]  }
  0x17   : > { %v6586_v44 = vld [vmem:[%s6872_s20 + $0xd0] sm:$0xff]   ;;  %v6589_v45 = vld [vmem:[%s6872_s20 + $0x40] sm:$0xff]   ;;  %v6591_v49 = vld [vmem:[%s6872_s20 + $0x48] sm:$0xff]  }
  0x18   : > { %5825 = vmatpush3.bf16.msra.mxu1 %v6553_v8  ;;  %v6590_v46 = vld [vmem:[%s6872_s20 + $0xa0] sm:$0xff]   ;;  %v6593_v50 = vld [vmem:[%s6872_s20 + $0xa8] sm:$0xff]   ;;  %v6595_v52 = vld [vmem:[%s6872_s20 + $0x50] sm:$0xff]  }
  0x19   : > { %6017 = vmatpush3.bf16.msra.mxu0 %v6554_v9  ;;  %5826 = vmatprep.subr.bf16.mxu1 %v6555_v10  ;;  %v6596_v53 = vld [vmem:[%s6872_s20 + $0xb0] sm:$0xff]   ;;  %v6597_v56 = vld [vmem:[%s6872_s20 + $0x58] sm:$0xff]   ;;  %v6601_v59 = vld [vmem:[%s6872_s20 + $0x60] sm:$0xff]  }
  0x1a   : > { %6018 = vmatprep.subr.bf16.mxu0 %v6556_v11  ;;  %v6599_v57 = vld [vmem:[%s6872_s20 + $0xb8] sm:$0xff]   ;;  %v6602_v61 = vld [vmem:[%s6872_s20 + $0xc0] sm:$0xff]   ;;  %v6603_v63 = vld [vmem:[%s6872_s20 + $0x68] sm:$0xff]  }
  0x1b   : > { %v6612_v62 = vld [vmem:[%s7357_s1 + $0x98] sm:$0xff]   ;;  %v6618_v0 = vld [vmem:[%s7357_s1 + $0xa0] sm:$0xff]   ;;  %v6605_v1 = vld [vmem:[%s6872_s20 + $0xc8] sm:$0xff]  }
  0x1c   : > { %5827 = vmatpush3.bf16.msra.mxu1 %v6555_v10  ;;  %v6607_v2 = vld [vmem:[%s6872_s20 + $0x70] sm:$0xff]   ;;  %v6624_v4 = vld [vmem:[%s7357_s1 + $0xa8] sm:$0xff]   ;;  %v6609_v5 = vld [vmem:[%s6872_s20 + $0x78] sm:$0xff]  }
  0x1d   : > { %6019 = vmatpush3.bf16.msra.mxu0 %v6556_v11  ;;  %5828 = vmatprep.subr.bf16.mxu1 %v6557_v14  ;;  %v6608_v3 = vld [vmem:[%s6872_s20 + $0xd0] sm:$0xff]   ;;  %v6611_v7 = vld [vmem:[%s6872_s20 + $0xd8] sm:$0xff]   ;;  %v6613_v8 = vld [vmem:[%s6872_s20 + $0x8] sm:$0xff]  }
  0x1e   : > { %6020 = vmatprep.subr.bf16.mxu0 %v6558_v15  ;;  %v6630_v6 = vld [vmem:[%s7357_s1 + $0xb0] sm:$0xff]   ;;  %v6614_v9 = vld [vmem:[%s6872_s20 + $0xe0] sm:$0xff]   ;;  %v6636_v10 = vld [vmem:[%s7357_s1 + $0xb8] sm:$0xff]  }
  0x1f   : > { %v6615_v11 = vld [vmem:[%s6872_s20 + $0x10] sm:$0xff]   ;;  %v6617_v12 = vld [vmem:[%s6872_s20 + $0xe8] sm:$0xff]   ;;  %v6619_v13 = vld [vmem:[%s6872_s20 + $0x18] sm:$0xff]  }
  0x20   : > { %5829 = vmatpush3.bf16.msra.mxu1 %v6557_v14  ;;  %v6620_v14 = vld [vmem:[%s6872_s20 + $0xf0] sm:$0xff]  }
  0x21   : > { %6021 = vmatpush3.bf16.msra.mxu0 %v6558_v15  ;;  %5830 = vmatprep.subr.bf16.mxu1 %v6559_v16  ;;  %v6622_v15 = vld [vmem:[%s7357_s1 + $0x188] sm:$0xff]  }
  0x22   : > { %6022 = vmatprep.subr.bf16.mxu0 %v6560_v17 }
  0x24   : > { %5831 = vmatpush3.bf16.msra.mxu1 %v6559_v16  ;;  %v6642_v16 = vld [vmem:[%s7357_s1 + $0x140] sm:$0xff]  }
  0x25   : > { %6023 = vmatpush3.bf16.msra.mxu0 %v6560_v17  ;;  %5864 = vmatprep.subr.bf16.mxu1 %v6564_v19  ;;  %v6628_v17 = vld [vmem:[%s7357_s1 + $0x190] sm:$0xff]  }
  0x26   : > { %6056 = vmatprep.subr.bf16.mxu0 %v6566_v20 }
  0x27   : > { %5833 = vmatmul.mubr.bf16.vlgmr.msra.gmra.mrb[0].mxu1 %v6563_v18  ;;  %v6621_v18 = vld [vmem:[%s6872_s20 + $0x20] sm:$0xff]  }
  0x28   : > { %6025 = vmatmul.mubr.bf16.vlgmr.msra.gmra.mrb[0].mxu0 %v6565_v21  ;;  %5865 = vmatpush3.bf16.msra.mxu1 %v6564_v19  ;;  %v6623_v19 = vld [vmem:[%s6872_s20 + $0xf8] sm:$0xff]   ;;  %v6626_v21 = vld [vmem:[%s6872_s20 + $0x100] sm:$0xff]  }
  0x29   : > { %6057 = vmatpush3.bf16.msra.mxu0 %v6566_v20  ;;  %5836 = vmatprep.mubr.bf16.mxu1 %v6568_v23  ;;  %v6625_v20 = vld [vmem:[%s6872_s20 + $0x28] sm:$0xff]   ;;  %v6627_v23 = vld [vmem:[%s6872_s20 + $0x30] sm:$0xff]  }
  0x2a   : > { %6058 = vmatprep.subr.bf16.mxu0 %v6567_v22  ;;  %6028 = vmatprep.mubr.bf16.mxu0 %v6569_v24  ;;  %v6640_v24 = vld [vmem:[%s7357_s1 + $0x1a0] sm:$0xff]  }
  0x2b   : > { %5866 = vmatprep.subr.bf16.mxu1 %v6571_v25 }
  0x2c   : > { %5867 = vmatpush3.bf16.msra.mxu1 %v6571_v25  ;;  %v6629_v25 = vld [vmem:[%s6872_s20 + $0x108] sm:$0xff]  }
  0x2d   : > { %6059 = vmatpush3.bf16.msra.mxu0 %v6567_v22  ;;  %5868 = vmatprep.subr.bf16.mxu1 %v6578_v27  ;;  %v6634_v22 = vld [vmem:[%s7357_s1 + $0x198] sm:$0xff]  }
  0x2e   : > { %6060 = vmatprep.subr.bf16.mxu0 %v6573_v28 }
  0x2f   : > { %5837 = vmatmul.mubr.bf16.gmra.mrb[4].mxu1 %v6570_v26  ;;  %v6631_v26 = vld [vmem:[%s6872_s20 + $0x38] sm:$0xff]  }
  0x30   : > { %6029 = vmatmul.mubr.bf16.gmra.mrb[4].mxu0 %v6572_v29  ;;  %5840 = vmatprep.mubr.bf16.mxu1 %v6575_v30  ;;  %v6633_v29 = vld [vmem:[%s6872_s20 + $0x40] sm:$0xff]   ;;  %v6652_v30 = vld [vmem:[%s7357_s1 + $0x1b0] sm:$0xff]  }
  0x31   : > { %6061 = vmatpush3.bf16.msra.mxu0 %v6573_v28  ;;  %6032 = vmatprep.mubr.bf16.mxu0 %v6576_v31  ;;  %v6646_v28 = vld [vmem:[%s7357_s1 + $0x1a8] sm:$0xff]   ;;  %v6635_v31 = vld [vmem:[%s6872_s20 + $0x118] sm:$0xff]  }
  0x32   : > { %6062 = vmatprep.subr.bf16.mxu0 %v6574_v32  ;;  %5869 = vmatpush3.bf16.msra.mxu1 %v6578_v27  ;;  %v6632_v27 = vld [vmem:[%s6872_s20 + $0x110] sm:$0xff]  }
  0x33   : > { %5870 = vmatprep.subr.bf16.mxu1 %v6585_v33 }
  0x35   : > { %6063 = vmatpush3.bf16.msra.mxu0 %v6574_v32  ;;  %v6637_v32 = vld [vmem:[%s6872_s20 + $0x48] sm:$0xff]  }
  0x36   : > { %6064 = vmatprep.subr.bf16.mxu0 %v6580_v36  ;;  %5871 = vmatpush3.bf16.msra.mxu1 %v6585_v33  ;;  %v6638_v33 = vld [vmem:[%s6872_s20 + $0x120] sm:$0xff]  }
  0x37   : > { %5841 = vmatmul.mubr.bf16.gmra.mrb[8].mxu1 %v6577_v34  ;;  %5872 = vmatprep.subr.bf16.mxu1 %v6592_v38  ;;  %v6658_v34 = vld [vmem:[%s7357_s1 + $0x1b8] sm:$0xff]  }
  0x38   : > { %6033 = vmatmul.mubr.bf16.gmra.mrb[8].mxu0 %v6579_v35  ;;  %5844 = vmatprep.mubr.bf16.mxu1 %v6582_v37  ;;  %v6639_v35 = vld [vmem:[%s6872_s20 + $0x50] sm:$0xff]   ;;  %v6641_v37 = vld [vmem:[%s6872_s20 + $0x128] sm:$0xff]  }
  0x39   : > { %6065 = vmatpush3.bf16.msra.mxu0 %v6580_v36  ;;  %6036 = vmatprep.mubr.bf16.mxu0 %v6583_v39  ;;  %v7045_v36 = vld [vmem:[%s7357_s1 + $0x40] sm:$0xff]   ;;  %v6644_v39 = vld [vmem:[%s6872_s20 + $0x130] sm:$0xff]  }
  0x3a   : > { %6066 = vmatprep.subr.bf16.mxu0 %v6581_v40  ;;  %5873 = vmatpush3.bf16.msra.mxu1 %v6592_v38  ;;  %v6643_v38 = vld [vmem:[%s6872_s20 + $0x58] sm:$0xff]  }
  0x3b   : > { %5874 = vmatprep.subr.bf16.mxu1 %v6598_v43 }
  0x3d   : > { %6067 = vmatpush3.bf16.msra.mxu0 %v6581_v40  ;;  %v6648_v40 = vld [vmem:[%s7357_s1 + $0x148] sm:$0xff]  }
  0x3e   : > { %6068 = vmatprep.subr.bf16.mxu0 %v6587_v42  ;;  %5875 = vmatpush3.bf16.msra.mxu1 %v6598_v43  ;;  %v6647_v43 = vld [vmem:[%s6872_s20 + $0x138] sm:$0xff]  }
  0x3f   : > { %5845 = vmatmul.mubr.bf16.gmra.mrb[12].mxu1 %v6584_v41  ;;  %5876 = vmatprep.subr.bf16.mxu1 %v6604_v48  ;;  %v6645_v41 = vld [vmem:[%s6872_s20 + $0x60] sm:$0xff]  }
  0x40   : > { %6037 = vmatmul.mubr.bf16.gmra.mrb[12].mxu0 %v6586_v44  ;;  %5848 = vmatprep.mubr.bf16.mxu1 %v6589_v45  ;;  %v6649_v44 = vld [vmem:[%s6872_s20 + $0x68] sm:$0xff]   ;;  %v6650_v45 = vld [vmem:[%s6872_s20 + $0x140] sm:$0xff]  }
  0x41   : > { %6069 = vmatpush3.bf16.msra.mxu0 %v6587_v42  ;;  %6072 = vmatprep.mubr.bf16.mxu0 %v6590_v46  ;;  %v6654_v42 = vld [vmem:[%s7357_s1 + $0x150] sm:$0xff]   ;;  %v6660_v46 = vld [vmem:[%s7357_s1 + $0x158] sm:$0xff]  }
  0x42   : > { %6070 = vmatprep.subr.bf16.mxu0 %v6588_v47  ;;  %5877 = vmatpush3.bf16.msra.mxu1 %v6604_v48  ;;  %v6666_v48 = vld [vmem:[%s7357_s1 + $0x160] sm:$0xff]  }
  0x43   : > { %5878 = vmatprep.subr.bf16.mxu1 %v6610_v55 }
  0x45   : > { %6071 = vmatpush3.bf16.msra.mxu0 %v6588_v47  ;;  %v6651_v47 = vld [vmem:[%s6872_s20 + $0x70] sm:$0xff]  }
  0x46   : > { %6104 = vmatprep.subr.bf16.mxu0 %v6594_v51  ;;  %5879 = vmatpush3.bf16.msra.mxu1 %v6610_v55  ;;  %v6659_v55 = vld [vmem:[%s6872_s20 + $0x158] sm:$0xff]  }
  0x47   : > { %5849 = vmatmul.mubr.bf16.gmra.mrb[16].mxu1 %v6591_v49  ;;  %5912 = vmatprep.subr.bf16.mxu1 %v6616_v60  ;;  %v6653_v49 = vld [vmem:[%s6872_s20 + $0x148] sm:$0xff]  }
  0x48   : > { %6073 = vmatmul.mubr.bf16.vlgmr.msra.gmra.mrb[0].mxu0 %v6593_v50  ;;  %5852 = vmatprep.mubr.bf16.mxu1 %v6595_v52  ;;  %v6655_v50 = vld [vmem:[%s6872_s20 + $0x78] sm:$0xff]   ;;  %v6672_v52 = vld [vmem:[%s7357_s1 + $0x168] sm:$0xff]  }
  0x49   : > { %6105 = vmatpush3.bf16.msra.mxu0 %v6594_v51  ;;  %6076 = vmatprep.mubr.bf16.mxu0 %v6596_v53  ;;  %v6656_v51 = vld [vmem:[%s6872_s20 + $0x150] sm:$0xff]   ;;  %v6657_v53 = vld [vmem:[%s6872_s20 + $0x80] sm:$0xff]  }
  0x4a   : > { %6106 = vmatprep.subr.bf16.mxu0 %v6600_v54 }
  0x4d   : > { %6107 = vmatpush3.bf16.msra.mxu0 %v6600_v54  ;;  %v6678_v54 = vld [vmem:[%s7357_s1 + $0x170] sm:$0xff]  }
  0x4e   : > { %6108 = vmatprep.subr.bf16.mxu0 %v6606_v58 }
  0x4f   : > { %5853 = vmatmul.mubr.bf16.gmra.mrb[20].mxu1 %v6597_v56  ;;  %v6661_v56 = vld [vmem:[%s6872_s20 + $0x10] sm:$0xff]  }
  0x50   : > { %6077 = vmatmul.mubr.bf16.gmra.mrb[4].mxu0 %v6599_v57  ;;  %5856 = vmatprep.mubr.bf16.mxu1 %v6601_v59  ;;  %v6662_v57 = vld [vmem:[%s6872_s20 + $0x160] sm:$0xff]   ;;  %v6663_v59 = vld [vmem:[%s6872_s20 + $0x18] sm:$0xff]  }
  0x51   : > { %6080 = vmatprep.mubr.bf16.mxu0 %v6602_v61  ;;  %6109 = vmatpush3.bf16.msra.mxu0 %v6606_v58  ;;  %v6684_v58 = vld [vmem:[%s7357_s1 + $0x178] sm:$0xff]   ;;  %v6665_v61 = vld [vmem:[%s6872_s20 + $0x168] sm:$0xff]  }
  0x52   : > { %6110 = vmatprep.subr.bf16.mxu0 %v6612_v62 }
  0x55   : > { %6111 = vmatpush3.bf16.msra.mxu0 %v6612_v62  ;;  %v6667_v62 = vld [vmem:[%s6872_s20 + $0x20] sm:$0xff]  }
  0x56   : > { %6112 = vmatprep.subr.bf16.mxu0 %v6618_v0 }
  0x57   : > { %5857 = vmatmul.mubr.bf16.gmra.mrb[24].mxu1 %v6603_v63  ;;  %v6668_v63 = vld [vmem:[%s6872_s20 + $0x170] sm:$0xff]  }
  0x58   : > { %6081 = vmatmul.mubr.bf16.gmra.mrb[8].mxu0 %v6605_v1  ;;  %5860 = vmatprep.mubr.bf16.mxu1 %v6607_v2  ;;  %v6676_v1 = vld [vmem:[%s7357_s1 + $0x50] sm:$0xff]   ;;  %v6669_v2 = vld [vmem:[%s6872_s20 + $0x28] sm:$0xff]  }
  0x59   : > { %6084 = vmatprep.mubr.bf16.mxu0 %v6608_v3  ;;  %6113 = vmatpush3.bf16.msra.mxu0 %v6618_v0  ;;  %v6670_v0 = vld [vmem:[%s7357_s1 + $0x48] sm:$0xff]   ;;  %v6671_v3 = vld [vmem:[%s6872_s20 + $0x178] sm:$0xff]  }
  0x5a   : > { %6114 = vmatprep.subr.bf16.mxu0 %v6624_v4 }
  0x5d   : > { %6115 = vmatpush3.bf16.msra.mxu0 %v6624_v4  ;;  %v6673_v4 = vld [vmem:[%s6872_s20 + $0x30] sm:$0xff]  }
  0x5e   : > { %6116 = vmatprep.subr.bf16.mxu0 %v6630_v6 }
  0x5f   : > { %5861 = vmatmul.mubr.bf16.gmra.mrb[28].mxu1 %v6609_v5  ;;  %v6674_v5 = vld [vmem:[%s6872_s20 + $0x180] sm:$0xff]  }
  0x60   : > { %6085 = vmatmul.mubr.bf16.gmra.mrb[12].mxu0 %v6611_v7  ;;  %5880 = vmatprep.mubr.bf16.mxu1 %v6613_v8  ;;  %v6675_v7 = vld [vmem:[%s6872_s20 + $0x38] sm:$0xff]   ;;  %v6688_v8 = vld [vmem:[%s7357_s1 + $0x60] sm:$0xff]  }
  0x61   : > { %6088 = vmatprep.mubr.bf16.mxu0 %v6614_v9  ;;  %6117 = vmatpush3.bf16.msra.mxu0 %v6630_v6  ;;  %v6682_v6 = vld [vmem:[%s7357_s1 + $0x58] sm:$0xff]   ;;  %v6677_v9 = vld [vmem:[%s6872_s20 + $0x188] sm:$0xff]  }
  0x62   : > { %6118 = vmatprep.subr.bf16.mxu0 %v6636_v10 }
  0x65   : > { %6119 = vmatpush3.bf16.msra.mxu0 %v6636_v10  ;;  %v6679_v10 = vld [vmem:[%s6872_s20 + $0x40] sm:$0xff]  }
  0x66   : > { %6152 = vmatprep.subr.bf16.mxu0 %v6642_v16 }
  0x67   : > { %5881 = vmatmul.mubr.bf16.vlgmr.msra.gmra.mrb[0].mxu1 %v6615_v11  ;;  %v6680_v11 = vld [vmem:[%s6872_s20 + $0x190] sm:$0xff]  }
  0x68   : > { %6089 = vmatmul.mubr.bf16.gmra.mrb[16].mxu0 %v6617_v12  ;;  %5913 = vmatpush3.bf16.msra.mxu1 %v6616_v60  ;;  %v7088_v60 = vld [vmem:[%s7357_s1 + $0x200] sm:$0xff]   ;;  %v6694_v12 = vld [vmem:[%s7357_s1 + $0x68] sm:$0xff]  }
  0x69   : > { %5884 = vmatprep.mubr.bf16.mxu1 %v6619_v13  ;;  %6092 = vmatprep.mubr.bf16.mxu0 %v6620_v14  ;;  %v6681_v13 = vld [vmem:[%s6872_s20 + $0x48] sm:$0xff]   ;;  %v6700_v14 = vld [vmem:[%s7357_s1 + $0x70] sm:$0xff]  }
  0x6a   : > { %5914 = vmatprep.subr.bf16.mxu1 %v6622_v15 }
  0x6c   : > { %5915 = vmatpush3.bf16.msra.mxu1 %v6622_v15  ;;  %v6683_v15 = vld [vmem:[%s6872_s20 + $0x198] sm:$0xff]  }
  0x6d   : > { %5916 = vmatprep.subr.bf16.mxu1 %v6628_v17 }
  0x6f   : > { %5885 = vmatmul.mubr.bf16.gmra.mrb[4].mxu1 %v6621_v18  ;;  %v6706_v18 = vld [vmem:[%s7357_s1 + $0x78] sm:$0xff]  }
  0x70   : > { %6093 = vmatmul.mubr.bf16.gmra.mrb[20].mxu0 %v6623_v19  ;;  %5888 = vmatprep.mubr.bf16.mxu1 %v6625_v20  ;;  %v6687_v19 = vld [vmem:[%s6872_s20 + $0x58] sm:$0xff]   ;;  %v6689_v20 = vld [vmem:[%s6872_s20 + $0x130] sm:$0xff]  }
  0x71   : > { %6096 = vmatprep.mubr.bf16.mxu0 %v6626_v21  ;;  %5917 = vmatpush3.bf16.msra.mxu1 %v6628_v17  ;;  %v6686_v17 = vld [vmem:[%s6872_s20 + $0x128] sm:$0xff]   ;;  %v6691_v21 = vld [vmem:[%s6872_s20 + $0x60] sm:$0xff]  }
  0x72   : > { %5918 = vmatprep.subr.bf16.mxu1 %v6634_v22 }
  0x75   : > { %5919 = vmatpush3.bf16.msra.mxu1 %v6634_v22  ;;  %v6692_v22 = vld [vmem:[%s6872_s20 + $0x138] sm:$0xff]  }
  0x76   : > { %5920 = vmatprep.subr.bf16.mxu1 %v6640_v24 }
  0x77   : > { %5889 = vmatmul.mubr.bf16.gmra.mrb[8].mxu1 %v6627_v23  ;;  %v6696_v23 = vld [vmem:[%s7357_s1 + $0x208] sm:$0xff]  }
  0x78   : > { %6097 = vmatmul.mubr.bf16.gmra.mrb[24].mxu0 %v6629_v25  ;;  %5892 = vmatprep.mubr.bf16.mxu1 %v6631_v26  ;;  %v6693_v25 = vld [vmem:[%s6872_s20 + $0x68] sm:$0xff]   ;;  %v6702_v26 = vld [vmem:[%s7357_s1 + $0x210] sm:$0xff]  }
  0x79   : > { %6100 = vmatprep.mubr.bf16.mxu0 %v6632_v27  ;;  %5921 = vmatpush3.bf16.msra.mxu1 %v6640_v24  ;;  %v6761_v24 = vld [vmem:[%s7357_s1 + $0x100] sm:$0xff]  }
  0x7a   : > { %5922 = vmatprep.subr.bf16.mxu1 %v6646_v28  ;;  %v6695_v27 = vld [vmem:[%s6872_s20 + $0x140] sm:$0xff]  }
  0x7d   : > { %5923 = vmatpush3.bf16.msra.mxu1 %v6646_v28  ;;  %v6697_v28 = vld [vmem:[%s6872_s20 + $0x70] sm:$0xff]  }
  0x7e   : > { %5924 = vmatprep.subr.bf16.mxu1 %v6652_v30 }
  0x7f   : > { %5893 = vmatmul.mubr.bf16.gmra.mrb[12].mxu1 %v6633_v29  ;;  %v6698_v29 = vld [vmem:[%s6872_s20 + $0x148] sm:$0xff]  }
  0x80   : > { %6101 = vmatmul.mubr.bf16.gmra.mrb[28].mxu0 %v6635_v31  ;;  %5896 = vmatprep.mubr.bf16.mxu1 %v6637_v32  ;;  %v6699_v31 = vld [vmem:[%s6872_s20 + $0x78] sm:$0xff]   ;;  %v6713_v32 = vld [vmem:[%s7357_s1 + $0x220] sm:$0xff]  }
  0x81   : > { %6120 = vmatprep.mubr.bf16.mxu0 %v6638_v33  ;;  %5925 = vmatpush3.bf16.msra.mxu1 %v6652_v30  ;;  %v6708_v30 = vld [vmem:[%s7357_s1 + $0x218] sm:$0xff]   ;;  %v6701_v33 = vld [vmem:[%s6872_s20 + $0x150] sm:$0xff]  }
  0x82   : > { %5926 = vmatprep.subr.bf16.mxu1 %v6658_v34 }
  0x85   : > { %5927 = vmatpush3.bf16.msra.mxu1 %v6658_v34  ;;  %v6703_v34 = vld [vmem:[%s6872_s20 + $0x80] sm:$0xff]  }
  0x86   : > { %5960 = vmatprep.subr.bf16.mxu1 %v7045_v36 }
  0x87   : > { %5897 = vmatmul.mubr.bf16.gmra.mrb[16].mxu1 %v6639_v35  ;;  %v6704_v35 = vld [vmem:[%s6872_s20 + $0x158] sm:$0xff]  }
  0x88   : > { %6121 = vmatmul.mubr.bf16.vlgmr.msra.gmra.mrb[0].mxu0 %v6641_v37  ;;  %5900 = vmatprep.mubr.bf16.mxu1 %v6643_v38  ;;  %v6705_v37 = vld [vmem:[%s6872_s20 + $0x88] sm:$0xff]   ;;  %v6723_v38 = vld [vmem:[%s7357_s1 + $0x230] sm:$0xff]  }
  0x89   : > { %6153 = vmatpush3.bf16.msra.mxu0 %v6642_v16  ;;  %6124 = vmatprep.mubr.bf16.mxu0 %v6644_v39  ;;  %v6685_v16 = vld [vmem:[%s6872_s20 + $0x50] sm:$0xff]   ;;  %v6707_v39 = vld [vmem:[%s6872_s20 + $0x160] sm:$0xff]  }
  0x8a   : > { %6154 = vmatprep.subr.bf16.mxu0 %v6648_v40 }
  0x8d   : > { %6155 = vmatpush3.bf16.msra.mxu0 %v6648_v40  ;;  %v6709_v40 = vld [vmem:[%s6872_s20 + $0x90] sm:$0xff]  }
  0x8e   : > { %6156 = vmatprep.subr.bf16.mxu0 %v6654_v42 }
  0x8f   : > { %5901 = vmatmul.mubr.bf16.gmra.mrb[20].mxu1 %v6645_v41  ;;  %v6710_v41 = vld [vmem:[%s6872_s20 + $0x168] sm:$0xff]  }
  0x90   : > { %6125 = vmatmul.mubr.bf16.gmra.mrb[4].mxu0 %v6647_v43  ;;  %5904 = vmatprep.mubr.bf16.mxu1 %v6649_v44  ;;  %v6711_v43 = vld [vmem:[%s6872_s20 + $0x98] sm:$0xff]   ;;  %v6712_v44 = vld [vmem:[%s6872_s20 + $0x170] sm:$0xff]  }
  0x91   : > { %6128 = vmatprep.mubr.bf16.mxu0 %v6650_v45  ;;  %6157 = vmatpush3.bf16.msra.mxu0 %v6654_v42  ;;  %v6728_v42 = vld [vmem:[%s7357_s1 + $0x238] sm:$0xff]   ;;  %v6714_v45 = vld [vmem:[%s6872_s20 + $0xa0] sm:$0xff]  }
  0x92   : > { %6158 = vmatprep.subr.bf16.mxu0 %v6660_v46 }
  0x95   : > { %6159 = vmatpush3.bf16.msra.mxu0 %v6660_v46  ;;  %v6715_v46 = vld [vmem:[%s6872_s20 + $0x178] sm:$0xff]  }
  0x96   : > { %6160 = vmatprep.subr.bf16.mxu0 %v6666_v48 }
  0x97   : > { %5905 = vmatmul.mubr.bf16.gmra.mrb[24].mxu1 %v6651_v47  ;;  %v6762_v47 = vld [vmem:[%s7357_s1 + $0x108] sm:$0xff]  }
  0x98   : > { %6129 = vmatmul.mubr.bf16.gmra.mrb[8].mxu0 %v6653_v49  ;;  %5908 = vmatprep.mubr.bf16.mxu1 %v6655_v50  ;;  %v6717_v49 = vld [vmem:[%s6872_s20 + $0x180] sm:$0xff]   ;;  %v6719_v50 = vld [vmem:[%s6872_s20 + $0xb0] sm:$0xff]  }
  0x99   : > { %6132 = vmatprep.mubr.bf16.mxu0 %v6656_v51  ;;  %6161 = vmatpush3.bf16.msra.mxu0 %v6666_v48  ;;  %v6716_v48 = vld [vmem:[%s6872_s20 + $0xa8] sm:$0xff]  }
  0x9a   : > { %6162 = vmatprep.subr.bf16.mxu0 %v6672_v52  ;;  %v6720_v51 = vld [vmem:[%s6872_s20 + $0x188] sm:$0xff]  }
  0x9d   : > { %6163 = vmatpush3.bf16.msra.mxu0 %v6672_v52  ;;  %v6763_v52 = vld [vmem:[%s7357_s1 + $0x110] sm:$0xff]  }
  0x9e   : > { %6164 = vmatprep.subr.bf16.mxu0 %v6678_v54 }
  0x9f   : > { %5909 = vmatmul.mubr.bf16.gmra.mrb[28].mxu1 %v6657_v53  ;;  %v6764_v53 = vld [vmem:[%s7357_s1 + $0x118] sm:$0xff]  }
  0xa0   : > { %6133 = vmatmul.mubr.bf16.gmra.mrb[12].mxu0 %v6659_v55  ;;  %5928 = vmatprep.mubr.bf16.mxu1 %v6661_v56  ;;  %v6722_v55 = vld [vmem:[%s6872_s20 + $0x190] sm:$0xff]   ;;  %v6724_v56 = vld [vmem:[%s6872_s20 + $0xc0] sm:$0xff]  }
  0xa1   : > { %6136 = vmatprep.mubr.bf16.mxu0 %v6662_v57  ;;  %6165 = vmatpush3.bf16.msra.mxu0 %v6678_v54  ;;  %v6721_v54 = vld [vmem:[%s6872_s20 + $0xb8] sm:$0xff]  }
  0xa2   : > { %6166 = vmatprep.subr.bf16.mxu0 %v6684_v58  ;;  %v6725_v57 = vld [vmem:[%s6872_s20 + $0x198] sm:$0xff]  }
  0xa5   : > { %6167 = vmatpush3.bf16.msra.mxu0 %v6684_v58  ;;  %v6765_v58 = vld [vmem:[%s7357_s1 + $0x120] sm:$0xff]  }
  0xa6   : > { %6200 = vmatprep.subr.bf16.mxu0 %v7088_v60 }
  0xa7   : > { %5929 = vmatmul.mubr.bf16.vlgmr.msra.gmra.mrb[0].mxu1 %v6663_v59  ;;  %v6766_v59 = vld [vmem:[%s7357_s1 + $0x128] sm:$0xff]  }
  0xa8   : > { %6137 = vmatmul.mubr.bf16.gmra.mrb[16].mxu0 %v6665_v61  ;;  %5961 = vmatpush3.bf16.msra.mxu1 %v7045_v36  ;;  %v6718_v36 = vld [vmem:[%s7357_s1 + $0x228] sm:$0xff]   ;;  %v6727_v61 = vld [vmem:[%s6872_s20 + $0x1a0] sm:$0xff]  }
  0xa9   : > { %5932 = vmatprep.mubr.bf16.mxu1 %v6667_v62  ;;  %6140 = vmatprep.mubr.bf16.mxu0 %v6668_v63  ;;  %v6729_v62 = vld [vmem:[%s6872_s20 + $0xd0] sm:$0xff]  }
  0xaa   : > { %5962 = vmatprep.subr.bf16.mxu1 %v6670_v0  ;;  %v6730_v63 = vld [vmem:[%s6872_s20 + $0x130] sm:$0xff]  }
  0xac   : > { %5963 = vmatpush3.bf16.msra.mxu1 %v6670_v0  ;;  %v6767_v0 = vld [vmem:[%s7357_s1 + $0x130] sm:$0xff]  }
  0xad   : > { %5964 = vmatprep.subr.bf16.mxu1 %v6676_v1 }
  0xaf   : > { %5933 = vmatmul.mubr.bf16.gmra.mrb[4].mxu1 %v6669_v2  ;;  %v6731_v2 = vld [vmem:[%s6872_s20 + $0xd8] sm:$0xff]  }
  0xb0   : > { %6141 = vmatmul.mubr.bf16.gmra.mrb[20].mxu0 %v6671_v3  ;;  %5936 = vmatprep.mubr.bf16.mxu1 %v6673_v4  ;;  %v6732_v3 = vld [vmem:[%s6872_s20 + $0x138] sm:$0xff]   ;;  %v6733_v4 = vld [vmem:[%s6872_s20 + $0xe0] sm:$0xff]  }
  0xb1   : > { %6144 = vmatprep.mubr.bf16.mxu0 %v6674_v5  ;;  %5965 = vmatpush3.bf16.msra.mxu1 %v6676_v1  ;;  %v6768_v1 = vld [vmem:[%s7357_s1 + $0x138] sm:$0xff]   ;;  %v6734_v5 = vld [vmem:[%s6872_s20 + $0x140] sm:$0xff]  }
  0xb2   : > { %5966 = vmatprep.subr.bf16.mxu1 %v6682_v6 }
  0xb5   : > { %5967 = vmatpush3.bf16.msra.mxu1 %v6682_v6  ;;  %v6735_v6 = vld [vmem:[%s6872_s20 + $0xe8] sm:$0xff]  }
  0xb6   : > { %5968 = vmatprep.subr.bf16.mxu1 %v6688_v8 }
  0xb7   : > { %5937 = vmatmul.mubr.bf16.gmra.mrb[8].mxu1 %v6675_v7  ;;  %v6736_v7 = vld [vmem:[%s6872_s20 + $0x148] sm:$0xff]  }
  0xb8   : > { %6145 = vmatmul.mubr.bf16.gmra.mrb[24].mxu0 %v6677_v9  ;;  %5940 = vmatprep.mubr.bf16.mxu1 %v6679_v10  ;;  %v6738_v9 = vld [vmem:[%s6872_s20 + $0x150] sm:$0xff]   ;;  %v6739_v10 = vld [vmem:[%s6872_s20 + $0xf8] sm:$0xff]  }
  0xb9   : > { %6148 = vmatprep.mubr.bf16.mxu0 %v6680_v11  ;;  %5969 = vmatpush3.bf16.msra.mxu1 %v6688_v8  ;;  %v6737_v8 = vld [vmem:[%s6872_s20 + $0xf0] sm:$0xff]   ;;  %v6740_v11 = vld [vmem:[%s6872_s20 + $0x158] sm:$0xff]  }
  0xba   : > { %5970 = vmatprep.subr.bf16.mxu1 %v6694_v12 }
  0xbd   : > { %5971 = vmatpush3.bf16.msra.mxu1 %v6694_v12  ;;  %v6741_v12 = vld [vmem:[%s6872_s20 + $0x100] sm:$0xff]  }
  0xbe   : > { %5972 = vmatprep.subr.bf16.mxu1 %v6700_v14 }
  0xbf   : > { %5941 = vmatmul.mubr.bf16.gmra.mrb[12].mxu1 %v6681_v13  ;;  %v6742_v13 = vld [vmem:[%s6872_s20 + $0x160] sm:$0xff]  }
  0xc0   : > { %6149 = vmatmul.mubr.bf16.gmra.mrb[28].mxu0 %v6683_v15  ;;  %5944 = vmatprep.mubr.bf16.mxu1 %v6685_v16  ;;  %v6744_v15 = vld [vmem:[%s6872_s20 + $0x168] sm:$0xff]   ;;  %v6745_v16 = vld [vmem:[%s6872_s20 + $0xd8] sm:$0xff]  }
  0xc1   : > { %6168 = vmatprep.mubr.bf16.mxu0 %v6686_v17  ;;  %5973 = vmatpush3.bf16.msra.mxu1 %v6700_v14  ;;  %v6743_v14 = vld [vmem:[%s6872_s20 + $0x108] sm:$0xff]   ;;  %v6746_v17 = vld [vmem:[%s6872_s20 + $0x170] sm:$0xff]  }
  0xc2   : > { %5974 = vmatprep.subr.bf16.mxu1 %v6706_v18 }
  0xc5   : > { %5975 = vmatpush3.bf16.msra.mxu1 %v6706_v18  ;;  %v6747_v18 = vld [vmem:[%s6872_s20 + $0xe0] sm:$0xff]  }
  0xc6   : > { %6248 = vmatprep.subr.bf16.mxu1 %v6761_v24 }
  0xc7   : > { %5945 = vmatmul.mubr.bf16.gmra.mrb[16].mxu1 %v6687_v19  ;;  %v6748_v19 = vld [vmem:[%s6872_s20 + $0x178] sm:$0xff]  }
  0xc8   : > { %6169 = vmatmul.mubr.bf16.vlgmr.msra.gmra.mrb[0].mxu0 %v6689_v20  ;;  %5948 = vmatprep.mubr.bf16.mxu1 %v6691_v21  ;;  %v6749_v20 = vld [vmem:[%s6872_s20 + $0xe8] sm:$0xff]   ;;  %v6750_v21 = vld [vmem:[%s6872_s20 + $0x180] sm:$0xff]  }
  0xc9   : > { %6201 = vmatpush3.bf16.msra.mxu0 %v7088_v60  ;;  %6172 = vmatprep.mubr.bf16.mxu0 %v6692_v22  ;;  %v6726_v60 = vld [vmem:[%s6872_s20 + $0xc8] sm:$0xff]   ;;  %v6751_v22 = vld [vmem:[%s6872_s20 + $0xf0] sm:$0xff]  }
  0xca   : > { %6202 = vmatprep.subr.bf16.mxu0 %v6696_v23 }
  0xcd   : > { %6203 = vmatpush3.bf16.msra.mxu0 %v6696_v23  ;;  %v6752_v23 = vld [vmem:[%s6872_s20 + $0x188] sm:$0xff]  }
  0xce   : > { %6204 = vmatprep.subr.bf16.mxu0 %v6702_v26 }
  0xcf   : > { %5949 = vmatmul.mubr.bf16.gmra.mrb[20].mxu1 %v6693_v25  ;;  %v6754_v25 = vld [vmem:[%s6872_s20 + $0x190] sm:$0xff]  }
  0xd0   : > { %6173 = vmatmul.mubr.bf16.gmra.mrb[4].mxu0 %v6695_v27  ;;  %5952 = vmatprep.mubr.bf16.mxu1 %v6697_v28  ;;  %v6756_v27 = vld [vmem:[%s6872_s20 + $0x198] sm:$0xff]   ;;  %v6757_v28 = vld [vmem:[%s6872_s20 + $0x108] sm:$0xff]  }
  0xd1   : > { %6176 = vmatprep.mubr.bf16.mxu0 %v6698_v29  ;;  %6205 = vmatpush3.bf16.msra.mxu0 %v6702_v26  ;;  %v6755_v26 = vld [vmem:[%s6872_s20 + $0x100] sm:$0xff]  }
  0xd2   : > { %6206 = vmatprep.subr.bf16.mxu0 %v6708_v30  ;;  %v6758_v29 = vld [vmem:[%s6872_s20 + $0x1a0] sm:$0xff]  }
  0xd5   : > { %6207 = vmatpush3.bf16.msra.mxu0 %v6708_v30  ;;  %v6759_v30 = vld [vmem:[%s6872_s20 + $0x110] sm:$0xff]  }
  0xd6   : > { %6208 = vmatprep.subr.bf16.mxu0 %v6713_v32 }
  0xd7   : > { %5953 = vmatmul.mubr.bf16.gmra.mrb[24].mxu1 %v6699_v31  ;;  %v6760_v31 = vld [vmem:[%s6872_s20 + $0x1a8] sm:$0xff]  }
  0xd8   : > { %6177 = vmatmul.mubr.bf16.gmra.mrb[8].mxu0 %v6701_v33  ;;  %5956 = vmatprep.mubr.bf16.mxu1 %v6703_v34 }
  0xd9   : > { %6180 = vmatprep.mubr.bf16.mxu0 %v6704_v35  ;;  %6209 = vmatpush3.bf16.msra.mxu0 %v6713_v32 }
  0xda   : > { %6210 = vmatprep.subr.bf16.mxu0 %v6718_v36 }
  0xdd   : > { %6211 = vmatpush3.bf16.msra.mxu0 %v6718_v36 }
  0xde   : > { %6212 = vmatprep.subr.bf16.mxu0 %v6723_v38 }
  0xdf   : > { %5957 = vmatmul.mubr.bf16.gmra.mrb[28].mxu1 %v6705_v37 }
  0xe0   : > { %6181 = vmatmul.mubr.bf16.gmra.mrb[12].mxu0 %v6707_v39  ;;  %5976 = vmatprep.mubr.bf16.mxu1 %v6709_v40 }
  0xe1   : > { %6184 = vmatprep.mubr.bf16.mxu0 %v6710_v41  ;;  %6213 = vmatpush3.bf16.msra.mxu0 %v6723_v38 }
  0xe2   : > { %6214 = vmatprep.subr.bf16.mxu0 %v6728_v42 }
  0xe5   : > { %6215 = vmatpush3.bf16.msra.mxu0 %v6728_v42 }
  0xe7   : > { %5977 = vmatmul.mubr.bf16.vlgmr.msra.gmra.mrb[0].mxu1 %v6711_v43 }
  0xe8   : > { %6185 = vmatmul.mubr.bf16.gmra.mrb[16].mxu0 %v6712_v44  ;;  %6256 = vmatpush3.bf16.msra.mxu1 %v6761_v24  ;;  %v6753_v24 = vld [vmem:[%s6872_s20 + $0xf8] sm:$0xff]  }
  0xe9   : > { %5980 = vmatprep.mubr.bf16.mxu1 %v6714_v45  ;;  %6188 = vmatprep.mubr.bf16.mxu0 %v6715_v46 }
  0xea   : > { %6249 = vmatprep.subr.bf16.mxu1 %v6762_v47 }
  0xec   : > { %6257 = vmatpush3.bf16.msra.mxu1 %v6762_v47 }
  0xed   : > { %6250 = vmatprep.subr.bf16.mxu1 %v6763_v52 }
  0xef   : > { %5981 = vmatmul.mubr.bf16.gmra.mrb[4].mxu1 %v6716_v48 }
  0xf0   : > { %6189 = vmatmul.mubr.bf16.gmra.mrb[20].mxu0 %v6717_v49  ;;  %5984 = vmatprep.mubr.bf16.mxu1 %v6719_v50  ;;  %v7249_v49 = vld [vmem:[%s7358_s2] ss:$0 sm:$0xff] }
  0xf1   : > { %6192 = vmatprep.mubr.bf16.mxu0 %v6720_v51  ;;  %6258 = vmatpush3.bf16.msra.mxu1 %v6763_v52  ;;  %v7254_v52 = vld [vmem:[%s7359_s3] ss:$0 sm:$0xff] }
  0xf2   : > { %6251 = vmatprep.subr.bf16.mxu1 %v6764_v53 }
  0xf5   : > { %6259 = vmatpush3.bf16.msra.mxu1 %v6764_v53 }
  0xf6   : > { %6252 = vmatprep.subr.bf16.mxu1 %v6765_v58 }
  0xf7   : > { %5985 = vmatmul.mubr.bf16.gmra.mrb[8].mxu1 %v6721_v54 }
  0xf8   : > { %6193 = vmatmul.mubr.bf16.gmra.mrb[24].mxu0 %v6722_v55  ;;  %5988 = vmatprep.mubr.bf16.mxu1 %v6724_v56 }
  0xf9   : > { %6196 = vmatprep.mubr.bf16.mxu0 %v6725_v57  ;;  %6260 = vmatpush3.bf16.msra.mxu1 %v6765_v58 }
  0xfa   : > { %6253 = vmatprep.subr.bf16.mxu1 %v6766_v59 }
  0xfd   : > { %6261 = vmatpush3.bf16.msra.mxu1 %v6766_v59 }
  0xfe   : > { %6254 = vmatprep.subr.bf16.mxu1 %v6767_v0 }
  0xff   : > { %5989 = vmatmul.mubr.bf16.gmra.mrb[12].mxu1 %v6726_v60 }
 0x100   : > { %6197 = vmatmul.mubr.bf16.gmra.mrb[28].mxu0 %v6727_v61  ;;  %5992 = vmatprep.mubr.bf16.mxu1 %v6729_v62 }
 0x101   : > { %6216 = vmatprep.mubr.bf16.mxu0 %v6730_v63  ;;  %6262 = vmatpush3.bf16.msra.mxu1 %v6767_v0 }
 0x102   : > { %6255 = vmatprep.subr.bf16.mxu1 %v6768_v1 }
 0x105   : > { %6263 = vmatpush3.bf16.msra.mxu1 %v6768_v1 }
 0x107   : > { %5993 = vmatmul.mubr.bf16.gmra.mrb[16].mxu1 %v6731_v2 }
 0x108   : > { %6217 = vmatmul.mubr.bf16.vlgmr.msra.gmra.mrb[0].mxu0 %v6732_v3  ;;  %5996 = vmatprep.mubr.bf16.mxu1 %v6733_v4 }
 0x109   : > { %6220 = vmatprep.mubr.bf16.mxu0 %v6734_v5 }
 0x10f   : > { %5997 = vmatmul.mubr.bf16.gmra.mrb[20].mxu1 %v6735_v6 }
 0x110   : > { %6221 = vmatmul.mubr.bf16.gmra.mrb[4].mxu0 %v6736_v7  ;;  %6000 = vmatprep.mubr.bf16.mxu1 %v6737_v8 }
 0x111   : > { %6224 = vmatprep.mubr.bf16.mxu0 %v6738_v9 }
 0x117   : > { %6001 = vmatmul.mubr.bf16.gmra.mrb[24].mxu1 %v6739_v10 }
 0x118   : > { %6225 = vmatmul.mubr.bf16.gmra.mrb[8].mxu0 %v6740_v11  ;;  %6004 = vmatprep.mubr.bf16.mxu1 %v6741_v12 }
 0x119   : > { %6228 = vmatprep.mubr.bf16.mxu0 %v6742_v13 }
 0x11f   : > { %6005 = vmatmul.mubr.bf16.gmra.mrb[28].mxu1 %v6743_v14 }
 0x120   : > { %6229 = vmatmul.mubr.bf16.gmra.mrb[12].mxu0 %v6744_v15  ;;  %6040 = vmatprep.mubr.bf16.mxu1 %v6745_v16 }
 0x121   : > { %6232 = vmatprep.mubr.bf16.mxu0 %v6746_v17 }
 0x127   : > { %6041 = vmatmul.mubr.bf16.vlgmr.msra.gmra.mrb[16].mxu1 %v6747_v18 }
 0x128   : > { %6233 = vmatmul.mubr.bf16.gmra.mrb[16].mxu0 %v6748_v19  ;;  %6044 = vmatprep.mubr.bf16.mxu1 %v6749_v20 }
 0x129   : > { %6236 = vmatprep.mubr.bf16.mxu0 %v6750_v21 }
 0x12f   : > { %6045 = vmatmul.mubr.bf16.gmra.mrb[20].mxu1 %v6751_v22 }
 0x130   : > { %6237 = vmatmul.mubr.bf16.gmra.mrb[20].mxu0 %v6752_v23  ;;  %6048 = vmatprep.mubr.bf16.mxu1 %v6753_v24 }
 0x131   : > { %6240 = vmatprep.mubr.bf16.mxu0 %v6754_v25 }
 0x137   : > { %6049 = vmatmul.mubr.bf16.gmra.mrb[24].mxu1 %v6755_v26 }
 0x138   : > { %6241 = vmatmul.mubr.bf16.gmra.mrb[24].mxu0 %v6756_v27  ;;  %6052 = vmatprep.mubr.bf16.mxu1 %v6757_v28 }
 0x139   : > { %6244 = vmatprep.mubr.bf16.mxu0 %v6758_v29 }
 0x13f   : > { %6053 = vmatmul.mubr.bf16.gmra.mrb[28].mxu1 %v6759_v30 }
 0x140   : > { %6245 = vmatmul.mubr.bf16.gmra.mrb[28].mxu0 %v6760_v31 }
 0x1ba   : > { %v5978_v32 = vpop.f32.mrb[0].mxu1 }
 0x1bb   : > { %v1945_v33 = vpop.f32.mrb[1].mxu1 }
 0x1bc   : > { %v5979_v34 = vpop.f32.mrb[2].mxu1 }
 0x1bd   : > { %v1948_v35 = vpop.f32.mrb[3].mxu1 }
 0x1c2   : > { %v5982_v36 = vpop.f32.mrb[4].mxu1 }
 0x1c3   : > { %v1961_v37 = vpop.f32.mrb[5].mxu1 }
 0x1c4   : > { %v5983_v38 = vpop.f32.mrb[6].mxu1 }
 0x1c5   : > { %v1964_v39 = vpop.f32.mrb[7].mxu1 }
 0x1ca   : > { %v5986_v40 = vpop.f32.mrb[8].mxu1 }
 0x1cb   : > { %v1977_v41 = vpop.f32.mrb[9].mxu1 }
 0x1cc   : > { %v5987_v42 = vpop.f32.mrb[10].mxu1 }
 0x1cd   : > { %v7236_v43 = vpop.f32.mrb[11].mxu1 }
 0x1d2   : > { %v7238_v44 = vpop.f32.mrb[12].mxu1 }
 0x1d3   : > { %v7240_v45 = vpop.f32.mrb[13].mxu1 }
 0x1d4   : > { %v7242_v46 = vpop.f32.mrb[14].mxu1 }
 0x1d5   : > { %v7244_v47 = vpop.f32.mrb[15].mxu1 }
 0x1db   : > { %v6218_v48 = vpop.f32.mrb[0].mxu0 }
 0x1dc   : > { %v6264_v50 = vadd.f32 %v6218_v48, %v5978_v32  ;;  %v4200_v51 = vpop.f32.mrb[1].mxu0 }
 0x1dd   : > { %v6265_v53 = vadd.f32 %v4200_v51, %v1945_v33  ;;  %v6219_v54 = vpop.f32.mrb[2].mxu0 }
 0x1de   : > { %v4435_v55 = vmul.f32 %v6264_v50, %v7249_v49  ;;  %v6266_v56 = vadd.f32 %v6219_v54, %v5979_v34  ;;  %v4203_v57 = vpop.f32.mrb[3].mxu0 }
 0x1df   : > { %v4433_v58 = vmul.f32 %v6265_v53, %v7249_v49  ;;  %v6267_v59 = vadd.f32 %v4203_v57, %v1948_v35 }
 0x1e0   : > { %v4474_v60 = vadd.f32 %v7254_v52, %v4435_v55  ;;  %v4436_v61 = vmul.f32 %v6266_v56, %v7249_v49 }
 0x1e1   : > { %v4472_v62 = vadd.f32 %v7254_v52, %v4433_v58  ;;  %v4434_v63 = vmul.f32 %v6267_v59, %v7249_v49 }
 0x1e2   : > { %v4475_v0 = vadd.f32 %v7254_v52, %v4436_v61  ;;  %v4506_v3 = vmax.f32 %v4474_v60, 0.0 }
 0x1e3   : > { %v4473_v1 = vadd.f32 %v7254_v52, %v4434_v63  ;;  %v6222_v2 = vpop.f32.mrb[4].mxu0  ;;  %v4504_v7 = vmax.f32 %v4472_v62, 0.0 }
 0x1e4   : > { %v4507_v4 = vmax.f32 %v4475_v0, 0.0  ;;  %v6268_v5 = vadd.f32 %v6222_v2, %v5982_v36  ;;  %v4216_v6 = vpop.f32.mrb[5].mxu0 }
 0x1e5   : > { %v4505_v8 = vmax.f32 %v4473_v1, 0.0  ;;  %v6269_v9 = vadd.f32 %v4216_v6, %v1961_v37  ;;  %v6223_v10 = vpop.f32.mrb[6].mxu0 }
 0x1e6   : > { %v5513_v11 = vpack.c.bf16 %v4507_v4, %v4506_v3  ;;  %v4439_v12 = vmul.f32 %v6268_v5, %v7249_v49  ;;  %v6270_v13 = vadd.f32 %v6223_v10, %v5983_v38  ;;  %v4219_v14 = vpop.f32.mrb[7].mxu0 }
 0x1e7   : > { %v5508_v15 = vpack.c.bf16 %v4505_v8, %v4504_v7  ;;  %v4437_v16 = vmul.f32 %v6269_v9, %v7249_v49  ;;  %v6271_v17 = vadd.f32 %v4219_v14, %v1964_v39 }
 0x1e8   : > { %5585 = vst [vmem:[%s7268_s19 + $0x8] sm:$0xff] %v5513_v11   ;;  %v4478_v18 = vadd.f32 %v7254_v52, %v4439_v12  ;;  %v4440_v19 = vmul.f32 %v6270_v13, %v7249_v49 }
 0x1e9   : > { %5509 = vst [vmem:[%s7268_s19] sm:$0xff] %v5508_v15   ;;  %v4476_v20 = vadd.f32 %v7254_v52, %v4437_v16  ;;  %v4438_v21 = vmul.f32 %v6271_v17, %v7249_v49 }
 0x1ea   : > { %v4479_v22 = vadd.f32 %v7254_v52, %v4440_v19  ;;  %v4510_v25 = vmax.f32 %v4478_v18, 0.0 }
 0x1eb   : > { %v4477_v23 = vadd.f32 %v7254_v52, %v4438_v21  ;;  %v6226_v24 = vpop.f32.mrb[8].mxu0  ;;  %v4508_v29 = vmax.f32 %v4476_v20, 0.0 }
 0x1ec   : > { %v4511_v26 = vmax.f32 %v4479_v22, 0.0  ;;  %v6272_v27 = vadd.f32 %v6226_v24, %v5986_v40  ;;  %v4232_v28 = vpop.f32.mrb[9].mxu0 }
 0x1ed   : > { %v4509_v30 = vmax.f32 %v4477_v23, 0.0  ;;  %v6273_v31 = vadd.f32 %v4232_v28, %v1977_v41  ;;  %v6227_v32 = vpop.f32.mrb[10].mxu0 }
 0x1ee   : > { %v5523_v33 = vpack.c.bf16 %v4511_v26, %v4510_v25  ;;  %v4443_v34 = vmul.f32 %v6272_v27, %v7249_v49  ;;  %v6274_v35 = vadd.f32 %v6227_v32, %v5987_v42  ;;  %v4235_v36 = vpop.f32.mrb[11].mxu0 }
 0x1ef   : > { %v5518_v37 = vpack.c.bf16 %v4509_v30, %v4508_v29  ;;  %v4441_v38 = vmul.f32 %v6273_v31, %v7249_v49  ;;  %v6275_v39 = vadd.f32 %v4235_v36, %v7236_v43 }
 0x1f0   : > { %5587 = vst [vmem:[%s7268_s19 + $0x18] sm:$0xff] %v5523_v33   ;;  %v4482_v48 = vadd.f32 %v7254_v52, %v4443_v34  ;;  %v4444_v40 = vmul.f32 %v6274_v35, %v7249_v49 }
 0x1f1   : > { %5586 = vst [vmem:[%s7268_s19 + $0x10] sm:$0xff] %v5518_v37   ;;  %v4480_v50 = vadd.f32 %v7254_v52, %v4441_v38  ;;  %v4442_v41 = vmul.f32 %v6275_v39, %v7249_v49 }
 0x1f2   : > { %v4483_v51 = vadd.f32 %v7254_v52, %v4444_v40  ;;  %v4514_v54 = vmax.f32 %v4482_v48, 0.0 }
 0x1f3   : > { %v4481_v42 = vadd.f32 %v7254_v52, %v4442_v41  ;;  %v6230_v53 = vpop.f32.mrb[12].mxu0  ;;  %v4512_v57 = vmax.f32 %v4480_v50, 0.0 }
 0x1f4   : > { %v4515_v55 = vmax.f32 %v4483_v51, 0.0  ;;  %v6276_v43 = vadd.f32 %v6230_v53, %v7238_v44  ;;  %v4248_v56 = vpop.f32.mrb[13].mxu0 }
 0x1f5   : > { %v4513_v58 = vmax.f32 %v4481_v42, 0.0  ;;  %v6277_v59 = vadd.f32 %v4248_v56, %v7240_v45  ;;  %v6231_v60 = vpop.f32.mrb[14].mxu0 }
 0x1f6   : > { %v5533_v61 = vpack.c.bf16 %v4515_v55, %v4514_v54  ;;  %v4447_v62 = vmul.f32 %v6276_v43, %v7249_v49  ;;  %v6278_v63 = vadd.f32 %v6231_v60, %v7242_v46  ;;  %v4251_v0 = vpop.f32.mrb[15].mxu0 }
 0x1f7   : > { %v5528_v1 = vpack.c.bf16 %v4513_v58, %v4512_v57  ;;  %v4445_v2 = vmul.f32 %v6277_v59, %v7249_v49  ;;  %v6279_v3 = vadd.f32 %v4251_v0, %v7244_v47 }
 0x1f8   : > { %5589 = vst [vmem:[%s7268_s19 + $0x28] sm:$0xff] %v5533_v61   ;;  %v4486_v44 = vadd.f32 %v7254_v52, %v4447_v62  ;;  %v4448_v4 = vmul.f32 %v6278_v63, %v7249_v49 }
 0x1f9   : > { %5588 = vst [vmem:[%s7268_s19 + $0x20] sm:$0xff] %v5528_v1   ;;  %v4484_v45 = vadd.f32 %v7254_v52, %v4445_v2  ;;  %v4446_v5 = vmul.f32 %v6279_v3, %v7249_v49 }
 0x1fa   : > { %v4487_v6 = vadd.f32 %v7254_v52, %v4448_v4  ;;  %v6042_v7 = vpop.f32.mrb[16].mxu1  ;;  %v4518_v10 = vmax.f32 %v4486_v44, 0.0 }
 0x1fb   : > { %v4485_v46 = vadd.f32 %v7254_v52, %v4446_v5  ;;  %v6234_v8 = vpop.f32.mrb[16].mxu0  ;;  %v2460_v9 = vpop.f32.mrb[17].mxu1  ;;  %v4516_v14 = vmax.f32 %v4484_v45, 0.0 }
 0x1fc   : > { %v4519_v11 = vmax.f32 %v4487_v6, 0.0  ;;  %v6280_v47 = vadd.f32 %v6234_v8, %v6042_v7  ;;  %v4264_v12 = vpop.f32.mrb[17].mxu0  ;;  %v6043_v13 = vpop.f32.mrb[18].mxu1 }
 0x1fd   : > { %v4517_v15 = vmax.f32 %v4485_v46, 0.0  ;;  %v6281_v16 = vadd.f32 %v4264_v12, %v2460_v9  ;;  %v6235_v17 = vpop.f32.mrb[18].mxu0  ;;  %v2463_v18 = vpop.f32.mrb[19].mxu1 }
 0x1fe   : > { %v5543_v19 = vpack.c.bf16 %v4519_v11, %v4518_v10  ;;  %v4451_v20 = vmul.f32 %v6280_v47, %v7249_v49  ;;  %v6282_v21 = vadd.f32 %v6235_v17, %v6043_v13  ;;  %v4267_v22 = vpop.f32.mrb[19].mxu0 }
 0x1ff   : > { %v5538_v23 = vpack.c.bf16 %v4517_v15, %v4516_v14  ;;  %v4449_v24 = vmul.f32 %v6281_v16, %v7249_v49  ;;  %v6283_v25 = vadd.f32 %v4267_v22, %v2463_v18 }
 0x200   : > { %5591 = vst [vmem:[%s7268_s19 + $0x38] sm:$0xff] %v5543_v19   ;;  %v4490_v26 = vadd.f32 %v7254_v52, %v4451_v20  ;;  %v4452_v27 = vmul.f32 %v6282_v21, %v7249_v49 }
 0x201   : > { %5590 = vst [vmem:[%s7268_s19 + $0x30] sm:$0xff] %v5538_v23   ;;  %v4488_v28 = vadd.f32 %v7254_v52, %v4449_v24  ;;  %v4450_v29 = vmul.f32 %v6283_v25, %v7249_v49 }
 0x202   : > { %v4491_v30 = vadd.f32 %v7254_v52, %v4452_v27  ;;  %v6046_v31 = vpop.f32.mrb[20].mxu1  ;;  %v4522_v35 = vmax.f32 %v4490_v26, 0.0 }
 0x203   : > { %v4489_v32 = vadd.f32 %v7254_v52, %v4450_v29  ;;  %v6238_v33 = vpop.f32.mrb[20].mxu0  ;;  %v2476_v34 = vpop.f32.mrb[21].mxu1  ;;  %v4520_v48 = vmax.f32 %v4488_v28, 0.0 }
 0x204   : > { %v4523_v36 = vmax.f32 %v4491_v30, 0.0  ;;  %v6284_v37 = vadd.f32 %v6238_v33, %v6046_v31  ;;  %v4280_v38 = vpop.f32.mrb[21].mxu0  ;;  %v6047_v39 = vpop.f32.mrb[22].mxu1 }
 0x205   : > { %v4521_v40 = vmax.f32 %v4489_v32, 0.0  ;;  %v6285_v50 = vadd.f32 %v4280_v38, %v2476_v34  ;;  %v6239_v41 = vpop.f32.mrb[22].mxu0  ;;  %v2479_v51 = vpop.f32.mrb[23].mxu1 }
 0x206   : > { %v5553_v42 = vpack.c.bf16 %v4523_v36, %v4522_v35  ;;  %v4455_v53 = vmul.f32 %v6284_v37, %v7249_v49  ;;  %v6286_v54 = vadd.f32 %v6239_v41, %v6047_v39  ;;  %v4283_v55 = vpop.f32.mrb[23].mxu0 }
 0x207   : > { %v5548_v43 = vpack.c.bf16 %v4521_v40, %v4520_v48  ;;  %v4453_v56 = vmul.f32 %v6285_v50, %v7249_v49  ;;  %v6287_v57 = vadd.f32 %v4283_v55, %v2479_v51 }
 0x208   : > { %5593 = vst [vmem:[%s7268_s19 + $0x48] sm:$0xff] %v5553_v42   ;;  %v4494_v58 = vadd.f32 %v7254_v52, %v4455_v53  ;;  %v4456_v59 = vmul.f32 %v6286_v54, %v7249_v49 }
 0x209   : > { %5592 = vst [vmem:[%s7268_s19 + $0x40] sm:$0xff] %v5548_v43   ;;  %v4492_v60 = vadd.f32 %v7254_v52, %v4453_v56  ;;  %v4454_v61 = vmul.f32 %v6287_v57, %v7249_v49 }
 0x20a   : > { %v4495_v62 = vadd.f32 %v7254_v52, %v4456_v59  ;;  %v6050_v63 = vpop.f32.mrb[24].mxu1  ;;  %v4526_v3 = vmax.f32 %v4494_v58, 0.0 }
 0x20b   : > { %v4493_v0 = vadd.f32 %v7254_v52, %v4454_v61  ;;  %v6242_v1 = vpop.f32.mrb[24].mxu0  ;;  %v2492_v2 = vpop.f32.mrb[25].mxu1  ;;  %v4524_v6 = vmax.f32 %v4492_v60, 0.0 }
 0x20c   : > { %v4527_v44 = vmax.f32 %v4495_v62, 0.0  ;;  %v6288_v4 = vadd.f32 %v6242_v1, %v6050_v63  ;;  %v4296_v45 = vpop.f32.mrb[25].mxu0  ;;  %v6051_v5 = vpop.f32.mrb[26].mxu1 }
 0x20d   : > { %v4525_v7 = vmax.f32 %v4493_v0, 0.0  ;;  %v6289_v46 = vadd.f32 %v4296_v45, %v2492_v2  ;;  %v6243_v8 = vpop.f32.mrb[26].mxu0  ;;  %v2495_v9 = vpop.f32.mrb[27].mxu1 }
 0x20e   : > { %v5563_v10 = vpack.c.bf16 %v4527_v44, %v4526_v3  ;;  %v4459_v11 = vmul.f32 %v6288_v4, %v7249_v49  ;;  %v6290_v47 = vadd.f32 %v6243_v8, %v6051_v5  ;;  %v4299_v12 = vpop.f32.mrb[27].mxu0 }
 0x20f   : > { %v5558_v13 = vpack.c.bf16 %v4525_v7, %v4524_v6  ;;  %v4457_v14 = vmul.f32 %v6289_v46, %v7249_v49  ;;  %v6291_v15 = vadd.f32 %v4299_v12, %v2495_v9 }
 0x210   : > { %5595 = vst [vmem:[%s7268_s19 + $0x58] sm:$0xff] %v5563_v10   ;;  %v4498_v16 = vadd.f32 %v7254_v52, %v4459_v11  ;;  %v4460_v17 = vmul.f32 %v6290_v47, %v7249_v49 }
 0x211   : > { %5594 = vst [vmem:[%s7268_s19 + $0x50] sm:$0xff] %v5558_v13   ;;  %v4496_v18 = vadd.f32 %v7254_v52, %v4457_v14  ;;  %v4458_v19 = vmul.f32 %v6291_v15, %v7249_v49 }
 0x212   : > { %v4499_v20 = vadd.f32 %v7254_v52, %v4460_v17  ;;  %v6054_v21 = vpop.f32.mrb[28].mxu1  ;;  %v4530_v25 = vmax.f32 %v4498_v16, 0.0 }
 0x213   : > { %v4497_v22 = vadd.f32 %v7254_v52, %v4458_v19  ;;  %v6246_v23 = vpop.f32.mrb[28].mxu0  ;;  %v2508_v24 = vpop.f32.mrb[29].mxu1  ;;  %v4528_v30 = vmax.f32 %v4496_v18, 0.0 }
 0x214   : > { %v4531_v26 = vmax.f32 %v4499_v20, 0.0  ;;  %v6292_v27 = vadd.f32 %v6246_v23, %v6054_v21  ;;  %v4312_v28 = vpop.f32.mrb[29].mxu0  ;;  %v6055_v29 = vpop.f32.mrb[30].mxu1 }
 0x215   : > { %v4529_v31 = vmax.f32 %v4497_v22, 0.0  ;;  %v6293_v32 = vadd.f32 %v4312_v28, %v2508_v24  ;;  %v6247_v33 = vpop.f32.mrb[30].mxu0  ;;  %v2511_v34 = vpop.f32.mrb[31].mxu1 }
 0x216   : > { %v5573_v35 = vpack.c.bf16 %v4531_v26, %v4530_v25  ;;  %v4463_v36 = vmul.f32 %v6292_v27, %v7249_v49  ;;  %v6294_v37 = vadd.f32 %v6247_v33, %v6055_v29  ;;  %v4315_v38 = vpop.f32.mrb[31].mxu0 }
 0x217   : > { %v5568_v39 = vpack.c.bf16 %v4529_v31, %v4528_v30  ;;  %v4461_v48 = vmul.f32 %v6293_v32, %v7249_v49  ;;  %v6295_v40 = vadd.f32 %v4315_v38, %v2511_v34 }
 0x218   : > { %5597 = vst [vmem:[%s7268_s19 + $0x68] sm:$0xff] %v5573_v35   ;;  %v4502_v50 = vadd.f32 %v7254_v52, %v4463_v36  ;;  %v4464_v41 = vmul.f32 %v6294_v37, %v7249_v49 }
 0x219   : > { %5596 = vst [vmem:[%s7268_s19 + $0x60] sm:$0xff] %v5568_v39   ;;  %v4500_v51 = vadd.f32 %v7254_v52, %v4461_v48  ;;  %v4462_v42 = vmul.f32 %v6295_v40, %v7249_v49 }
 0x21a   : > { %v4503_v53 = vadd.f32 %v7254_v52, %v4464_v41  ;;  %v4534_v55 = vmax.f32 %v4502_v50, 0.0 }
 0x21b   : > { %v4501_v54 = vadd.f32 %v7254_v52, %v4462_v42  ;;  %v4532_v56 = vmax.f32 %v4500_v51, 0.0 }
 0x21c   : > { %v4535_v43 = vmax.f32 %v4503_v53, 0.0 }
 0x21d   : > { %v4533_v57 = vmax.f32 %v4501_v54, 0.0 }
 0x21e   : > { %v5583_v58 = vpack.c.bf16 %v4535_v43, %v4534_v55 }
 0x21f   : > { %v5578_v59 = vpack.c.bf16 %v4533_v57, %v4532_v56 }
 0x220   : > { %5599 = vst [vmem:[%s7268_s19 + $0x78] sm:$0xff] %v5583_v58  }
 0x221   : > { %5598 = vst [vmem:[%s7268_s19 + $0x70] sm:$0xff] %v5578_v59  }
 0x222 PF: > { %s14_s17 = sadd.s32 1, %s6791_s17   ;;  %s7361_s15 = smov %s6787_s16 }
 0x223   : > { %p11_p5 = scmp.ge.s32.totalorder %s14_s17, 4   ;;  %s7362_s16 = smov %s7364_s18 }
 0x225   :  { %13 = sbr.rel (!%p11_p5) target bundleno = 2 (0x2), region = 99 }

// kernel: decoder_resnet50_forward.3
= control target key start
LH: loop header
LB: loop body
LE: loop exit
PB: predicated region body
PF: predicated region fallthrough
CT: control target
= control target key end

     0   :  { %s6531_s15 = smov 0   ;;  %s6533_s16 = smov 0   ;;  %s7088_s0 = inlined_call_operand.vmem [shape: bf16[2,54,16,128], index: 0, kind: input, shape index: {}]   ;;  %s7089_s1 = inlined_call_operand.vmem [shape: bf16[9,128,128], index: 1, kind: input, shape index: {}]   ;;  %s7090_s2 = inlined_call_operand.vmem [shape: f32[1,128], index: 2, kind: input, shape index: {}]   ;;  %s7091_s3 = inlined_call_operand.vmem [shape: f32[1,128], index: 3, kind: input, shape index: {}]   ;;  %s7092_s4 = inlined_call_operand.vmem [shape: f32[2,16,16,128], index: 4, kind: output, shape index: {}]  }
   0x1   :  { %s6535_s17 = smov 0  }
   0x2 LB: > { %s33_s18 = sadd.s32 1, %s6500_s16  ;;  %p4704_p0 = scmp.ge.s32.totalorder %s6504_s17, 1  ;;  %s6504_s17 = sphi %s6535_s17, %s14_s17   ;;  %s6500_s16 = sphi %s6533_s16, %s7094_s16   ;;  %s6496_s15 = sphi %s6531_s15, %s7093_s15  }
   0x3   : > { %p35_p1 = scmp.ge.s32.totalorder %s33_s18, 2  ;;  %p220_p2 = scmp.lt.s32.totalorder %s6504_s17, 3 }
   0x5   : > { %s7096_s18 = smov (%p35_p1, %s33_s18), 0  ;;  %p221_p3 = pnand %p4704_p0, %p220_p2 }
   0x6   : > { %v6258_v0 = vld [vmem:[%s7089_s1] sm:$0xff] (!%p221_p3)   ;;  %p266_p4 = scmp.lt.s32.totalorder (!%p221_p3), %s6496_s15, 1  ;;  %v6260_v2 = vld [vmem:[%s7089_s1 + $0x8] sm:$0xff] (!%p221_p3)   ;;  %v6262_v4 = vld [vmem:[%s7089_s1 + $0x10] sm:$0xff] (!%p221_p3)  }
   0x7   : > { %224 = sbr.rel (%p221_p3) target bundleno = 544 (0x220), region = 36  ;;  %v6259_v1 = vld [vmem:[%s7089_s1 + $0x100] sm:$0xff] (!%p221_p3)   ;;  %5529 = vmatprep.subr.bf16.mxu1 (!%p221_p3), %v6258_v0  ;;  %v6261_v3 = vld [vmem:[%s7089_s1 + $0x108] sm:$0xff] (!%p221_p3)   ;;  %v6263_v5 = vld [vmem:[%s7089_s1 + $0x110] sm:$0xff] (!%p221_p3)  }
   0x8   : > { %5721 = vmatprep.subr.bf16.mxu0 (!%p221_p3), %v6259_v1  ;;  %5530 = vmatpush3.bf16.msra.mxu1 (!%p221_p3), %v6258_v0  ;;  %v6264_v6 = vld [vmem:[%s7089_s1 + $0x18] sm:$0xff] (!%p221_p3)   ;;  %v6266_v8 = vld [vmem:[%s7089_s1 + $0x20] sm:$0xff] (!%p221_p3)   ;;  %v6268_v10 = vld [vmem:[%s7089_s1 + $0x28] sm:$0xff] (!%p221_p3)  }
   0x9   : > { %5722 = vmatpush3.bf16.msra.mxu0 (!%p221_p3), %v6259_v1  ;;  %5531 = vmatprep.subr.bf16.mxu1 (!%p221_p3), %v6260_v2  ;;  %v6265_v7 = vld [vmem:[%s7089_s1 + $0x118] sm:$0xff] (!%p221_p3)   ;;  %v6267_v9 = vld [vmem:[%s7089_s1 + $0x120] sm:$0xff] (!%p221_p3)   ;;  %v6269_v11 = vld [vmem:[%s7089_s1 + $0x128] sm:$0xff] (!%p221_p3)  }
   0xa   : > { %5723 = vmatprep.subr.bf16.mxu0 (!%p221_p3), %v6261_v3  ;;  %v6270_v14 = vld [vmem:[%s7089_s1 + $0x30] sm:$0xff] (!%p221_p3)   ;;  %v6272_v16 = vld [vmem:[%s7089_s1 + $0x38] sm:$0xff] (!%p221_p3)   ;;  %v6277_v19 = vld [vmem:[%s7089_s1 + $0xc0] sm:$0xff] (!%p221_p3)  }
   0xb   : > { %v6271_v15 = vld [vmem:[%s7089_s1 + $0x130] sm:$0xff] (!%p221_p3)   ;;  %v6273_v17 = vld [vmem:[%s7089_s1 + $0x138] sm:$0xff] (!%p221_p3)   ;;  %v6279_v20 = vld [vmem:[%s7089_s1 + $0x1c0] sm:$0xff] (!%p221_p3)  }
   0xc   : > { %5532 = vmatpush3.bf16.msra.mxu1 (!%p221_p3), %v6260_v2  ;;  %v6280_v22 = vld [vmem:[%s7089_s1 + $0x1c8] sm:$0xff] (!%p221_p3)   ;;  %v6291_v27 = vld [vmem:[%s7089_s1 + $0xd0] sm:$0xff] (!%p221_p3)   ;;  %v6287_v32 = vld [vmem:[%s7089_s1 + $0x1d8] sm:$0xff] (!%p221_p3)  }
   0xd   : > { %5724 = vmatpush3.bf16.msra.mxu0 (!%p221_p3), %v6261_v3  ;;  %5533 = vmatprep.subr.bf16.mxu1 (!%p221_p3), %v6262_v4  ;;  %v6284_v25 = vld [vmem:[%s7089_s1 + $0xc8] sm:$0xff] (!%p221_p3)   ;;  %v6286_v28 = vld [vmem:[%s7089_s1 + $0x1d0] sm:$0xff] (!%p221_p3)   ;;  %v6298_v33 = vld [vmem:[%s7089_s1 + $0xd8] sm:$0xff] (!%p221_p3)  }
   0xe   : > { %s7098_s15 = smov (!%p266_p4, %s6496_s15), 1  ;;  %5725 = vmatprep.subr.bf16.mxu0 %v6263_v5  ;;  %v6293_v36 = vld [vmem:[%s7089_s1 + $0x1e0] sm:$0xff]   ;;  %v6294_v40 = vld [vmem:[%s7089_s1 + $0x1e8] sm:$0xff]   ;;  %v6300_v42 = vld [vmem:[%s7089_s1 + $0x1f0] sm:$0xff]  }
   0xf   : > { %s6233_s9 = smul.u32 432, %s7098_s15  ;;  %v6305_v38 = vld [vmem:[%s7089_s1 + $0xe0] sm:$0xff]   ;;  %v6311_v43 = vld [vmem:[%s7089_s1 + $0xe8] sm:$0xff]   ;;  %v6301_v47 = vld [vmem:[%s7089_s1 + $0x1f8] sm:$0xff]   ;;  %s5312_s12 = sshll.u32 %s7098_s15, 8 }
  0x10   : > { %5534 = vmatpush3.bf16.msra.mxu1 %v6262_v4  ;;  %v6317_v48 = vld [vmem:[%s7089_s1 + $0xf0] sm:$0xff]   ;;  %v6307_v51 = vld [vmem:[%s7089_s1 + $0x80] sm:$0xff]   ;;  %v6313_v54 = vld [vmem:[%s7089_s1 + $0x88] sm:$0xff]   ;;  %s6979_s19 = scalar_lea.vmem %s7092_s4, %s5312_s12 }
  0x11   : > { %5726 = vmatpush3.bf16.msra.mxu0 %v6263_v5  ;;  %5535 = vmatprep.subr.bf16.mxu1 %v6264_v6  ;;  %s6585_s20 = scalar_lea.vmem %s7088_s0, %s6233_s9  ;;  %v6323_v55 = vld [vmem:[%s7089_s1 + $0xf8] sm:$0xff]   ;;  %v6319_v58 = vld [vmem:[%s7089_s1 + $0x90] sm:$0xff]   ;;  %v6329_v60 = vld [vmem:[%s7089_s1 + $0x180] sm:$0xff]  }
  0x12   : > { %5727 = vmatprep.subr.bf16.mxu0 %v6265_v7  ;;  %v6274_v12 = vld [vmem:[%s6585_s20] sm:$0xff]   ;;  %v6275_v13 = vld [vmem:[%s6585_s20 + $0x98] sm:$0xff]   ;;  %v6276_v18 = vld [vmem:[%s6585_s20 + $0x8] sm:$0xff]  }
  0x13   : > { %5545 = vmatprep.mubr.bf16.mxu1 %v6274_v12  ;;  %5737 = vmatprep.mubr.bf16.mxu0 %v6275_v13  ;;  %v6278_v21 = vld [vmem:[%s6585_s20 + $0xa0] sm:$0xff]   ;;  %v6281_v23 = vld [vmem:[%s6585_s20 + $0x10] sm:$0xff]   ;;  %v6282_v24 = vld [vmem:[%s6585_s20 + $0xa8] sm:$0xff]  }
  0x14   : > { %5536 = vmatpush3.bf16.msra.mxu1 %v6264_v6  ;;  %v6283_v26 = vld [vmem:[%s6585_s20 + $0x18] sm:$0xff]   ;;  %v6285_v29 = vld [vmem:[%s6585_s20 + $0xb0] sm:$0xff]   ;;  %v6288_v30 = vld [vmem:[%s6585_s20 + $0x20] sm:$0xff]  }
  0x15   : > { %5728 = vmatpush3.bf16.msra.mxu0 %v6265_v7  ;;  %5537 = vmatprep.subr.bf16.mxu1 %v6266_v8  ;;  %v6289_v31 = vld [vmem:[%s6585_s20 + $0xb8] sm:$0xff]   ;;  %v6290_v34 = vld [vmem:[%s6585_s20 + $0x28] sm:$0xff]   ;;  %v6292_v35 = vld [vmem:[%s6585_s20 + $0xc0] sm:$0xff]  }
  0x16   : > { %5729 = vmatprep.subr.bf16.mxu0 %v6267_v9  ;;  %v6295_v37 = vld [vmem:[%s6585_s20 + $0x30] sm:$0xff]   ;;  %v6296_v39 = vld [vmem:[%s6585_s20 + $0xc8] sm:$0xff]   ;;  %v6297_v41 = vld [vmem:[%s6585_s20 + $0x38] sm:$0xff]  }
  0x17   : > { %v6299_v44 = vld [vmem:[%s6585_s20 + $0xd0] sm:$0xff]   ;;  %v6302_v45 = vld [vmem:[%s6585_s20 + $0x40] sm:$0xff]   ;;  %v6304_v49 = vld [vmem:[%s6585_s20 + $0x48] sm:$0xff]  }
  0x18   : > { %5538 = vmatpush3.bf16.msra.mxu1 %v6266_v8  ;;  %v6303_v46 = vld [vmem:[%s6585_s20 + $0xa0] sm:$0xff]   ;;  %v6306_v50 = vld [vmem:[%s6585_s20 + $0xa8] sm:$0xff]   ;;  %v6308_v52 = vld [vmem:[%s6585_s20 + $0x50] sm:$0xff]  }
  0x19   : > { %5730 = vmatpush3.bf16.msra.mxu0 %v6267_v9  ;;  %5539 = vmatprep.subr.bf16.mxu1 %v6268_v10  ;;  %v6309_v53 = vld [vmem:[%s6585_s20 + $0xb0] sm:$0xff]   ;;  %v6310_v56 = vld [vmem:[%s6585_s20 + $0x58] sm:$0xff]   ;;  %v6314_v59 = vld [vmem:[%s6585_s20 + $0x60] sm:$0xff]  }
  0x1a   : > { %5731 = vmatprep.subr.bf16.mxu0 %v6269_v11  ;;  %v6312_v57 = vld [vmem:[%s6585_s20 + $0xb8] sm:$0xff]   ;;  %v6315_v61 = vld [vmem:[%s6585_s20 + $0xc0] sm:$0xff]   ;;  %v6316_v63 = vld [vmem:[%s6585_s20 + $0x68] sm:$0xff]  }
  0x1b   : > { %v6325_v62 = vld [vmem:[%s7089_s1 + $0x98] sm:$0xff]   ;;  %v6331_v0 = vld [vmem:[%s7089_s1 + $0xa0] sm:$0xff]   ;;  %v6318_v1 = vld [vmem:[%s6585_s20 + $0xc8] sm:$0xff]  }
  0x1c   : > { %5540 = vmatpush3.bf16.msra.mxu1 %v6268_v10  ;;  %v6320_v2 = vld [vmem:[%s6585_s20 + $0x70] sm:$0xff]   ;;  %v6337_v4 = vld [vmem:[%s7089_s1 + $0xa8] sm:$0xff]   ;;  %v6322_v5 = vld [vmem:[%s6585_s20 + $0x78] sm:$0xff]  }
  0x1d   : > { %5732 = vmatpush3.bf16.msra.mxu0 %v6269_v11  ;;  %5541 = vmatprep.subr.bf16.mxu1 %v6270_v14  ;;  %v6321_v3 = vld [vmem:[%s6585_s20 + $0xd0] sm:$0xff]   ;;  %v6324_v7 = vld [vmem:[%s6585_s20 + $0xd8] sm:$0xff]   ;;  %v6326_v8 = vld [vmem:[%s6585_s20 + $0x8] sm:$0xff]  }
  0x1e   : > { %5733 = vmatprep.subr.bf16.mxu0 %v6271_v15  ;;  %v6343_v6 = vld [vmem:[%s7089_s1 + $0xb0] sm:$0xff]   ;;  %v6327_v9 = vld [vmem:[%s6585_s20 + $0xe0] sm:$0xff]   ;;  %v6349_v10 = vld [vmem:[%s7089_s1 + $0xb8] sm:$0xff]  }
  0x1f   : > { %v6328_v11 = vld [vmem:[%s6585_s20 + $0x10] sm:$0xff]   ;;  %v6330_v12 = vld [vmem:[%s6585_s20 + $0xe8] sm:$0xff]   ;;  %v6332_v13 = vld [vmem:[%s6585_s20 + $0x18] sm:$0xff]  }
  0x20   : > { %5542 = vmatpush3.bf16.msra.mxu1 %v6270_v14  ;;  %v6333_v14 = vld [vmem:[%s6585_s20 + $0xf0] sm:$0xff]  }
  0x21   : > { %5734 = vmatpush3.bf16.msra.mxu0 %v6271_v15  ;;  %5543 = vmatprep.subr.bf16.mxu1 %v6272_v16  ;;  %v6335_v15 = vld [vmem:[%s7089_s1 + $0x188] sm:$0xff]  }
  0x22   : > { %5735 = vmatprep.subr.bf16.mxu0 %v6273_v17 }
  0x24   : > { %5544 = vmatpush3.bf16.msra.mxu1 %v6272_v16  ;;  %v6355_v16 = vld [vmem:[%s7089_s1 + $0x140] sm:$0xff]  }
  0x25   : > { %5736 = vmatpush3.bf16.msra.mxu0 %v6273_v17  ;;  %5577 = vmatprep.subr.bf16.mxu1 %v6277_v19  ;;  %v6341_v17 = vld [vmem:[%s7089_s1 + $0x190] sm:$0xff]  }
  0x26   : > { %5769 = vmatprep.subr.bf16.mxu0 %v6279_v20 }
  0x27   : > { %5546 = vmatmul.mubr.bf16.vlgmr.msra.gmra.mrb[0].mxu1 %v6276_v18  ;;  %v6334_v18 = vld [vmem:[%s6585_s20 + $0x20] sm:$0xff]  }
  0x28   : > { %5738 = vmatmul.mubr.bf16.vlgmr.msra.gmra.mrb[0].mxu0 %v6278_v21  ;;  %5578 = vmatpush3.bf16.msra.mxu1 %v6277_v19  ;;  %v6336_v19 = vld [vmem:[%s6585_s20 + $0xf8] sm:$0xff]   ;;  %v6339_v21 = vld [vmem:[%s6585_s20 + $0x100] sm:$0xff]  }
  0x29   : > { %5770 = vmatpush3.bf16.msra.mxu0 %v6279_v20  ;;  %5549 = vmatprep.mubr.bf16.mxu1 %v6281_v23  ;;  %v6338_v20 = vld [vmem:[%s6585_s20 + $0x28] sm:$0xff]   ;;  %v6340_v23 = vld [vmem:[%s6585_s20 + $0x30] sm:$0xff]  }
  0x2a   : > { %5771 = vmatprep.subr.bf16.mxu0 %v6280_v22  ;;  %5741 = vmatprep.mubr.bf16.mxu0 %v6282_v24  ;;  %v6353_v24 = vld [vmem:[%s7089_s1 + $0x1a0] sm:$0xff]  }
  0x2b   : > { %5579 = vmatprep.subr.bf16.mxu1 %v6284_v25 }
  0x2c   : > { %5580 = vmatpush3.bf16.msra.mxu1 %v6284_v25  ;;  %v6342_v25 = vld [vmem:[%s6585_s20 + $0x108] sm:$0xff]  }
  0x2d   : > { %5772 = vmatpush3.bf16.msra.mxu0 %v6280_v22  ;;  %5581 = vmatprep.subr.bf16.mxu1 %v6291_v27  ;;  %v6347_v22 = vld [vmem:[%s7089_s1 + $0x198] sm:$0xff]  }
  0x2e   : > { %5773 = vmatprep.subr.bf16.mxu0 %v6286_v28 }
  0x2f   : > { %5550 = vmatmul.mubr.bf16.gmra.mrb[4].mxu1 %v6283_v26  ;;  %v6344_v26 = vld [vmem:[%s6585_s20 + $0x38] sm:$0xff]  }
  0x30   : > { %5742 = vmatmul.mubr.bf16.gmra.mrb[4].mxu0 %v6285_v29  ;;  %5553 = vmatprep.mubr.bf16.mxu1 %v6288_v30  ;;  %v6346_v29 = vld [vmem:[%s6585_s20 + $0x40] sm:$0xff]   ;;  %v6365_v30 = vld [vmem:[%s7089_s1 + $0x1b0] sm:$0xff]  }
  0x31   : > { %5774 = vmatpush3.bf16.msra.mxu0 %v6286_v28  ;;  %5745 = vmatprep.mubr.bf16.mxu0 %v6289_v31  ;;  %v6359_v28 = vld [vmem:[%s7089_s1 + $0x1a8] sm:$0xff]   ;;  %v6348_v31 = vld [vmem:[%s6585_s20 + $0x118] sm:$0xff]  }
  0x32   : > { %5775 = vmatprep.subr.bf16.mxu0 %v6287_v32  ;;  %5582 = vmatpush3.bf16.msra.mxu1 %v6291_v27  ;;  %v6345_v27 = vld [vmem:[%s6585_s20 + $0x110] sm:$0xff]  }
  0x33   : > { %5583 = vmatprep.subr.bf16.mxu1 %v6298_v33 }
  0x35   : > { %5776 = vmatpush3.bf16.msra.mxu0 %v6287_v32  ;;  %v6350_v32 = vld [vmem:[%s6585_s20 + $0x48] sm:$0xff]  }
  0x36   : > { %5777 = vmatprep.subr.bf16.mxu0 %v6293_v36  ;;  %5584 = vmatpush3.bf16.msra.mxu1 %v6298_v33  ;;  %v6351_v33 = vld [vmem:[%s6585_s20 + $0x120] sm:$0xff]  }
  0x37   : > { %5554 = vmatmul.mubr.bf16.gmra.mrb[8].mxu1 %v6290_v34  ;;  %5585 = vmatprep.subr.bf16.mxu1 %v6305_v38  ;;  %v6371_v34 = vld [vmem:[%s7089_s1 + $0x1b8] sm:$0xff]  }
  0x38   : > { %5746 = vmatmul.mubr.bf16.gmra.mrb[8].mxu0 %v6292_v35  ;;  %5557 = vmatprep.mubr.bf16.mxu1 %v6295_v37  ;;  %v6352_v35 = vld [vmem:[%s6585_s20 + $0x50] sm:$0xff]   ;;  %v6354_v37 = vld [vmem:[%s6585_s20 + $0x128] sm:$0xff]  }
  0x39   : > { %5778 = vmatpush3.bf16.msra.mxu0 %v6293_v36  ;;  %5749 = vmatprep.mubr.bf16.mxu0 %v6296_v39  ;;  %v6758_v36 = vld [vmem:[%s7089_s1 + $0x40] sm:$0xff]   ;;  %v6357_v39 = vld [vmem:[%s6585_s20 + $0x130] sm:$0xff]  }
  0x3a   : > { %5779 = vmatprep.subr.bf16.mxu0 %v6294_v40  ;;  %5586 = vmatpush3.bf16.msra.mxu1 %v6305_v38  ;;  %v6356_v38 = vld [vmem:[%s6585_s20 + $0x58] sm:$0xff]  }
  0x3b   : > { %5587 = vmatprep.subr.bf16.mxu1 %v6311_v43 }
  0x3d   : > { %5780 = vmatpush3.bf16.msra.mxu0 %v6294_v40  ;;  %v6361_v40 = vld [vmem:[%s7089_s1 + $0x148] sm:$0xff]  }
  0x3e   : > { %5781 = vmatprep.subr.bf16.mxu0 %v6300_v42  ;;  %5588 = vmatpush3.bf16.msra.mxu1 %v6311_v43  ;;  %v6360_v43 = vld [vmem:[%s6585_s20 + $0x138] sm:$0xff]  }
  0x3f   : > { %5558 = vmatmul.mubr.bf16.gmra.mrb[12].mxu1 %v6297_v41  ;;  %5589 = vmatprep.subr.bf16.mxu1 %v6317_v48  ;;  %v6358_v41 = vld [vmem:[%s6585_s20 + $0x60] sm:$0xff]  }
  0x40   : > { %5750 = vmatmul.mubr.bf16.gmra.mrb[12].mxu0 %v6299_v44  ;;  %5561 = vmatprep.mubr.bf16.mxu1 %v6302_v45  ;;  %v6362_v44 = vld [vmem:[%s6585_s20 + $0x68] sm:$0xff]   ;;  %v6363_v45 = vld [vmem:[%s6585_s20 + $0x140] sm:$0xff]  }
  0x41   : > { %5782 = vmatpush3.bf16.msra.mxu0 %v6300_v42  ;;  %5785 = vmatprep.mubr.bf16.mxu0 %v6303_v46  ;;  %v6367_v42 = vld [vmem:[%s7089_s1 + $0x150] sm:$0xff]   ;;  %v6373_v46 = vld [vmem:[%s7089_s1 + $0x158] sm:$0xff]  }
  0x42   : > { %5783 = vmatprep.subr.bf16.mxu0 %v6301_v47  ;;  %5590 = vmatpush3.bf16.msra.mxu1 %v6317_v48  ;;  %v6379_v48 = vld [vmem:[%s7089_s1 + $0x160] sm:$0xff]  }
  0x43   : > { %5591 = vmatprep.subr.bf16.mxu1 %v6323_v55 }
  0x45   : > { %5784 = vmatpush3.bf16.msra.mxu0 %v6301_v47  ;;  %v6364_v47 = vld [vmem:[%s6585_s20 + $0x70] sm:$0xff]  }
  0x46   : > { %5817 = vmatprep.subr.bf16.mxu0 %v6307_v51  ;;  %5592 = vmatpush3.bf16.msra.mxu1 %v6323_v55  ;;  %v6372_v55 = vld [vmem:[%s6585_s20 + $0x158] sm:$0xff]  }
  0x47   : > { %5562 = vmatmul.mubr.bf16.gmra.mrb[16].mxu1 %v6304_v49  ;;  %5625 = vmatprep.subr.bf16.mxu1 %v6329_v60  ;;  %v6366_v49 = vld [vmem:[%s6585_s20 + $0x148] sm:$0xff]  }
  0x48   : > { %5786 = vmatmul.mubr.bf16.vlgmr.msra.gmra.mrb[0].mxu0 %v6306_v50  ;;  %5565 = vmatprep.mubr.bf16.mxu1 %v6308_v52  ;;  %v6368_v50 = vld [vmem:[%s6585_s20 + $0x78] sm:$0xff]   ;;  %v6385_v52 = vld [vmem:[%s7089_s1 + $0x168] sm:$0xff]  }
  0x49   : > { %5818 = vmatpush3.bf16.msra.mxu0 %v6307_v51  ;;  %5789 = vmatprep.mubr.bf16.mxu0 %v6309_v53  ;;  %v6369_v51 = vld [vmem:[%s6585_s20 + $0x150] sm:$0xff]   ;;  %v6370_v53 = vld [vmem:[%s6585_s20 + $0x80] sm:$0xff]  }
  0x4a   : > { %5819 = vmatprep.subr.bf16.mxu0 %v6313_v54 }
  0x4d   : > { %5820 = vmatpush3.bf16.msra.mxu0 %v6313_v54  ;;  %v6391_v54 = vld [vmem:[%s7089_s1 + $0x170] sm:$0xff]  }
  0x4e   : > { %5821 = vmatprep.subr.bf16.mxu0 %v6319_v58 }
  0x4f   : > { %5566 = vmatmul.mubr.bf16.gmra.mrb[20].mxu1 %v6310_v56  ;;  %v6374_v56 = vld [vmem:[%s6585_s20 + $0x10] sm:$0xff]  }
  0x50   : > { %5790 = vmatmul.mubr.bf16.gmra.mrb[4].mxu0 %v6312_v57  ;;  %5569 = vmatprep.mubr.bf16.mxu1 %v6314_v59  ;;  %v6375_v57 = vld [vmem:[%s6585_s20 + $0x160] sm:$0xff]   ;;  %v6376_v59 = vld [vmem:[%s6585_s20 + $0x18] sm:$0xff]  }
  0x51   : > { %5793 = vmatprep.mubr.bf16.mxu0 %v6315_v61  ;;  %5822 = vmatpush3.bf16.msra.mxu0 %v6319_v58  ;;  %v6397_v58 = vld [vmem:[%s7089_s1 + $0x178] sm:$0xff]   ;;  %v6378_v61 = vld [vmem:[%s6585_s20 + $0x168] sm:$0xff]  }
  0x52   : > { %5823 = vmatprep.subr.bf16.mxu0 %v6325_v62 }
  0x55   : > { %5824 = vmatpush3.bf16.msra.mxu0 %v6325_v62  ;;  %v6380_v62 = vld [vmem:[%s6585_s20 + $0x20] sm:$0xff]  }
  0x56   : > { %5825 = vmatprep.subr.bf16.mxu0 %v6331_v0 }
  0x57   : > { %5570 = vmatmul.mubr.bf16.gmra.mrb[24].mxu1 %v6316_v63  ;;  %v6381_v63 = vld [vmem:[%s6585_s20 + $0x170] sm:$0xff]  }
  0x58   : > { %5794 = vmatmul.mubr.bf16.gmra.mrb[8].mxu0 %v6318_v1  ;;  %5573 = vmatprep.mubr.bf16.mxu1 %v6320_v2  ;;  %v6389_v1 = vld [vmem:[%s7089_s1 + $0x50] sm:$0xff]   ;;  %v6382_v2 = vld [vmem:[%s6585_s20 + $0x28] sm:$0xff]  }
  0x59   : > { %5797 = vmatprep.mubr.bf16.mxu0 %v6321_v3  ;;  %5826 = vmatpush3.bf16.msra.mxu0 %v6331_v0  ;;  %v6383_v0 = vld [vmem:[%s7089_s1 + $0x48] sm:$0xff]   ;;  %v6384_v3 = vld [vmem:[%s6585_s20 + $0x178] sm:$0xff]  }
  0x5a   : > { %5827 = vmatprep.subr.bf16.mxu0 %v6337_v4 }
  0x5d   : > { %5828 = vmatpush3.bf16.msra.mxu0 %v6337_v4  ;;  %v6386_v4 = vld [vmem:[%s6585_s20 + $0x30] sm:$0xff]  }
  0x5e   : > { %5829 = vmatprep.subr.bf16.mxu0 %v6343_v6 }
  0x5f   : > { %5574 = vmatmul.mubr.bf16.gmra.mrb[28].mxu1 %v6322_v5  ;;  %v6387_v5 = vld [vmem:[%s6585_s20 + $0x180] sm:$0xff]  }
  0x60   : > { %5798 = vmatmul.mubr.bf16.gmra.mrb[12].mxu0 %v6324_v7  ;;  %5593 = vmatprep.mubr.bf16.mxu1 %v6326_v8  ;;  %v6388_v7 = vld [vmem:[%s6585_s20 + $0x38] sm:$0xff]   ;;  %v6401_v8 = vld [vmem:[%s7089_s1 + $0x60] sm:$0xff]  }
  0x61   : > { %5801 = vmatprep.mubr.bf16.mxu0 %v6327_v9  ;;  %5830 = vmatpush3.bf16.msra.mxu0 %v6343_v6  ;;  %v6395_v6 = vld [vmem:[%s7089_s1 + $0x58] sm:$0xff]   ;;  %v6390_v9 = vld [vmem:[%s6585_s20 + $0x188] sm:$0xff]  }
  0x62   : > { %5831 = vmatprep.subr.bf16.mxu0 %v6349_v10 }
  0x65   : > { %5832 = vmatpush3.bf16.msra.mxu0 %v6349_v10  ;;  %v6392_v10 = vld [vmem:[%s6585_s20 + $0x40] sm:$0xff]  }
  0x66   : > { %5865 = vmatprep.subr.bf16.mxu0 %v6355_v16 }
  0x67   : > { %5594 = vmatmul.mubr.bf16.vlgmr.msra.gmra.mrb[0].mxu1 %v6328_v11  ;;  %v6393_v11 = vld [vmem:[%s6585_s20 + $0x190] sm:$0xff]  }
  0x68   : > { %5802 = vmatmul.mubr.bf16.gmra.mrb[16].mxu0 %v6330_v12  ;;  %5626 = vmatpush3.bf16.msra.mxu1 %v6329_v60  ;;  %v6801_v60 = vld [vmem:[%s7089_s1 + $0x200] sm:$0xff]   ;;  %v6407_v12 = vld [vmem:[%s7089_s1 + $0x68] sm:$0xff]  }
  0x69   : > { %5597 = vmatprep.mubr.bf16.mxu1 %v6332_v13  ;;  %5805 = vmatprep.mubr.bf16.mxu0 %v6333_v14  ;;  %v6394_v13 = vld [vmem:[%s6585_s20 + $0x48] sm:$0xff]   ;;  %v6413_v14 = vld [vmem:[%s7089_s1 + $0x70] sm:$0xff]  }
  0x6a   : > { %5627 = vmatprep.subr.bf16.mxu1 %v6335_v15 }
  0x6c   : > { %5628 = vmatpush3.bf16.msra.mxu1 %v6335_v15  ;;  %v6396_v15 = vld [vmem:[%s6585_s20 + $0x198] sm:$0xff]  }
  0x6d   : > { %5629 = vmatprep.subr.bf16.mxu1 %v6341_v17 }
  0x6f   : > { %5598 = vmatmul.mubr.bf16.gmra.mrb[4].mxu1 %v6334_v18  ;;  %v6419_v18 = vld [vmem:[%s7089_s1 + $0x78] sm:$0xff]  }
  0x70   : > { %5806 = vmatmul.mubr.bf16.gmra.mrb[20].mxu0 %v6336_v19  ;;  %5601 = vmatprep.mubr.bf16.mxu1 %v6338_v20  ;;  %v6400_v19 = vld [vmem:[%s6585_s20 + $0x58] sm:$0xff]   ;;  %v6402_v20 = vld [vmem:[%s6585_s20 + $0x130] sm:$0xff]  }
  0x71   : > { %5809 = vmatprep.mubr.bf16.mxu0 %v6339_v21  ;;  %5630 = vmatpush3.bf16.msra.mxu1 %v6341_v17  ;;  %v6399_v17 = vld [vmem:[%s6585_s20 + $0x128] sm:$0xff]   ;;  %v6404_v21 = vld [vmem:[%s6585_s20 + $0x60] sm:$0xff]  }
  0x72   : > { %5631 = vmatprep.subr.bf16.mxu1 %v6347_v22 }
  0x75   : > { %5632 = vmatpush3.bf16.msra.mxu1 %v6347_v22  ;;  %v6405_v22 = vld [vmem:[%s6585_s20 + $0x138] sm:$0xff]  }
  0x76   : > { %5633 = vmatprep.subr.bf16.mxu1 %v6353_v24 }
  0x77   : > { %5602 = vmatmul.mubr.bf16.gmra.mrb[8].mxu1 %v6340_v23  ;;  %v6409_v23 = vld [vmem:[%s7089_s1 + $0x208] sm:$0xff]  }
  0x78   : > { %5810 = vmatmul.mubr.bf16.gmra.mrb[24].mxu0 %v6342_v25  ;;  %5605 = vmatprep.mubr.bf16.mxu1 %v6344_v26  ;;  %v6406_v25 = vld [vmem:[%s6585_s20 + $0x68] sm:$0xff]   ;;  %v6415_v26 = vld [vmem:[%s7089_s1 + $0x210] sm:$0xff]  }
  0x79   : > { %5813 = vmatprep.mubr.bf16.mxu0 %v6345_v27  ;;  %5634 = vmatpush3.bf16.msra.mxu1 %v6353_v24  ;;  %v6474_v24 = vld [vmem:[%s7089_s1 + $0x100] sm:$0xff]  }
  0x7a   : > { %5635 = vmatprep.subr.bf16.mxu1 %v6359_v28  ;;  %v6408_v27 = vld [vmem:[%s6585_s20 + $0x140] sm:$0xff]  }
  0x7d   : > { %5636 = vmatpush3.bf16.msra.mxu1 %v6359_v28  ;;  %v6410_v28 = vld [vmem:[%s6585_s20 + $0x70] sm:$0xff]  }
  0x7e   : > { %5637 = vmatprep.subr.bf16.mxu1 %v6365_v30 }
  0x7f   : > { %5606 = vmatmul.mubr.bf16.gmra.mrb[12].mxu1 %v6346_v29  ;;  %v6411_v29 = vld [vmem:[%s6585_s20 + $0x148] sm:$0xff]  }
  0x80   : > { %5814 = vmatmul.mubr.bf16.gmra.mrb[28].mxu0 %v6348_v31  ;;  %5609 = vmatprep.mubr.bf16.mxu1 %v6350_v32  ;;  %v6412_v31 = vld [vmem:[%s6585_s20 + $0x78] sm:$0xff]   ;;  %v6426_v32 = vld [vmem:[%s7089_s1 + $0x220] sm:$0xff]  }
  0x81   : > { %5833 = vmatprep.mubr.bf16.mxu0 %v6351_v33  ;;  %5638 = vmatpush3.bf16.msra.mxu1 %v6365_v30  ;;  %v6421_v30 = vld [vmem:[%s7089_s1 + $0x218] sm:$0xff]   ;;  %v6414_v33 = vld [vmem:[%s6585_s20 + $0x150] sm:$0xff]  }
  0x82   : > { %5639 = vmatprep.subr.bf16.mxu1 %v6371_v34 }
  0x85   : > { %5640 = vmatpush3.bf16.msra.mxu1 %v6371_v34  ;;  %v6416_v34 = vld [vmem:[%s6585_s20 + $0x80] sm:$0xff]  }
  0x86   : > { %5673 = vmatprep.subr.bf16.mxu1 %v6758_v36 }
  0x87   : > { %5610 = vmatmul.mubr.bf16.gmra.mrb[16].mxu1 %v6352_v35  ;;  %v6417_v35 = vld [vmem:[%s6585_s20 + $0x158] sm:$0xff]  }
  0x88   : > { %5834 = vmatmul.mubr.bf16.vlgmr.msra.gmra.mrb[0].mxu0 %v6354_v37  ;;  %5613 = vmatprep.mubr.bf16.mxu1 %v6356_v38  ;;  %v6418_v37 = vld [vmem:[%s6585_s20 + $0x88] sm:$0xff]   ;;  %v6436_v38 = vld [vmem:[%s7089_s1 + $0x230] sm:$0xff]  }
  0x89   : > { %5866 = vmatpush3.bf16.msra.mxu0 %v6355_v16  ;;  %5837 = vmatprep.mubr.bf16.mxu0 %v6357_v39  ;;  %v6398_v16 = vld [vmem:[%s6585_s20 + $0x50] sm:$0xff]   ;;  %v6420_v39 = vld [vmem:[%s6585_s20 + $0x160] sm:$0xff]  }
  0x8a   : > { %5867 = vmatprep.subr.bf16.mxu0 %v6361_v40 }
  0x8d   : > { %5868 = vmatpush3.bf16.msra.mxu0 %v6361_v40  ;;  %v6422_v40 = vld [vmem:[%s6585_s20 + $0x90] sm:$0xff]  }
  0x8e   : > { %5869 = vmatprep.subr.bf16.mxu0 %v6367_v42 }
  0x8f   : > { %5614 = vmatmul.mubr.bf16.gmra.mrb[20].mxu1 %v6358_v41  ;;  %v6423_v41 = vld [vmem:[%s6585_s20 + $0x168] sm:$0xff]  }
  0x90   : > { %5838 = vmatmul.mubr.bf16.gmra.mrb[4].mxu0 %v6360_v43  ;;  %5617 = vmatprep.mubr.bf16.mxu1 %v6362_v44  ;;  %v6424_v43 = vld [vmem:[%s6585_s20 + $0x98] sm:$0xff]   ;;  %v6425_v44 = vld [vmem:[%s6585_s20 + $0x170] sm:$0xff]  }
  0x91   : > { %5841 = vmatprep.mubr.bf16.mxu0 %v6363_v45  ;;  %5870 = vmatpush3.bf16.msra.mxu0 %v6367_v42  ;;  %v6441_v42 = vld [vmem:[%s7089_s1 + $0x238] sm:$0xff]   ;;  %v6427_v45 = vld [vmem:[%s6585_s20 + $0xa0] sm:$0xff]  }
  0x92   : > { %5871 = vmatprep.subr.bf16.mxu0 %v6373_v46 }
  0x95   : > { %5872 = vmatpush3.bf16.msra.mxu0 %v6373_v46  ;;  %v6428_v46 = vld [vmem:[%s6585_s20 + $0x178] sm:$0xff]  }
  0x96   : > { %5873 = vmatprep.subr.bf16.mxu0 %v6379_v48 }
  0x97   : > { %5618 = vmatmul.mubr.bf16.gmra.mrb[24].mxu1 %v6364_v47  ;;  %v6475_v47 = vld [vmem:[%s7089_s1 + $0x108] sm:$0xff]  }
  0x98   : > { %5842 = vmatmul.mubr.bf16.gmra.mrb[8].mxu0 %v6366_v49  ;;  %5621 = vmatprep.mubr.bf16.mxu1 %v6368_v50  ;;  %v6430_v49 = vld [vmem:[%s6585_s20 + $0x180] sm:$0xff]   ;;  %v6432_v50 = vld [vmem:[%s6585_s20 + $0xb0] sm:$0xff]  }
  0x99   : > { %5845 = vmatprep.mubr.bf16.mxu0 %v6369_v51  ;;  %5874 = vmatpush3.bf16.msra.mxu0 %v6379_v48  ;;  %v6429_v48 = vld [vmem:[%s6585_s20 + $0xa8] sm:$0xff]  }
  0x9a   : > { %5875 = vmatprep.subr.bf16.mxu0 %v6385_v52  ;;  %v6433_v51 = vld [vmem:[%s6585_s20 + $0x188] sm:$0xff]  }
  0x9d   : > { %5876 = vmatpush3.bf16.msra.mxu0 %v6385_v52  ;;  %v6476_v52 = vld [vmem:[%s7089_s1 + $0x110] sm:$0xff]  }
  0x9e   : > { %5877 = vmatprep.subr.bf16.mxu0 %v6391_v54 }
  0x9f   : > { %5622 = vmatmul.mubr.bf16.gmra.mrb[28].mxu1 %v6370_v53  ;;  %v6477_v53 = vld [vmem:[%s7089_s1 + $0x118] sm:$0xff]  }
  0xa0   : > { %5846 = vmatmul.mubr.bf16.gmra.mrb[12].mxu0 %v6372_v55  ;;  %5641 = vmatprep.mubr.bf16.mxu1 %v6374_v56  ;;  %v6435_v55 = vld [vmem:[%s6585_s20 + $0x190] sm:$0xff]   ;;  %v6437_v56 = vld [vmem:[%s6585_s20 + $0xc0] sm:$0xff]  }
  0xa1   : > { %5849 = vmatprep.mubr.bf16.mxu0 %v6375_v57  ;;  %5878 = vmatpush3.bf16.msra.mxu0 %v6391_v54  ;;  %v6434_v54 = vld [vmem:[%s6585_s20 + $0xb8] sm:$0xff]  }
  0xa2   : > { %5879 = vmatprep.subr.bf16.mxu0 %v6397_v58  ;;  %v6438_v57 = vld [vmem:[%s6585_s20 + $0x198] sm:$0xff]  }
  0xa5   : > { %5880 = vmatpush3.bf16.msra.mxu0 %v6397_v58  ;;  %v6478_v58 = vld [vmem:[%s7089_s1 + $0x120] sm:$0xff]  }
  0xa6   : > { %5913 = vmatprep.subr.bf16.mxu0 %v6801_v60 }
  0xa7   : > { %5642 = vmatmul.mubr.bf16.vlgmr.msra.gmra.mrb[0].mxu1 %v6376_v59  ;;  %v6479_v59 = vld [vmem:[%s7089_s1 + $0x128] sm:$0xff]  }
  0xa8   : > { %5850 = vmatmul.mubr.bf16.gmra.mrb[16].mxu0 %v6378_v61  ;;  %5674 = vmatpush3.bf16.msra.mxu1 %v6758_v36  ;;  %v6431_v36 = vld [vmem:[%s7089_s1 + $0x228] sm:$0xff]   ;;  %v6440_v61 = vld [vmem:[%s6585_s20 + $0x1a0] sm:$0xff]  }
  0xa9   : > { %5645 = vmatprep.mubr.bf16.mxu1 %v6380_v62  ;;  %5853 = vmatprep.mubr.bf16.mxu0 %v6381_v63  ;;  %v6442_v62 = vld [vmem:[%s6585_s20 + $0xd0] sm:$0xff]  }
  0xaa   : > { %5675 = vmatprep.subr.bf16.mxu1 %v6383_v0  ;;  %v6443_v63 = vld [vmem:[%s6585_s20 + $0x130] sm:$0xff]  }
  0xac   : > { %5676 = vmatpush3.bf16.msra.mxu1 %v6383_v0  ;;  %v6480_v0 = vld [vmem:[%s7089_s1 + $0x130] sm:$0xff]  }
  0xad   : > { %5677 = vmatprep.subr.bf16.mxu1 %v6389_v1 }
  0xaf   : > { %5646 = vmatmul.mubr.bf16.gmra.mrb[4].mxu1 %v6382_v2  ;;  %v6444_v2 = vld [vmem:[%s6585_s20 + $0xd8] sm:$0xff]  }
  0xb0   : > { %5854 = vmatmul.mubr.bf16.gmra.mrb[20].mxu0 %v6384_v3  ;;  %5649 = vmatprep.mubr.bf16.mxu1 %v6386_v4  ;;  %v6445_v3 = vld [vmem:[%s6585_s20 + $0x138] sm:$0xff]   ;;  %v6446_v4 = vld [vmem:[%s6585_s20 + $0xe0] sm:$0xff]  }
  0xb1   : > { %5857 = vmatprep.mubr.bf16.mxu0 %v6387_v5  ;;  %5678 = vmatpush3.bf16.msra.mxu1 %v6389_v1  ;;  %v6481_v1 = vld [vmem:[%s7089_s1 + $0x138] sm:$0xff]   ;;  %v6447_v5 = vld [vmem:[%s6585_s20 + $0x140] sm:$0xff]  }
  0xb2   : > { %5679 = vmatprep.subr.bf16.mxu1 %v6395_v6 }
  0xb5   : > { %5680 = vmatpush3.bf16.msra.mxu1 %v6395_v6  ;;  %v6448_v6 = vld [vmem:[%s6585_s20 + $0xe8] sm:$0xff]  }
  0xb6   : > { %5681 = vmatprep.subr.bf16.mxu1 %v6401_v8 }
  0xb7   : > { %5650 = vmatmul.mubr.bf16.gmra.mrb[8].mxu1 %v6388_v7  ;;  %v6449_v7 = vld [vmem:[%s6585_s20 + $0x148] sm:$0xff]  }
  0xb8   : > { %5858 = vmatmul.mubr.bf16.gmra.mrb[24].mxu0 %v6390_v9  ;;  %5653 = vmatprep.mubr.bf16.mxu1 %v6392_v10  ;;  %v6451_v9 = vld [vmem:[%s6585_s20 + $0x150] sm:$0xff]   ;;  %v6452_v10 = vld [vmem:[%s6585_s20 + $0xf8] sm:$0xff]  }
  0xb9   : > { %5861 = vmatprep.mubr.bf16.mxu0 %v6393_v11  ;;  %5682 = vmatpush3.bf16.msra.mxu1 %v6401_v8  ;;  %v6450_v8 = vld [vmem:[%s6585_s20 + $0xf0] sm:$0xff]   ;;  %v6453_v11 = vld [vmem:[%s6585_s20 + $0x158] sm:$0xff]  }
  0xba   : > { %5683 = vmatprep.subr.bf16.mxu1 %v6407_v12 }
  0xbd   : > { %5684 = vmatpush3.bf16.msra.mxu1 %v6407_v12  ;;  %v6454_v12 = vld [vmem:[%s6585_s20 + $0x100] sm:$0xff]  }
  0xbe   : > { %5685 = vmatprep.subr.bf16.mxu1 %v6413_v14 }
  0xbf   : > { %5654 = vmatmul.mubr.bf16.gmra.mrb[12].mxu1 %v6394_v13  ;;  %v6455_v13 = vld [vmem:[%s6585_s20 + $0x160] sm:$0xff]  }
  0xc0   : > { %5862 = vmatmul.mubr.bf16.gmra.mrb[28].mxu0 %v6396_v15  ;;  %5657 = vmatprep.mubr.bf16.mxu1 %v6398_v16  ;;  %v6457_v15 = vld [vmem:[%s6585_s20 + $0x168] sm:$0xff]   ;;  %v6458_v16 = vld [vmem:[%s6585_s20 + $0xd8] sm:$0xff]  }
  0xc1   : > { %5881 = vmatprep.mubr.bf16.mxu0 %v6399_v17  ;;  %5686 = vmatpush3.bf16.msra.mxu1 %v6413_v14  ;;  %v6456_v14 = vld [vmem:[%s6585_s20 + $0x108] sm:$0xff]   ;;  %v6459_v17 = vld [vmem:[%s6585_s20 + $0x170] sm:$0xff]  }
  0xc2   : > { %5687 = vmatprep.subr.bf16.mxu1 %v6419_v18 }
  0xc5   : > { %5688 = vmatpush3.bf16.msra.mxu1 %v6419_v18  ;;  %v6460_v18 = vld [vmem:[%s6585_s20 + $0xe0] sm:$0xff]  }
  0xc6   : > { %5961 = vmatprep.subr.bf16.mxu1 %v6474_v24 }
  0xc7   : > { %5658 = vmatmul.mubr.bf16.gmra.mrb[16].mxu1 %v6400_v19  ;;  %v6461_v19 = vld [vmem:[%s6585_s20 + $0x178] sm:$0xff]  }
  0xc8   : > { %5882 = vmatmul.mubr.bf16.vlgmr.msra.gmra.mrb[0].mxu0 %v6402_v20  ;;  %5661 = vmatprep.mubr.bf16.mxu1 %v6404_v21  ;;  %v6462_v20 = vld [vmem:[%s6585_s20 + $0xe8] sm:$0xff]   ;;  %v6463_v21 = vld [vmem:[%s6585_s20 + $0x180] sm:$0xff]  }
  0xc9   : > { %5914 = vmatpush3.bf16.msra.mxu0 %v6801_v60  ;;  %5885 = vmatprep.mubr.bf16.mxu0 %v6405_v22  ;;  %v6439_v60 = vld [vmem:[%s6585_s20 + $0xc8] sm:$0xff]   ;;  %v6464_v22 = vld [vmem:[%s6585_s20 + $0xf0] sm:$0xff]  }
  0xca   : > { %5915 = vmatprep.subr.bf16.mxu0 %v6409_v23 }
  0xcd   : > { %5916 = vmatpush3.bf16.msra.mxu0 %v6409_v23  ;;  %v6465_v23 = vld [vmem:[%s6585_s20 + $0x188] sm:$0xff]  }
  0xce   : > { %5917 = vmatprep.subr.bf16.mxu0 %v6415_v26 }
  0xcf   : > { %5662 = vmatmul.mubr.bf16.gmra.mrb[20].mxu1 %v6406_v25  ;;  %v6467_v25 = vld [vmem:[%s6585_s20 + $0x190] sm:$0xff]  }
  0xd0   : > { %5886 = vmatmul.mubr.bf16.gmra.mrb[4].mxu0 %v6408_v27  ;;  %5665 = vmatprep.mubr.bf16.mxu1 %v6410_v28  ;;  %v6469_v27 = vld [vmem:[%s6585_s20 + $0x198] sm:$0xff]   ;;  %v6470_v28 = vld [vmem:[%s6585_s20 + $0x108] sm:$0xff]  }
  0xd1   : > { %5889 = vmatprep.mubr.bf16.mxu0 %v6411_v29  ;;  %5918 = vmatpush3.bf16.msra.mxu0 %v6415_v26  ;;  %v6468_v26 = vld [vmem:[%s6585_s20 + $0x100] sm:$0xff]  }
  0xd2   : > { %5919 = vmatprep.subr.bf16.mxu0 %v6421_v30  ;;  %v6471_v29 = vld [vmem:[%s6585_s20 + $0x1a0] sm:$0xff]  }
  0xd5   : > { %5920 = vmatpush3.bf16.msra.mxu0 %v6421_v30  ;;  %v6472_v30 = vld [vmem:[%s6585_s20 + $0x110] sm:$0xff]  }
  0xd6   : > { %5921 = vmatprep.subr.bf16.mxu0 %v6426_v32 }
  0xd7   : > { %5666 = vmatmul.mubr.bf16.gmra.mrb[24].mxu1 %v6412_v31  ;;  %v6473_v31 = vld [vmem:[%s6585_s20 + $0x1a8] sm:$0xff]  }
  0xd8   : > { %5890 = vmatmul.mubr.bf16.gmra.mrb[8].mxu0 %v6414_v33  ;;  %5669 = vmatprep.mubr.bf16.mxu1 %v6416_v34 }
  0xd9   : > { %5893 = vmatprep.mubr.bf16.mxu0 %v6417_v35  ;;  %5922 = vmatpush3.bf16.msra.mxu0 %v6426_v32 }
  0xda   : > { %5923 = vmatprep.subr.bf16.mxu0 %v6431_v36 }
  0xdd   : > { %5924 = vmatpush3.bf16.msra.mxu0 %v6431_v36 }
  0xde   : > { %5925 = vmatprep.subr.bf16.mxu0 %v6436_v38 }
  0xdf   : > { %5670 = vmatmul.mubr.bf16.gmra.mrb[28].mxu1 %v6418_v37 }
  0xe0   : > { %5894 = vmatmul.mubr.bf16.gmra.mrb[12].mxu0 %v6420_v39  ;;  %5689 = vmatprep.mubr.bf16.mxu1 %v6422_v40 }
  0xe1   : > { %5897 = vmatprep.mubr.bf16.mxu0 %v6423_v41  ;;  %5926 = vmatpush3.bf16.msra.mxu0 %v6436_v38 }
  0xe2   : > { %5927 = vmatprep.subr.bf16.mxu0 %v6441_v42 }
  0xe5   : > { %5928 = vmatpush3.bf16.msra.mxu0 %v6441_v42 }
  0xe7   : > { %5690 = vmatmul.mubr.bf16.vlgmr.msra.gmra.mrb[0].mxu1 %v6424_v43 }
  0xe8   : > { %5898 = vmatmul.mubr.bf16.gmra.mrb[16].mxu0 %v6425_v44  ;;  %5969 = vmatpush3.bf16.msra.mxu1 %v6474_v24  ;;  %v6466_v24 = vld [vmem:[%s6585_s20 + $0xf8] sm:$0xff]  }
  0xe9   : > { %5693 = vmatprep.mubr.bf16.mxu1 %v6427_v45  ;;  %5901 = vmatprep.mubr.bf16.mxu0 %v6428_v46 }
  0xea   : > { %5962 = vmatprep.subr.bf16.mxu1 %v6475_v47 }
  0xec   : > { %5970 = vmatpush3.bf16.msra.mxu1 %v6475_v47 }
  0xed   : > { %5963 = vmatprep.subr.bf16.mxu1 %v6476_v52 }
  0xef   : > { %5694 = vmatmul.mubr.bf16.gmra.mrb[4].mxu1 %v6429_v48 }
  0xf0   : > { %5902 = vmatmul.mubr.bf16.gmra.mrb[20].mxu0 %v6430_v49  ;;  %5697 = vmatprep.mubr.bf16.mxu1 %v6432_v50  ;;  %v6964_v49 = vld [vmem:[%s7090_s2] ss:$0 sm:$0xff] }
  0xf1   : > { %5905 = vmatprep.mubr.bf16.mxu0 %v6433_v51  ;;  %5971 = vmatpush3.bf16.msra.mxu1 %v6476_v52  ;;  %v6969_v52 = vld [vmem:[%s7091_s3] ss:$0 sm:$0xff] }
  0xf2   : > { %5964 = vmatprep.subr.bf16.mxu1 %v6477_v53 }
  0xf5   : > { %5972 = vmatpush3.bf16.msra.mxu1 %v6477_v53 }
  0xf6   : > { %5965 = vmatprep.subr.bf16.mxu1 %v6478_v58 }
  0xf7   : > { %5698 = vmatmul.mubr.bf16.gmra.mrb[8].mxu1 %v6434_v54 }
  0xf8   : > { %5906 = vmatmul.mubr.bf16.gmra.mrb[24].mxu0 %v6435_v55  ;;  %5701 = vmatprep.mubr.bf16.mxu1 %v6437_v56 }
  0xf9   : > { %5909 = vmatprep.mubr.bf16.mxu0 %v6438_v57  ;;  %5973 = vmatpush3.bf16.msra.mxu1 %v6478_v58 }
  0xfa   : > { %5966 = vmatprep.subr.bf16.mxu1 %v6479_v59 }
  0xfd   : > { %5974 = vmatpush3.bf16.msra.mxu1 %v6479_v59 }
  0xfe   : > { %5967 = vmatprep.subr.bf16.mxu1 %v6480_v0 }
  0xff   : > { %5702 = vmatmul.mubr.bf16.gmra.mrb[12].mxu1 %v6439_v60 }
 0x100   : > { %5910 = vmatmul.mubr.bf16.gmra.mrb[28].mxu0 %v6440_v61  ;;  %5705 = vmatprep.mubr.bf16.mxu1 %v6442_v62 }
 0x101   : > { %5929 = vmatprep.mubr.bf16.mxu0 %v6443_v63  ;;  %5975 = vmatpush3.bf16.msra.mxu1 %v6480_v0 }
 0x102   : > { %5968 = vmatprep.subr.bf16.mxu1 %v6481_v1 }
 0x105   : > { %5976 = vmatpush3.bf16.msra.mxu1 %v6481_v1 }
 0x107   : > { %5706 = vmatmul.mubr.bf16.gmra.mrb[16].mxu1 %v6444_v2 }
 0x108   : > { %5930 = vmatmul.mubr.bf16.vlgmr.msra.gmra.mrb[0].mxu0 %v6445_v3  ;;  %5709 = vmatprep.mubr.bf16.mxu1 %v6446_v4 }
 0x109   : > { %5933 = vmatprep.mubr.bf16.mxu0 %v6447_v5 }
 0x10f   : > { %5710 = vmatmul.mubr.bf16.gmra.mrb[20].mxu1 %v6448_v6 }
 0x110   : > { %5934 = vmatmul.mubr.bf16.gmra.mrb[4].mxu0 %v6449_v7  ;;  %5713 = vmatprep.mubr.bf16.mxu1 %v6450_v8 }
 0x111   : > { %5937 = vmatprep.mubr.bf16.mxu0 %v6451_v9 }
 0x117   : > { %5714 = vmatmul.mubr.bf16.gmra.mrb[24].mxu1 %v6452_v10 }
 0x118   : > { %5938 = vmatmul.mubr.bf16.gmra.mrb[8].mxu0 %v6453_v11  ;;  %5717 = vmatprep.mubr.bf16.mxu1 %v6454_v12 }
 0x119   : > { %5941 = vmatprep.mubr.bf16.mxu0 %v6455_v13 }
 0x11f   : > { %5718 = vmatmul.mubr.bf16.gmra.mrb[28].mxu1 %v6456_v14 }
 0x120   : > { %5942 = vmatmul.mubr.bf16.gmra.mrb[12].mxu0 %v6457_v15  ;;  %5753 = vmatprep.mubr.bf16.mxu1 %v6458_v16 }
 0x121   : > { %5945 = vmatprep.mubr.bf16.mxu0 %v6459_v17 }
 0x127   : > { %5754 = vmatmul.mubr.bf16.vlgmr.msra.gmra.mrb[16].mxu1 %v6460_v18 }
 0x128   : > { %5946 = vmatmul.mubr.bf16.gmra.mrb[16].mxu0 %v6461_v19  ;;  %5757 = vmatprep.mubr.bf16.mxu1 %v6462_v20 }
 0x129   : > { %5949 = vmatprep.mubr.bf16.mxu0 %v6463_v21 }
 0x12f   : > { %5758 = vmatmul.mubr.bf16.gmra.mrb[20].mxu1 %v6464_v22 }
 0x130   : > { %5950 = vmatmul.mubr.bf16.gmra.mrb[20].mxu0 %v6465_v23  ;;  %5761 = vmatprep.mubr.bf16.mxu1 %v6466_v24 }
 0x131   : > { %5953 = vmatprep.mubr.bf16.mxu0 %v6467_v25 }
 0x137   : > { %5762 = vmatmul.mubr.bf16.gmra.mrb[24].mxu1 %v6468_v26 }
 0x138   : > { %5954 = vmatmul.mubr.bf16.gmra.mrb[24].mxu0 %v6469_v27  ;;  %5765 = vmatprep.mubr.bf16.mxu1 %v6470_v28 }
 0x139   : > { %5957 = vmatprep.mubr.bf16.mxu0 %v6471_v29 }
 0x13f   : > { %5766 = vmatmul.mubr.bf16.gmra.mrb[28].mxu1 %v6472_v30 }
 0x140   : > { %5958 = vmatmul.mubr.bf16.gmra.mrb[28].mxu0 %v6473_v31 }
 0x1ba   : > { %v5691_v32 = vpop.f32.mrb[0].mxu1 }
 0x1bb   : > { %v1945_v33 = vpop.f32.mrb[1].mxu1 }
 0x1bc   : > { %v5692_v34 = vpop.f32.mrb[2].mxu1 }
 0x1bd   : > { %v1948_v35 = vpop.f32.mrb[3].mxu1 }
 0x1c2   : > { %v5695_v36 = vpop.f32.mrb[4].mxu1 }
 0x1c3   : > { %v1961_v37 = vpop.f32.mrb[5].mxu1 }
 0x1c4   : > { %v5696_v38 = vpop.f32.mrb[6].mxu1 }
 0x1c5   : > { %v1964_v39 = vpop.f32.mrb[7].mxu1 }
 0x1ca   : > { %v5699_v40 = vpop.f32.mrb[8].mxu1 }
 0x1cb   : > { %v1977_v41 = vpop.f32.mrb[9].mxu1 }
 0x1cc   : > { %v6949_v42 = vpop.f32.mrb[10].mxu1 }
 0x1cd   : > { %v6951_v43 = vpop.f32.mrb[11].mxu1 }
 0x1d2   : > { %v6953_v44 = vpop.f32.mrb[12].mxu1 }
 0x1d3   : > { %v6955_v45 = vpop.f32.mrb[13].mxu1 }
 0x1d4   : > { %v6957_v46 = vpop.f32.mrb[14].mxu1 }
 0x1d5   : > { %v6959_v47 = vpop.f32.mrb[15].mxu1 }
 0x1db   : > { %v5931_v48 = vpop.f32.mrb[0].mxu0 }
 0x1dc   : > { %v5977_v50 = vadd.f32 %v5931_v48, %v5691_v32  ;;  %v4200_v51 = vpop.f32.mrb[1].mxu0 }
 0x1dd   : > { %v5978_v53 = vadd.f32 %v4200_v51, %v1945_v33  ;;  %v5932_v54 = vpop.f32.mrb[2].mxu0 }
 0x1de   : > { %v4435_v55 = vmul.f32 %v5977_v50, %v6964_v49  ;;  %v5979_v56 = vadd.f32 %v5932_v54, %v5692_v34  ;;  %v4203_v57 = vpop.f32.mrb[3].mxu0 }
 0x1df   : > { %v4433_v58 = vmul.f32 %v5978_v53, %v6964_v49  ;;  %v5980_v59 = vadd.f32 %v4203_v57, %v1948_v35 }
 0x1e0   : > { %v4474_v60 = vadd.f32 %v6969_v52, %v4435_v55  ;;  %v4436_v61 = vmul.f32 %v5979_v56, %v6964_v49 }
 0x1e1   : > { %v4472_v62 = vadd.f32 %v6969_v52, %v4433_v58  ;;  %v4434_v63 = vmul.f32 %v5980_v59, %v6964_v49 }
 0x1e2   : > { %v4506_v0 = vmax.f32 %v4474_v60, 0.0  ;;  %v4475_v1 = vadd.f32 %v6969_v52, %v4436_v61 }
 0x1e3   : > { %v4504_v2 = vmax.f32 %v4472_v62, 0.0  ;;  %v4473_v3 = vadd.f32 %v6969_v52, %v4434_v63  ;;  %v5935_v4 = vpop.f32.mrb[4].mxu0 }
 0x1e4   : > { %4538 = vst [vmem:[%s6979_s19 + $0x10] sm:$0xff] %v4506_v0  ;;  %v4507_v5 = vmax.f32 %v4475_v1, 0.0  ;;  %v5981_v6 = vadd.f32 %v5935_v4, %v5695_v36  ;;  %v4216_v7 = vpop.f32.mrb[5].mxu0 }
 0x1e5   : > { %4536 = vst [vmem:[%s6979_s19] sm:$0xff] %v4504_v2  ;;  %v4505_v8 = vmax.f32 %v4473_v3, 0.0  ;;  %v5982_v9 = vadd.f32 %v4216_v7, %v1961_v37  ;;  %v5936_v10 = vpop.f32.mrb[6].mxu0 }
 0x1e6   : > { %4539 = vst [vmem:[%s6979_s19 + $0x18] sm:$0xff] %v4507_v5  ;;  %v4439_v11 = vmul.f32 %v5981_v6, %v6964_v49  ;;  %v5983_v12 = vadd.f32 %v5936_v10, %v5696_v38  ;;  %v4219_v13 = vpop.f32.mrb[7].mxu0 }
 0x1e7   : > { %4537 = vst [vmem:[%s6979_s19 + $0x8] sm:$0xff] %v4505_v8  ;;  %v4437_v14 = vmul.f32 %v5982_v9, %v6964_v49  ;;  %v5984_v15 = vadd.f32 %v4219_v13, %v1964_v39 }
 0x1e8   : > { %v4478_v16 = vadd.f32 %v6969_v52, %v4439_v11  ;;  %v4440_v17 = vmul.f32 %v5983_v12, %v6964_v49 }
 0x1e9   : > { %v4476_v18 = vadd.f32 %v6969_v52, %v4437_v14  ;;  %v4438_v19 = vmul.f32 %v5984_v15, %v6964_v49 }
 0x1ea   : > { %v4510_v20 = vmax.f32 %v4478_v16, 0.0  ;;  %v4479_v21 = vadd.f32 %v6969_v52, %v4440_v17 }
 0x1eb   : > { %v4508_v22 = vmax.f32 %v4476_v18, 0.0  ;;  %v4477_v23 = vadd.f32 %v6969_v52, %v4438_v19  ;;  %v5939_v24 = vpop.f32.mrb[8].mxu0 }
 0x1ec   : > { %4542 = vst [vmem:[%s6979_s19 + $0x30] sm:$0xff] %v4510_v20  ;;  %v4511_v25 = vmax.f32 %v4479_v21, 0.0  ;;  %v5985_v26 = vadd.f32 %v5939_v24, %v5699_v40  ;;  %v4232_v27 = vpop.f32.mrb[9].mxu0 }
 0x1ed   : > { %4540 = vst [vmem:[%s6979_s19 + $0x20] sm:$0xff] %v4508_v22  ;;  %v4509_v28 = vmax.f32 %v4477_v23, 0.0  ;;  %v5986_v29 = vadd.f32 %v4232_v27, %v1977_v41  ;;  %v5940_v30 = vpop.f32.mrb[10].mxu0 }
 0x1ee   : > { %4543 = vst [vmem:[%s6979_s19 + $0x38] sm:$0xff] %v4511_v25  ;;  %v4443_v31 = vmul.f32 %v5985_v26, %v6964_v49  ;;  %v5987_v32 = vadd.f32 %v5940_v30, %v6949_v42  ;;  %v4235_v33 = vpop.f32.mrb[11].mxu0 }
 0x1ef   : > { %4541 = vst [vmem:[%s6979_s19 + $0x28] sm:$0xff] %v4509_v28  ;;  %v4441_v34 = vmul.f32 %v5986_v29, %v6964_v49  ;;  %v5988_v35 = vadd.f32 %v4235_v33, %v6951_v43 }
 0x1f0   : > { %v4482_v36 = vadd.f32 %v6969_v52, %v4443_v31  ;;  %v4444_v37 = vmul.f32 %v5987_v32, %v6964_v49 }
 0x1f1   : > { %v4480_v38 = vadd.f32 %v6969_v52, %v4441_v34  ;;  %v4442_v39 = vmul.f32 %v5988_v35, %v6964_v49 }
 0x1f2   : > { %v4514_v40 = vmax.f32 %v4482_v36, 0.0  ;;  %v4483_v41 = vadd.f32 %v6969_v52, %v4444_v37 }
 0x1f3   : > { %v4512_v42 = vmax.f32 %v4480_v38, 0.0  ;;  %v4481_v48 = vadd.f32 %v6969_v52, %v4442_v39  ;;  %v5943_v50 = vpop.f32.mrb[12].mxu0 }
 0x1f4   : > { %4546 = vst [vmem:[%s6979_s19 + $0x50] sm:$0xff] %v4514_v40  ;;  %v4515_v51 = vmax.f32 %v4483_v41, 0.0  ;;  %v5989_v43 = vadd.f32 %v5943_v50, %v6953_v44  ;;  %v4248_v53 = vpop.f32.mrb[13].mxu0 }
 0x1f5   : > { %4544 = vst [vmem:[%s6979_s19 + $0x40] sm:$0xff] %v4512_v42  ;;  %v4513_v54 = vmax.f32 %v4481_v48, 0.0  ;;  %v5990_v55 = vadd.f32 %v4248_v53, %v6955_v45  ;;  %v5944_v56 = vpop.f32.mrb[14].mxu0 }
 0x1f6   : > { %4547 = vst [vmem:[%s6979_s19 + $0x58] sm:$0xff] %v4515_v51  ;;  %v4447_v57 = vmul.f32 %v5989_v43, %v6964_v49  ;;  %v5991_v58 = vadd.f32 %v5944_v56, %v6957_v46  ;;  %v4251_v59 = vpop.f32.mrb[15].mxu0 }
 0x1f7   : > { %4545 = vst [vmem:[%s6979_s19 + $0x48] sm:$0xff] %v4513_v54  ;;  %v4445_v60 = vmul.f32 %v5990_v55, %v6964_v49  ;;  %v5992_v61 = vadd.f32 %v4251_v59, %v6959_v47 }
 0x1f8   : > { %v4486_v44 = vadd.f32 %v6969_v52, %v4447_v57  ;;  %v4448_v62 = vmul.f32 %v5991_v58, %v6964_v49 }
 0x1f9   : > { %v4484_v45 = vadd.f32 %v6969_v52, %v4445_v60  ;;  %v4446_v63 = vmul.f32 %v5992_v61, %v6964_v49 }
 0x1fa   : > { %v4518_v0 = vmax.f32 %v4486_v44, 0.0  ;;  %v4487_v1 = vadd.f32 %v6969_v52, %v4448_v62  ;;  %v5755_v46 = vpop.f32.mrb[16].mxu1 }
 0x1fb   : > { %v4516_v2 = vmax.f32 %v4484_v45, 0.0  ;;  %v4485_v3 = vadd.f32 %v6969_v52, %v4446_v63  ;;  %v5947_v4 = vpop.f32.mrb[16].mxu0  ;;  %v2460_v47 = vpop.f32.mrb[17].mxu1 }
 0x1fc   : > { %4550 = vst [vmem:[%s6979_s19 + $0x70] sm:$0xff] %v4518_v0  ;;  %v4519_v5 = vmax.f32 %v4487_v1, 0.0  ;;  %v5993_v6 = vadd.f32 %v5947_v4, %v5755_v46  ;;  %v4264_v7 = vpop.f32.mrb[17].mxu0  ;;  %v5756_v8 = vpop.f32.mrb[18].mxu1 }
 0x1fd   : > { %4548 = vst [vmem:[%s6979_s19 + $0x60] sm:$0xff] %v4516_v2  ;;  %v4517_v9 = vmax.f32 %v4485_v3, 0.0  ;;  %v5994_v10 = vadd.f32 %v4264_v7, %v2460_v47  ;;  %v5948_v11 = vpop.f32.mrb[18].mxu0  ;;  %v2463_v12 = vpop.f32.mrb[19].mxu1 }
 0x1fe   : > { %4551 = vst [vmem:[%s6979_s19 + $0x78] sm:$0xff] %v4519_v5  ;;  %v4451_v13 = vmul.f32 %v5993_v6, %v6964_v49  ;;  %v5995_v14 = vadd.f32 %v5948_v11, %v5756_v8  ;;  %v4267_v15 = vpop.f32.mrb[19].mxu0 }
 0x1ff   : > { %4549 = vst [vmem:[%s6979_s19 + $0x68] sm:$0xff] %v4517_v9  ;;  %v4449_v16 = vmul.f32 %v5994_v10, %v6964_v49  ;;  %v5996_v17 = vadd.f32 %v4267_v15, %v2463_v12 }
 0x200   : > { %v4490_v18 = vadd.f32 %v6969_v52, %v4451_v13  ;;  %v4452_v19 = vmul.f32 %v5995_v14, %v6964_v49 }
 0x201   : > { %v4488_v20 = vadd.f32 %v6969_v52, %v4449_v16  ;;  %v4450_v21 = vmul.f32 %v5996_v17, %v6964_v49 }
 0x202   : > { %v4522_v22 = vmax.f32 %v4490_v18, 0.0  ;;  %v4491_v23 = vadd.f32 %v6969_v52, %v4452_v19  ;;  %v5759_v24 = vpop.f32.mrb[20].mxu1 }
 0x203   : > { %v4520_v25 = vmax.f32 %v4488_v20, 0.0  ;;  %v4489_v26 = vadd.f32 %v6969_v52, %v4450_v21  ;;  %v5951_v27 = vpop.f32.mrb[20].mxu0  ;;  %v2476_v28 = vpop.f32.mrb[21].mxu1 }
 0x204   : > { %4554 = vst [vmem:[%s6979_s19 + $0x90] sm:$0xff] %v4522_v22  ;;  %v4523_v29 = vmax.f32 %v4491_v23, 0.0  ;;  %v5997_v30 = vadd.f32 %v5951_v27, %v5759_v24  ;;  %v4280_v31 = vpop.f32.mrb[21].mxu0  ;;  %v5760_v32 = vpop.f32.mrb[22].mxu1 }
 0x205   : > { %4552 = vst [vmem:[%s6979_s19 + $0x80] sm:$0xff] %v4520_v25  ;;  %v4521_v33 = vmax.f32 %v4489_v26, 0.0  ;;  %v5998_v34 = vadd.f32 %v4280_v31, %v2476_v28  ;;  %v5952_v35 = vpop.f32.mrb[22].mxu0  ;;  %v2479_v36 = vpop.f32.mrb[23].mxu1 }
 0x206   : > { %4555 = vst [vmem:[%s6979_s19 + $0x98] sm:$0xff] %v4523_v29  ;;  %v4455_v37 = vmul.f32 %v5997_v30, %v6964_v49  ;;  %v5999_v38 = vadd.f32 %v5952_v35, %v5760_v32  ;;  %v4283_v39 = vpop.f32.mrb[23].mxu0 }
 0x207   : > { %4553 = vst [vmem:[%s6979_s19 + $0x88] sm:$0xff] %v4521_v33  ;;  %v4453_v40 = vmul.f32 %v5998_v34, %v6964_v49  ;;  %v6000_v41 = vadd.f32 %v4283_v39, %v2479_v36 }
 0x208   : > { %v4494_v42 = vadd.f32 %v6969_v52, %v4455_v37  ;;  %v4456_v48 = vmul.f32 %v5999_v38, %v6964_v49 }
 0x209   : > { %v4492_v50 = vadd.f32 %v6969_v52, %v4453_v40  ;;  %v4454_v51 = vmul.f32 %v6000_v41, %v6964_v49 }
 0x20a   : > { %v4526_v43 = vmax.f32 %v4494_v42, 0.0  ;;  %v4495_v53 = vadd.f32 %v6969_v52, %v4456_v48  ;;  %v5763_v54 = vpop.f32.mrb[24].mxu1 }
 0x20b   : > { %v4524_v55 = vmax.f32 %v4492_v50, 0.0  ;;  %v4493_v56 = vadd.f32 %v6969_v52, %v4454_v51  ;;  %v5955_v57 = vpop.f32.mrb[24].mxu0  ;;  %v2492_v58 = vpop.f32.mrb[25].mxu1 }
 0x20c   : > { %4558 = vst [vmem:[%s6979_s19 + $0xb0] sm:$0xff] %v4526_v43  ;;  %v4527_v59 = vmax.f32 %v4495_v53, 0.0  ;;  %v6001_v60 = vadd.f32 %v5955_v57, %v5763_v54  ;;  %v4296_v61 = vpop.f32.mrb[25].mxu0  ;;  %v5764_v44 = vpop.f32.mrb[26].mxu1 }
 0x20d   : > { %4556 = vst [vmem:[%s6979_s19 + $0xa0] sm:$0xff] %v4524_v55  ;;  %v4525_v62 = vmax.f32 %v4493_v56, 0.0  ;;  %v6002_v45 = vadd.f32 %v4296_v61, %v2492_v58  ;;  %v5956_v63 = vpop.f32.mrb[26].mxu0  ;;  %v2495_v0 = vpop.f32.mrb[27].mxu1 }
 0x20e   : > { %4559 = vst [vmem:[%s6979_s19 + $0xb8] sm:$0xff] %v4527_v59  ;;  %v4459_v1 = vmul.f32 %v6001_v60, %v6964_v49  ;;  %v6003_v46 = vadd.f32 %v5956_v63, %v5764_v44  ;;  %v4299_v2 = vpop.f32.mrb[27].mxu0 }
 0x20f   : > { %4557 = vst [vmem:[%s6979_s19 + $0xa8] sm:$0xff] %v4525_v62  ;;  %v4457_v3 = vmul.f32 %v6002_v45, %v6964_v49  ;;  %v6004_v4 = vadd.f32 %v4299_v2, %v2495_v0 }
 0x210   : > { %v4498_v47 = vadd.f32 %v6969_v52, %v4459_v1  ;;  %v4460_v5 = vmul.f32 %v6003_v46, %v6964_v49 }
 0x211   : > { %v4496_v6 = vadd.f32 %v6969_v52, %v4457_v3  ;;  %v4458_v7 = vmul.f32 %v6004_v4, %v6964_v49 }
 0x212   : > { %v4530_v8 = vmax.f32 %v4498_v47, 0.0  ;;  %v4499_v9 = vadd.f32 %v6969_v52, %v4460_v5  ;;  %v5767_v10 = vpop.f32.mrb[28].mxu1 }
 0x213   : > { %v4528_v11 = vmax.f32 %v4496_v6, 0.0  ;;  %v4497_v12 = vadd.f32 %v6969_v52, %v4458_v7  ;;  %v5959_v13 = vpop.f32.mrb[28].mxu0  ;;  %v2508_v14 = vpop.f32.mrb[29].mxu1 }
 0x214   : > { %4562 = vst [vmem:[%s6979_s19 + $0xd0] sm:$0xff] %v4530_v8  ;;  %v4531_v15 = vmax.f32 %v4499_v9, 0.0  ;;  %v6005_v16 = vadd.f32 %v5959_v13, %v5767_v10  ;;  %v4312_v17 = vpop.f32.mrb[29].mxu0  ;;  %v5768_v18 = vpop.f32.mrb[30].mxu1 }
 0x215   : > { %4560 = vst [vmem:[%s6979_s19 + $0xc0] sm:$0xff] %v4528_v11  ;;  %v4529_v19 = vmax.f32 %v4497_v12, 0.0  ;;  %v6006_v20 = vadd.f32 %v4312_v17, %v2508_v14  ;;  %v5960_v21 = vpop.f32.mrb[30].mxu0  ;;  %v2511_v22 = vpop.f32.mrb[31].mxu1 }
 0x216   : > { %4563 = vst [vmem:[%s6979_s19 + $0xd8] sm:$0xff] %v4531_v15  ;;  %v4463_v23 = vmul.f32 %v6005_v16, %v6964_v49  ;;  %v6007_v24 = vadd.f32 %v5960_v21, %v5768_v18  ;;  %v4315_v25 = vpop.f32.mrb[31].mxu0 }
 0x217   : > { %4561 = vst [vmem:[%s6979_s19 + $0xc8] sm:$0xff] %v4529_v19  ;;  %v4461_v26 = vmul.f32 %v6006_v20, %v6964_v49  ;;  %v6008_v27 = vadd.f32 %v4315_v25, %v2511_v22 }
 0x218   : > { %v4502_v28 = vadd.f32 %v6969_v52, %v4463_v23  ;;  %v4464_v29 = vmul.f32 %v6007_v24, %v6964_v49 }
 0x219   : > { %v4500_v30 = vadd.f32 %v6969_v52, %v4461_v26  ;;  %v4462_v31 = vmul.f32 %v6008_v27, %v6964_v49 }
 0x21a   : > { %v4534_v32 = vmax.f32 %v4502_v28, 0.0  ;;  %v4503_v33 = vadd.f32 %v6969_v52, %v4464_v29 }
 0x21b   : > { %v4532_v34 = vmax.f32 %v4500_v30, 0.0  ;;  %v4501_v35 = vadd.f32 %v6969_v52, %v4462_v31 }
 0x21c   : > { %4566 = vst [vmem:[%s6979_s19 + $0xf0] sm:$0xff] %v4534_v32  ;;  %v4535_v36 = vmax.f32 %v4503_v33, 0.0 }
 0x21d   : > { %4564 = vst [vmem:[%s6979_s19 + $0xe0] sm:$0xff] %v4532_v34  ;;  %v4533_v37 = vmax.f32 %v4501_v35, 0.0 }
 0x21e   : > { %4567 = vst [vmem:[%s6979_s19 + $0xf8] sm:$0xff] %v4535_v36 }
 0x21f   : > { %4565 = vst [vmem:[%s6979_s19 + $0xe8] sm:$0xff] %v4533_v37 }
 0x220 PF: > { %s14_s17 = sadd.s32 1, %s6504_s17   ;;  %s7093_s15 = smov %s6500_s16 }
 0x221   : > { %p11_p5 = scmp.ge.s32.totalorder %s14_s17, 4   ;;  %s7094_s16 = smov %s7096_s18 }
 0x223   :  { %13 = sbr.rel (!%p11_p5) target bundleno = 2 (0x2), region = 99 }

</bundles_post_ra>
